<compile_context>
chip_gen: v7x
topology: tpu7x:2x2x1
jax: 0.10.0
libtpu: 0.0.40
codegen_flags: <defaults>
</compile_context>

<pallas_src>
from functools import partial

import jax
import jax.numpy as jnp
from jax.experimental import pallas as pl
from jax.experimental.pallas import tpu as pltpu

N_HIDDEN = 9                    # number of 512->512 Linear+ReLU blocks after the first layer
D_IN, D_H, D_OUT = 784, 512, 10
D_IN_PAD = 896                  # 784 -> 7*128, lane-aligned K for the first matmul
D_OUT_PAD = 128                 # 10 -> 128, lane-dense output stores


def _round_up(n, m):
    return (n + m - 1) // m * m


def mlp_kernel(x_ref, w0_ref, b0_ref, wh_ref, bh_ref, wl_ref, bl_ref, o_ref):
    # Layer 0: bf16 @ bf16 -> f32 on the MXU, bias+ReLU in f32, cast back to bf16.
    h = jnp.dot(x_ref[...], w0_ref[...], preferred_element_type=jnp.float32)
    h = jnp.maximum(h + b0_ref[...], 0.0).astype(jnp.bfloat16)

    # 9 hidden 512x512 layers (static unroll; weights resident in VMEM across the grid).
    for i in range(N_HIDDEN):
        z = jnp.dot(h, wh_ref[i], preferred_element_type=jnp.float32)
        h = jnp.maximum(z + bh_ref[i], 0.0).astype(jnp.bfloat16)

    # Output layer (padded 10 -> 128 lanes) + softmax over the 10 real logits.
    y = jnp.dot(h, wl_ref[...], preferred_element_type=jnp.float32) + bl_ref[...]
    lane = jax.lax.broadcasted_iota(jnp.int32, y.shape, dimension=1)
    y = jnp.where(lane < D_OUT, y, -jnp.inf)            # mask padded logit lanes
    m = jnp.max(y, axis=-1, keepdims=True)
    e = jnp.exp(y - m)                                  # padded lanes -> exactly 0
    denom = jnp.sum(e, axis=-1, keepdims=True)
    o_ref[...] = e * pl.reciprocal(denom, approx=True)  # divide on the EUP slot


@partial(jax.jit, static_argnames=("tile_b",))
def net_v5_forward(x, params, *, tile_b=256):
    w0, b0, wh, bh, wl, bl = params
    B = x.shape[0]

    tb = min(tile_b, _round_up(B, 8))       # batch tile, sublane (8) aligned
    Bp = _round_up(B, tb)
    grid_b = Bp // tb

    # --- pad + cast operands: bf16 weights/activations, f32 biases & accumulation ---
    xp = jnp.zeros((Bp, D_IN_PAD), jnp.bfloat16).at[:B, :D_IN].set(x.astype(jnp.bfloat16))
    w0p = jnp.zeros((D_IN_PAD, D_H), jnp.bfloat16).at[:D_IN, :].set(w0.astype(jnp.bfloat16))
    whb = wh.astype(jnp.bfloat16)
    wlp = jnp.zeros((D_H, D_OUT_PAD), jnp.bfloat16).at[:, :D_OUT].set(wl.astype(jnp.bfloat16))
    blp = jnp.zeros((1, D_OUT_PAD), jnp.float32).at[:, :D_OUT].set(bl)

    const2 = lambda i: (0, 0)
    const3 = lambda i: (0, 0, 0)

    out = pl.pallas_call(
        mlp_kernel,
        out_shape=jax.ShapeDtypeStruct((Bp, D_OUT_PAD), jnp.float32),
        grid_spec=pltpu.PrefetchScalarGridSpec(
            num_scalar_prefetch=0,
            grid=(grid_b,),
            in_specs=[
                pl.BlockSpec((tb, D_IN_PAD), lambda i: (i, 0)),      # x   (batch-tiled)
                pl.BlockSpec((D_IN_PAD, D_H), const2),               # w0  (resident)
                pl.BlockSpec((1, D_H), const2),                      # b0  (resident)
                pl.BlockSpec((N_HIDDEN, D_H, D_H), const3),          # wh  (resident)
                pl.BlockSpec((N_HIDDEN, 1, D_H), const3),            # bh  (resident)
                pl.BlockSpec((D_H, D_OUT_PAD), const2),              # wl  (resident)
                pl.BlockSpec((1, D_OUT_PAD), const2),                # bl  (resident)
            ],
            out_specs=pl.BlockSpec((tb, D_OUT_PAD), lambda i: (i, 0)),
        ),
        compiler_params=pltpu.CompilerParams(
            dimension_semantics=("parallel",),     # shard batch tiles across TCs (v7x)
            vmem_limit_bytes=48 * 1024 * 1024,     # ~12 MB actual; < 64 MiB v7x physical
        ),
    )(xp, w0p, b0, whb, bh, wlp, blp)

    return out[:B, :D_OUT]


def init_params(key):
    """Deterministic synthetic init, PyTorch-Linear-style uniform(-1/sqrt(fan_in), +)."""
    keys = jax.random.split(key, 2 * (N_HIDDEN + 2))

    def lin(kw, kb, fan_in, fan_out):
        bound = 1.0 / (fan_in ** 0.5)
        w = jax.random.uniform(kw, (fan_in, fan_out), jnp.float32, -bound, bound)
        b = jax.random.uniform(kb, (1, fan_out), jnp.float32, -bound, bound)
        return w, b

    w0, b0 = lin(keys[0], keys[1], D_IN, D_H)                # (784,512), (1,512)
    whs, bhs = [], []
    for i in range(N_HIDDEN):
        w, b = lin(keys[2 + 2 * i], keys[3 + 2 * i], D_H, D_H)
        whs.append(w)
        bhs.append(b)
    wh = jnp.stack(whs)                                      # (9, 512, 512)
    bh = jnp.stack(bhs)                                      # (9, 1, 512)
    wl, bl = lin(keys[-2], keys[-1], D_H, D_OUT)             # (512, 10), (1, 10)
    return w0, b0, wh, bh, wl, bl


def reference_forward(x, params):
    """Pure-JAX reference mirroring the kernel's bf16-input / f32-accumulate path."""
    w0, b0, wh, bh, wl, bl = params

    def mm(a, w):
        return jax.lax.dot(a.astype(jnp.bfloat16), w.astype(jnp.bfloat16),
                           preferred_element_type=jnp.float32)

    h = jnp.maximum(mm(x, w0) + b0, 0.0)
    for i in range(N_HIDDEN):
        h = jnp.maximum(mm(h, wh[i]) + bh[i], 0.0)
    y = mm(h, wl) + bl
    return jax.nn.softmax(y, axis=1)


if __name__ == "__main__":
    key = jax.random.PRNGKey(0)
    k_x, k_p = jax.random.split(key)

    B = 32
    x = jax.random.normal(k_x, (B, D_IN), dtype=jnp.float32)
    params = init_params(k_p)

    # tile_b=8 -> 4 batch tiles, exercising the grid + resident-weight pipelining.
    out = net_v5_forward(x, params, tile_b=8)
    out = jax.block_until_ready(out)

    ref = reference_forward(x, params)
    assert out.shape == (B, D_OUT)
    assert bool(jnp.all(jnp.isfinite(out)))
    assert bool(jnp.allclose(jnp.sum(out, axis=1), 1.0, atol=1e-2))
    assert bool(jnp.allclose(out, ref, atol=2e-2, rtol=2e-2))

    print("KERNEL_OK")
</pallas_src>

<mosaic_0001>
module attributes {stable_mosaic.version = 11 : i64} {
  func.func @mlp_kernel(%arg0: i32, %arg1: memref<8x896xbf16, #tpu.memory_space<vmem>>, %arg2: memref<896x512xbf16, #tpu.memory_space<vmem>>, %arg3: memref<1x512xf32, #tpu.memory_space<vmem>>, %arg4: memref<9x512x512xbf16, #tpu.memory_space<vmem>>, %arg5: memref<9x1x512xf32, #tpu.memory_space<vmem>>, %arg6: memref<512x128xbf16, #tpu.memory_space<vmem>>, %arg7: memref<1x128xf32, #tpu.memory_space<vmem>>, %arg8: memref<8x128xf32, #tpu.memory_space<vmem>>) attributes {dimension_semantics = [#tpu.dimension_semantics<parallel>], iteration_bounds = array<i64: 4>, scalar_prefetch = 0 : i64, scratch_operands = 0 : i64, tpu.core_type = #tpu.core_type<tc>, window_params = [{transform_indices = @transform_0, window_bounds = array<i64: 8, 896>}, {pipeline_mode = #tpu.pipeline_mode<synchronous>, transform_indices = @transform_1, window_bounds = array<i64: 896, 512>}, {pipeline_mode = #tpu.pipeline_mode<synchronous>, transform_indices = @transform_2, window_bounds = array<i64: 1, 512>}, {pipeline_mode = #tpu.pipeline_mode<synchronous>, transform_indices = @transform_3, window_bounds = array<i64: 9, 512, 512>}, {pipeline_mode = #tpu.pipeline_mode<synchronous>, transform_indices = @transform_4, window_bounds = array<i64: 9, 1, 512>}, {pipeline_mode = #tpu.pipeline_mode<synchronous>, transform_indices = @transform_5, window_bounds = array<i64: 512, 128>}, {pipeline_mode = #tpu.pipeline_mode<synchronous>, transform_indices = @transform_6, window_bounds = array<i64: 1, 128>}, {transform_indices = @transform_7, window_bounds = array<i64: 8, 128>}]} {
    %c0 = arith.constant 0 : index
    %c0_0 = arith.constant 0 : index
    %0 = vector.load %arg1[%c0, %c0_0] : memref<8x896xbf16, #tpu.memory_space<vmem>>, vector<8x896xbf16>
    %c0_1 = arith.constant 0 : index
    %c0_2 = arith.constant 0 : index
    %1 = vector.load %arg2[%c0_1, %c0_2] : memref<896x512xbf16, #tpu.memory_space<vmem>>, vector<896x512xbf16>
    %cst = arith.constant dense<0.000000e+00> : vector<8x512xf32>
    %2 = tpu.matmul %0, %1, %cst {dimension_numbers = #tpu.dot_dimension_numbers<[1], [0], [0], [1], [0, 0, 1, 1], [], []>} : vector<8x896xbf16>, vector<896x512xbf16>, vector<8x512xf32> -> vector<8x512xf32>
    %c0_3 = arith.constant 0 : index
    %c0_4 = arith.constant 0 : index
    %3 = vector.load %arg3[%c0_3, %c0_4] : memref<1x512xf32, #tpu.memory_space<vmem>>, vector<1x512xf32>
    %4 = vector.broadcast %3 : vector<1x512xf32> to vector<8x512xf32>
    %5 = arith.addf %2, %4 : vector<8x512xf32>
    %cst_5 = arith.constant 0.000000e+00 : f32
    %6 = vector.broadcast %cst_5 : f32 to vector<8x512xf32>
    %7 = arith.maximumf %5, %6 : vector<8x512xf32>
    %8 = arith.truncf %7 : vector<8x512xf32> to vector<8x512xbf16>
    %c0_6 = arith.constant 0 : index
    %c0_7 = arith.constant 0 : index
    %c0_8 = arith.constant 0 : index
    %9 = vector.load %arg4[%c0_6, %c0_7, %c0_8] : memref<9x512x512xbf16, #tpu.memory_space<vmem>>, vector<1x512x512xbf16>
    %10 = vector.shape_cast %9 : vector<1x512x512xbf16> to vector<512x512xbf16>
    %cst_9 = arith.constant dense<0.000000e+00> : vector<8x512xf32>
    %11 = tpu.matmul %8, %10, %cst_9 {dimension_numbers = #tpu.dot_dimension_numbers<[1], [0], [0], [1], [0, 0, 1, 1], [], []>} : vector<8x512xbf16>, vector<512x512xbf16>, vector<8x512xf32> -> vector<8x512xf32>
    %c0_10 = arith.constant 0 : index
    %c0_11 = arith.constant 0 : index
    %c0_12 = arith.constant 0 : index
    %12 = vector.load %arg5[%c0_10, %c0_11, %c0_12] : memref<9x1x512xf32, #tpu.memory_space<vmem>>, vector<1x1x512xf32>
    %13 = vector.shape_cast %12 : vector<1x1x512xf32> to vector<1x512xf32>
    %14 = vector.broadcast %13 : vector<1x512xf32> to vector<8x512xf32>
    %15 = arith.addf %11, %14 : vector<8x512xf32>
    %cst_13 = arith.constant 0.000000e+00 : f32
    %16 = vector.broadcast %cst_13 : f32 to vector<8x512xf32>
    %17 = arith.maximumf %15, %16 : vector<8x512xf32>
    %18 = arith.truncf %17 : vector<8x512xf32> to vector<8x512xbf16>
    %c1 = arith.constant 1 : index
    %c0_14 = arith.constant 0 : index
    %c0_15 = arith.constant 0 : index
    %19 = vector.load %arg4[%c1, %c0_14, %c0_15] : memref<9x512x512xbf16, #tpu.memory_space<vmem>>, vector<1x512x512xbf16>
    %20 = vector.shape_cast %19 : vector<1x512x512xbf16> to vector<512x512xbf16>
    %cst_16 = arith.constant dense<0.000000e+00> : vector<8x512xf32>
    %21 = tpu.matmul %18, %20, %cst_16 {dimension_numbers = #tpu.dot_dimension_numbers<[1], [0], [0], [1], [0, 0, 1, 1], [], []>} : vector<8x512xbf16>, vector<512x512xbf16>, vector<8x512xf32> -> vector<8x512xf32>
    %c1_17 = arith.constant 1 : index
    %c0_18 = arith.constant 0 : index
    %c0_19 = arith.constant 0 : index
    %22 = vector.load %arg5[%c1_17, %c0_18, %c0_19] : memref<9x1x512xf32, #tpu.memory_space<vmem>>, vector<1x1x512xf32>
    %23 = vector.shape_cast %22 : vector<1x1x512xf32> to vector<1x512xf32>
    %24 = vector.broadcast %23 : vector<1x512xf32> to vector<8x512xf32>
    %25 = arith.addf %21, %24 : vector<8x512xf32>
    %cst_20 = arith.constant 0.000000e+00 : f32
    %26 = vector.broadcast %cst_20 : f32 to vector<8x512xf32>
    %27 = arith.maximumf %25, %26 : vector<8x512xf32>
    %28 = arith.truncf %27 : vector<8x512xf32> to vector<8x512xbf16>
    %c2 = arith.constant 2 : index
    %c0_21 = arith.constant 0 : index
    %c0_22 = arith.constant 0 : index
    %29 = vector.load %arg4[%c2, %c0_21, %c0_22] : memref<9x512x512xbf16, #tpu.memory_space<vmem>>, vector<1x512x512xbf16>
    %30 = vector.shape_cast %29 : vector<1x512x512xbf16> to vector<512x512xbf16>
    %cst_23 = arith.constant dense<0.000000e+00> : vector<8x512xf32>
    %31 = tpu.matmul %28, %30, %cst_23 {dimension_numbers = #tpu.dot_dimension_numbers<[1], [0], [0], [1], [0, 0, 1, 1], [], []>} : vector<8x512xbf16>, vector<512x512xbf16>, vector<8x512xf32> -> vector<8x512xf32>
    %c2_24 = arith.constant 2 : index
    %c0_25 = arith.constant 0 : index
    %c0_26 = arith.constant 0 : index
    %32 = vector.load %arg5[%c2_24, %c0_25, %c0_26] : memref<9x1x512xf32, #tpu.memory_space<vmem>>, vector<1x1x512xf32>
    %33 = vector.shape_cast %32 : vector<1x1x512xf32> to vector<1x512xf32>
    %34 = vector.broadcast %33 : vector<1x512xf32> to vector<8x512xf32>
    %35 = arith.addf %31, %34 : vector<8x512xf32>
    %cst_27 = arith.constant 0.000000e+00 : f32
    %36 = vector.broadcast %cst_27 : f32 to vector<8x512xf32>
    %37 = arith.maximumf %35, %36 : vector<8x512xf32>
    %38 = arith.truncf %37 : vector<8x512xf32> to vector<8x512xbf16>
    %c3 = arith.constant 3 : index
    %c0_28 = arith.constant 0 : index
    %c0_29 = arith.constant 0 : index
    %39 = vector.load %arg4[%c3, %c0_28, %c0_29] : memref<9x512x512xbf16, #tpu.memory_space<vmem>>, vector<1x512x512xbf16>
    %40 = vector.shape_cast %39 : vector<1x512x512xbf16> to vector<512x512xbf16>
    %cst_30 = arith.constant dense<0.000000e+00> : vector<8x512xf32>
    %41 = tpu.matmul %38, %40, %cst_30 {dimension_numbers = #tpu.dot_dimension_numbers<[1], [0], [0], [1], [0, 0, 1, 1], [], []>} : vector<8x512xbf16>, vector<512x512xbf16>, vector<8x512xf32> -> vector<8x512xf32>
    %c3_31 = arith.constant 3 : index
    %c0_32 = arith.constant 0 : index
    %c0_33 = arith.constant 0 : index
    %42 = vector.load %arg5[%c3_31, %c0_32, %c0_33] : memref<9x1x512xf32, #tpu.memory_space<vmem>>, vector<1x1x512xf32>
    %43 = vector.shape_cast %42 : vector<1x1x512xf32> to vector<1x512xf32>
    %44 = vector.broadcast %43 : vector<1x512xf32> to vector<8x512xf32>
    %45 = arith.addf %41, %44 : vector<8x512xf32>
    %cst_34 = arith.constant 0.000000e+00 : f32
    %46 = vector.broadcast %cst_34 : f32 to vector<8x512xf32>
    %47 = arith.maximumf %45, %46 : vector<8x512xf32>
    %48 = arith.truncf %47 : vector<8x512xf32> to vector<8x512xbf16>
    %c4 = arith.constant 4 : index
    %c0_35 = arith.constant 0 : index
    %c0_36 = arith.constant 0 : index
    %49 = vector.load %arg4[%c4, %c0_35, %c0_36] : memref<9x512x512xbf16, #tpu.memory_space<vmem>>, vector<1x512x512xbf16>
    %50 = vector.shape_cast %49 : vector<1x512x512xbf16> to vector<512x512xbf16>
    %cst_37 = arith.constant dense<0.000000e+00> : vector<8x512xf32>
    %51 = tpu.matmul %48, %50, %cst_37 {dimension_numbers = #tpu.dot_dimension_numbers<[1], [0], [0], [1], [0, 0, 1, 1], [], []>} : vector<8x512xbf16>, vector<512x512xbf16>, vector<8x512xf32> -> vector<8x512xf32>
    %c4_38 = arith.constant 4 : index
    %c0_39 = arith.constant 0 : index
    %c0_40 = arith.constant 0 : index
    %52 = vector.load %arg5[%c4_38, %c0_39, %c0_40] : memref<9x1x512xf32, #tpu.memory_space<vmem>>, vector<1x1x512xf32>
    %53 = vector.shape_cast %52 : vector<1x1x512xf32> to vector<1x512xf32>
    %54 = vector.broadcast %53 : vector<1x512xf32> to vector<8x512xf32>
    %55 = arith.addf %51, %54 : vector<8x512xf32>
    %cst_41 = arith.constant 0.000000e+00 : f32
    %56 = vector.broadcast %cst_41 : f32 to vector<8x512xf32>
    %57 = arith.maximumf %55, %56 : vector<8x512xf32>
    %58 = arith.truncf %57 : vector<8x512xf32> to vector<8x512xbf16>
    %c5 = arith.constant 5 : index
    %c0_42 = arith.constant 0 : index
    %c0_43 = arith.constant 0 : index
    %59 = vector.load %arg4[%c5, %c0_42, %c0_43] : memref<9x512x512xbf16, #tpu.memory_space<vmem>>, vector<1x512x512xbf16>
    %60 = vector.shape_cast %59 : vector<1x512x512xbf16> to vector<512x512xbf16>
    %cst_44 = arith.constant dense<0.000000e+00> : vector<8x512xf32>
    %61 = tpu.matmul %58, %60, %cst_44 {dimension_numbers = #tpu.dot_dimension_numbers<[1], [0], [0], [1], [0, 0, 1, 1], [], []>} : vector<8x512xbf16>, vector<512x512xbf16>, vector<8x512xf32> -> vector<8x512xf32>
    %c5_45 = arith.constant 5 : index
    %c0_46 = arith.constant 0 : index
    %c0_47 = arith.constant 0 : index
    %62 = vector.load %arg5[%c5_45, %c0_46, %c0_47] : memref<9x1x512xf32, #tpu.memory_space<vmem>>, vector<1x1x512xf32>
    %63 = vector.shape_cast %62 : vector<1x1x512xf32> to vector<1x512xf32>
    %64 = vector.broadcast %63 : vector<1x512xf32> to vector<8x512xf32>
    %65 = arith.addf %61, %64 : vector<8x512xf32>
    %cst_48 = arith.constant 0.000000e+00 : f32
    %66 = vector.broadcast %cst_48 : f32 to vector<8x512xf32>
    %67 = arith.maximumf %65, %66 : vector<8x512xf32>
    %68 = arith.truncf %67 : vector<8x512xf32> to vector<8x512xbf16>
    %c6 = arith.constant 6 : index
    %c0_49 = arith.constant 0 : index
    %c0_50 = arith.constant 0 : index
    %69 = vector.load %arg4[%c6, %c0_49, %c0_50] : memref<9x512x512xbf16, #tpu.memory_space<vmem>>, vector<1x512x512xbf16>
    %70 = vector.shape_cast %69 : vector<1x512x512xbf16> to vector<512x512xbf16>
    %cst_51 = arith.constant dense<0.000000e+00> : vector<8x512xf32>
    %71 = tpu.matmul %68, %70, %cst_51 {dimension_numbers = #tpu.dot_dimension_numbers<[1], [0], [0], [1], [0, 0, 1, 1], [], []>} : vector<8x512xbf16>, vector<512x512xbf16>, vector<8x512xf32> -> vector<8x512xf32>
    %c6_52 = arith.constant 6 : index
    %c0_53 = arith.constant 0 : index
    %c0_54 = arith.constant 0 : index
    %72 = vector.load %arg5[%c6_52, %c0_53, %c0_54] : memref<9x1x512xf32, #tpu.memory_space<vmem>>, vector<1x1x512xf32>
    %73 = vector.shape_cast %72 : vector<1x1x512xf32> to vector<1x512xf32>
    %74 = vector.broadcast %73 : vector<1x512xf32> to vector<8x512xf32>
    %75 = arith.addf %71, %74 : vector<8x512xf32>
    %cst_55 = arith.constant 0.000000e+00 : f32
    %76 = vector.broadcast %cst_55 : f32 to vector<8x512xf32>
    %77 = arith.maximumf %75, %76 : vector<8x512xf32>
    %78 = arith.truncf %77 : vector<8x512xf32> to vector<8x512xbf16>
    %c7 = arith.constant 7 : index
    %c0_56 = arith.constant 0 : index
    %c0_57 = arith.constant 0 : index
    %79 = vector.load %arg4[%c7, %c0_56, %c0_57] : memref<9x512x512xbf16, #tpu.memory_space<vmem>>, vector<1x512x512xbf16>
    %80 = vector.shape_cast %79 : vector<1x512x512xbf16> to vector<512x512xbf16>
    %cst_58 = arith.constant dense<0.000000e+00> : vector<8x512xf32>
    %81 = tpu.matmul %78, %80, %cst_58 {dimension_numbers = #tpu.dot_dimension_numbers<[1], [0], [0], [1], [0, 0, 1, 1], [], []>} : vector<8x512xbf16>, vector<512x512xbf16>, vector<8x512xf32> -> vector<8x512xf32>
    %c7_59 = arith.constant 7 : index
    %c0_60 = arith.constant 0 : index
    %c0_61 = arith.constant 0 : index
    %82 = vector.load %arg5[%c7_59, %c0_60, %c0_61] : memref<9x1x512xf32, #tpu.memory_space<vmem>>, vector<1x1x512xf32>
    %83 = vector.shape_cast %82 : vector<1x1x512xf32> to vector<1x512xf32>
    %84 = vector.broadcast %83 : vector<1x512xf32> to vector<8x512xf32>
    %85 = arith.addf %81, %84 : vector<8x512xf32>
    %cst_62 = arith.constant 0.000000e+00 : f32
    %86 = vector.broadcast %cst_62 : f32 to vector<8x512xf32>
    %87 = arith.maximumf %85, %86 : vector<8x512xf32>
    %88 = arith.truncf %87 : vector<8x512xf32> to vector<8x512xbf16>
    %c8 = arith.constant 8 : index
    %c0_63 = arith.constant 0 : index
    %c0_64 = arith.constant 0 : index
    %89 = vector.load %arg4[%c8, %c0_63, %c0_64] : memref<9x512x512xbf16, #tpu.memory_space<vmem>>, vector<1x512x512xbf16>
    %90 = vector.shape_cast %89 : vector<1x512x512xbf16> to vector<512x512xbf16>
    %cst_65 = arith.constant dense<0.000000e+00> : vector<8x512xf32>
    %91 = tpu.matmul %88, %90, %cst_65 {dimension_numbers = #tpu.dot_dimension_numbers<[1], [0], [0], [1], [0, 0, 1, 1], [], []>} : vector<8x512xbf16>, vector<512x512xbf16>, vector<8x512xf32> -> vector<8x512xf32>
    %c8_66 = arith.constant 8 : index
    %c0_67 = arith.constant 0 : index
    %c0_68 = arith.constant 0 : index
    %92 = vector.load %arg5[%c8_66, %c0_67, %c0_68] : memref<9x1x512xf32, #tpu.memory_space<vmem>>, vector<1x1x512xf32>
    %93 = vector.shape_cast %92 : vector<1x1x512xf32> to vector<1x512xf32>
    %94 = vector.broadcast %93 : vector<1x512xf32> to vector<8x512xf32>
    %95 = arith.addf %91, %94 : vector<8x512xf32>
    %cst_69 = arith.constant 0.000000e+00 : f32
    %96 = vector.broadcast %cst_69 : f32 to vector<8x512xf32>
    %97 = arith.maximumf %95, %96 : vector<8x512xf32>
    %98 = arith.truncf %97 : vector<8x512xf32> to vector<8x512xbf16>
    %c0_70 = arith.constant 0 : index
    %c0_71 = arith.constant 0 : index
    %99 = vector.load %arg6[%c0_70, %c0_71] : memref<512x128xbf16, #tpu.memory_space<vmem>>, vector<512x128xbf16>
    %cst_72 = arith.constant dense<0.000000e+00> : vector<8x128xf32>
    %100 = tpu.matmul %98, %99, %cst_72 {dimension_numbers = #tpu.dot_dimension_numbers<[1], [0], [0], [1], [0, 0, 1, 1], [], []>} : vector<8x512xbf16>, vector<512x128xbf16>, vector<8x128xf32> -> vector<8x128xf32>
    %c0_73 = arith.constant 0 : index
    %c0_74 = arith.constant 0 : index
    %101 = vector.load %arg7[%c0_73, %c0_74] : memref<1x128xf32, #tpu.memory_space<vmem>>, vector<1x128xf32>
    %102 = vector.broadcast %101 : vector<1x128xf32> to vector<8x128xf32>
    %103 = arith.addf %100, %102 : vector<8x128xf32>
    %104 = tpu.iota {dimensions = array<i32: 1>} : vector<8x128xi32>
    %c10_i32 = arith.constant 10 : i32
    %105 = vector.broadcast %c10_i32 : i32 to vector<8x128xi32>
    %106 = arith.cmpi slt, %104, %105 : vector<8x128xi32>
    %cst_75 = arith.constant 0xFF800000 : f32
    %107 = vector.broadcast %cst_75 : f32 to vector<8x128xf32>
    %108 = arith.select %106, %103, %107 : vector<8x128xi1>, vector<8x128xf32>
    %cst_76 = arith.constant dense<0xFF800000> : vector<8xf32>
    %109 = vector.multi_reduction <maximumf>, %108, %cst_76 [1] : vector<8x128xf32> to vector<8xf32>
    %110 = vector.shape_cast %109 : vector<8xf32> to vector<8x1xf32>
    %111 = vector.broadcast %110 : vector<8x1xf32> to vector<8x128xf32>
    %112 = arith.subf %108, %111 : vector<8x128xf32>
    %113 = math.exp %112 : vector<8x128xf32>
    %cst_77 = arith.constant dense<0.000000e+00> : vector<8xf32>
    %114 = vector.multi_reduction <add>, %113, %cst_77 [1] : vector<8x128xf32> to vector<8xf32>
    %115 = vector.shape_cast %114 : vector<8xf32> to vector<8x1xf32>
    %116 = tpu.reciprocal %115 {approx = true} : vector<8x1xf32> -> vector<8x1xf32>
    %117 = vector.broadcast %116 : vector<8x1xf32> to vector<8x128xf32>
    %118 = arith.mulf %113, %117 : vector<8x128xf32>
    %c0_78 = arith.constant 0 : index
    %c0_79 = arith.constant 0 : index
    %119 = vector.load %arg8[%c0_78, %c0_79] : memref<8x128xf32, #tpu.memory_space<vmem>>, vector<8x128xf32>
    tpu.vector_store %arg8[%c0_78, %c0_79], %118 {strides = array<i32>} : memref<8x128xf32, #tpu.memory_space<vmem>>, vector<8x128xf32>,
    return
  }
  func.func @transform_0(%arg0: i32) -> (i32, i32) {
    %c0_i32 = arith.constant 0 : i32
    %c0_i32_0 = arith.constant 0 : i32
    return %arg0, %c0_i32 : i32, i32
  }
  func.func @transform_1(%arg0: i32) -> (i32, i32) {
    %c0_i32 = arith.constant 0 : i32
    %c0_i32_0 = arith.constant 0 : i32
    %c0_i32_1 = arith.constant 0 : i32
    return %c0_i32, %c0_i32_0 : i32, i32
  }
  func.func @transform_2(%arg0: i32) -> (i32, i32) {
    %c0_i32 = arith.constant 0 : i32
    %c0_i32_0 = arith.constant 0 : i32
    %c0_i32_1 = arith.constant 0 : i32
    return %c0_i32, %c0_i32_0 : i32, i32
  }
  func.func @transform_3(%arg0: i32) -> (i32, i32, i32) {
    %c0_i32 = arith.constant 0 : i32
    %c0_i32_0 = arith.constant 0 : i32
    %c0_i32_1 = arith.constant 0 : i32
    %c0_i32_2 = arith.constant 0 : i32
    return %c0_i32, %c0_i32_0, %c0_i32_1 : i32, i32, i32
  }
  func.func @transform_4(%arg0: i32) -> (i32, i32, i32) {
    %c0_i32 = arith.constant 0 : i32
    %c0_i32_0 = arith.constant 0 : i32
    %c0_i32_1 = arith.constant 0 : i32
    %c0_i32_2 = arith.constant 0 : i32
    return %c0_i32, %c0_i32_0, %c0_i32_1 : i32, i32, i32
  }
  func.func @transform_5(%arg0: i32) -> (i32, i32) {
    %c0_i32 = arith.constant 0 : i32
    %c0_i32_0 = arith.constant 0 : i32
    %c0_i32_1 = arith.constant 0 : i32
    return %c0_i32, %c0_i32_0 : i32, i32
  }
  func.func @transform_6(%arg0: i32) -> (i32, i32) {
    %c0_i32 = arith.constant 0 : i32
    %c0_i32_0 = arith.constant 0 : i32
    %c0_i32_1 = arith.constant 0 : i32
    return %c0_i32, %c0_i32_0 : i32, i32
  }
  func.func @transform_7(%arg0: i32) -> (i32, i32) {
    %c0_i32 = arith.constant 0 : i32
    %c0_i32_0 = arith.constant 0 : i32
    return %arg0, %c0_i32 : i32, i32
  }
}

</mosaic_0001>

<bundles_post_ra>
// kernel: net_v5_forward.1
= control target key start
LH: loop header
LB: loop body
LE: loop exit
PB: predicated region body
PF: predicated region fallthrough
CT: control target
= control target key end

     0   :  { %s15896_s24 = smov 0   ;;  %s20333_s0 = inlined_call_operand.vmem [shape: bf16[32,896], index: 0, kind: input, shape index: {}]   ;;  %s20334_s1 = inlined_call_operand.vmem [shape: bf16[896,512], index: 1, kind: input, shape index: {}]   ;;  %s20335_s2 = inlined_call_operand.vmem [shape: f32[1,512], index: 2, kind: input, shape index: {}]   ;;  %s20336_s3 = inlined_call_operand.vmem [shape: bf16[9,512,512], index: 3, kind: input, shape index: {}]   ;;  %s20337_s4 = inlined_call_operand.vmem [shape: f32[9,1,512], index: 4, kind: input, shape index: {}]   ;;  %s20338_s5 = inlined_call_operand.vmem [shape: bf16[512,128], index: 5, kind: input, shape index: {}]   ;;  %s20339_s6 = inlined_call_operand.vmem [shape: f32[1,128], index: 6, kind: input, shape index: {}]   ;;  %s20340_s7 = inlined_call_operand.vmem [shape: f32[32,128], index: 7, kind: output, shape index: {}]  }
   0x1 LB: > { %s11093_s25 = sadd.s32 4294967295, %s15853_s24   ;;  %p11097_p0 = scmp.ge.s32.totalorder %s15853_s24, 1  ;;  %s15853_s24 = sphi %s15896_s24, %s17_s24  }
   0x2   : > { %p237_p1 = scmp.lt.s32.totalorder %s15853_s24, 5 }
   0x4   : > { %p238_p2 = pnand %p11097_p0, %p237_p1 }
   0x5   : > { %v13740_v0 = vld [vmem:[%s20334_s1 + $0x4] ss:$16 sps:$4 sm:$0xff] (!%p238_p2)   ;;  %v13742_v1 = vld [vmem:[%s20334_s1 + $0xc] ss:$16 sps:$4 sm:$0xff] (!%p238_p2)   ;;  %v13744_v2 = vld [vmem:[%s20334_s1] ss:$16 sps:$4 sm:$0xff] (!%p238_p2)  }
   0x6   : > { %241 = sbr.rel (%p238_p2) target bundleno = 3539 (0xdd3), region = 48  ;;  %1673 = vmatprep.subr.bf16.mxu0 (!%p238_p2), %v13740_v0  ;;  %v13745_v3 = vld [vmem:[%s20334_s1 + $0x8] ss:$16 sps:$4 sm:$0xff] (!%p238_p2)   ;;  %1837 = vmatprep.subr.bf16.mxu1 (!%p238_p2), %v13742_v1  ;;  %v13746_v4 = vld [vmem:[%s20334_s1 + $0x24] ss:$16 sps:$4 sm:$0xff] (!%p238_p2)   ;;  %p268_p3 = scmp.lt.s32.totalorder (!%p238_p2), %s11093_s25, 3 }
   0x7   : > { %1674 = vmatpush1.bf16.msra.mxu0 (!%p238_p2), %v13744_v2  ;;  %1838 = vmatpush1.bf16.msra.mxu1 (!%p238_p2), %v13745_v3  ;;  %v13748_v5 = vld [vmem:[%s20334_s1 + $0x2c] ss:$16 sps:$4 sm:$0xff] (!%p238_p2)   ;;  %v13750_v6 = vld [vmem:[%s20334_s1 + $0x20] ss:$16 sps:$4 sm:$0xff] (!%p238_p2)   ;;  %v13751_v7 = vld [vmem:[%s20334_s1 + $0x28] ss:$16 sps:$4 sm:$0xff] (!%p238_p2)  }
   0x8   : > { %1675 = vmatprep.subr.bf16.mxu0 (!%p238_p2), %v13746_v4  ;;  %1839 = vmatprep.subr.bf16.mxu1 (!%p238_p2), %v13748_v5  ;;  %v13752_v8 = vld [vmem:[%s20334_s1 + $0x44] ss:$16 sps:$4 sm:$0xff] (!%p238_p2)   ;;  %v13754_v9 = vld [vmem:[%s20334_s1 + $0x4c] ss:$16 sps:$4 sm:$0xff] (!%p238_p2)   ;;  %v13756_v10 = vld [vmem:[%s20334_s1 + $0x40] ss:$16 sps:$4 sm:$0xff] (!%p238_p2)  }
   0x9   : > { %v13757_v11 = vld [vmem:[%s20334_s1 + $0x48] ss:$16 sps:$4 sm:$0xff] (!%p238_p2)   ;;  %v13758_v12 = vld [vmem:[%s20334_s1 + $0x64] ss:$16 sps:$4 sm:$0xff] (!%p238_p2)   ;;  %v13760_v13 = vld [vmem:[%s20334_s1 + $0x6c] ss:$16 sps:$4 sm:$0xff] (!%p238_p2)  }
   0xa   : > { %v13762_v14 = vld [vmem:[%s20334_s1 + $0x60] ss:$16 sps:$4 sm:$0xff] (!%p238_p2)   ;;  %v13763_v15 = vld [vmem:[%s20334_s1 + $0x68] ss:$16 sps:$4 sm:$0xff] (!%p238_p2)   ;;  %v13764_v16 = vld [vmem:[%s20334_s1 + $0x84] ss:$16 sps:$4 sm:$0xff] (!%p238_p2)  }
   0xb   : > { %1676 = vmatpush1.bf16.msra.mxu0 (!%p238_p2), %v13750_v6  ;;  %1840 = vmatpush1.bf16.msra.mxu1 (!%p238_p2), %v13751_v7  ;;  %v13766_v17 = vld [vmem:[%s20334_s1 + $0x8c] ss:$16 sps:$4 sm:$0xff] (!%p238_p2)   ;;  %v13768_v18 = vld [vmem:[%s20334_s1 + $0x80] ss:$16 sps:$4 sm:$0xff] (!%p238_p2)   ;;  %v13769_v19 = vld [vmem:[%s20334_s1 + $0x88] ss:$16 sps:$4 sm:$0xff] (!%p238_p2)  }
   0xc   : > { %1677 = vmatprep.subr.bf16.mxu0 (!%p238_p2), %v13752_v8  ;;  %1841 = vmatprep.subr.bf16.mxu1 (!%p238_p2), %v13754_v9  ;;  %v13770_v20 = vld [vmem:[%s20334_s1 + $0xa4] ss:$16 sps:$4 sm:$0xff] (!%p238_p2)   ;;  %v13772_v21 = vld [vmem:[%s20334_s1 + $0xac] ss:$16 sps:$4 sm:$0xff] (!%p238_p2)   ;;  %v13774_v22 = vld [vmem:[%s20334_s1 + $0xa0] ss:$16 sps:$4 sm:$0xff] (!%p238_p2)  }
   0xd   : > { %v13775_v23 = vld [vmem:[%s20334_s1 + $0xa8] ss:$16 sps:$4 sm:$0xff]   ;;  %v13776_v24 = vld [vmem:[%s20334_s1 + $0xc4] ss:$16 sps:$4 sm:$0xff]   ;;  %v13778_v25 = vld [vmem:[%s20334_s1 + $0xcc] ss:$16 sps:$4 sm:$0xff]  }
   0xe   : > { %v13780_v26 = vld [vmem:[%s20334_s1 + $0xc0] ss:$16 sps:$4 sm:$0xff]   ;;  %v13781_v27 = vld [vmem:[%s20334_s1 + $0xc8] ss:$16 sps:$4 sm:$0xff]   ;;  %v13782_v28 = vld [vmem:[%s20334_s1 + $0xe4] ss:$16 sps:$4 sm:$0xff]  }
   0xf   : > { %1678 = vmatpush1.bf16.msra.mxu0 %v13756_v10  ;;  %1842 = vmatpush1.bf16.msra.mxu1 %v13757_v11  ;;  %v13784_v29 = vld [vmem:[%s20334_s1 + $0xec] ss:$16 sps:$4 sm:$0xff]   ;;  %v13786_v30 = vld [vmem:[%s20334_s1 + $0xe0] ss:$16 sps:$4 sm:$0xff]   ;;  %v13787_v31 = vld [vmem:[%s20334_s1 + $0xe8] ss:$16 sps:$4 sm:$0xff]  }
  0x10   : > { %1679 = vmatprep.subr.bf16.mxu0 %v13758_v12  ;;  %1843 = vmatprep.subr.bf16.mxu1 %v13760_v13  ;;  %v13788_v32 = vld [vmem:[%s20334_s1 + $0x104] ss:$16 sps:$4 sm:$0xff]   ;;  %v13790_v33 = vld [vmem:[%s20334_s1 + $0x10c] ss:$16 sps:$4 sm:$0xff]   ;;  %v13792_v34 = vld [vmem:[%s20334_s1 + $0x100] ss:$16 sps:$4 sm:$0xff]  }
  0x11   : > { %v13793_v35 = vld [vmem:[%s20334_s1 + $0x108] ss:$16 sps:$4 sm:$0xff]   ;;  %s20342_s25 = smov (!%p268_p3, %s11093_s25), 3  ;;  %v13794_v36 = vld [vmem:[%s20334_s1 + $0x124] ss:$16 sps:$4 sm:$0xff]  }
  0x12   : > { %v13796_v37 = vld [vmem:[%s20334_s1 + $0x12c] ss:$16 sps:$4 sm:$0xff]   ;;  %v13798_v38 = vld [vmem:[%s20334_s1 + $0x120] ss:$16 sps:$4 sm:$0xff]   ;;  %s13730_s18 = smul.u32 28, %s20342_s25  ;;  %s11099_s29 = sshll.u32 %s20342_s25, 3 }
  0x13   : > { %1680 = vmatpush1.bf16.msra.mxu0 %v13762_v14  ;;  %1844 = vmatpush1.bf16.msra.mxu1 %v13763_v15  ;;  %v13799_v39 = vld [vmem:[%s20334_s1 + $0x128] ss:$16 sps:$4 sm:$0xff]   ;;  %v13800_v40 = vld [vmem:[%s20334_s1 + $0x144] ss:$16 sps:$4 sm:$0xff]   ;;  %v13802_v41 = vld [vmem:[%s20334_s1 + $0x14c] ss:$16 sps:$4 sm:$0xff]   ;;  %s276_s9 = scalar_lea.vmem %s20340_s7, %s11099_s29 }
  0x14   : > { %1681 = vmatprep.subr.bf16.mxu0 %v13764_v16  ;;  %1845 = vmatprep.subr.bf16.mxu1 %v13766_v17  ;;  %v13804_v42 = vld [vmem:[%s20334_s1 + $0x140] ss:$16 sps:$4 sm:$0xff]   ;;  %v13805_v43 = vld [vmem:[%s20334_s1 + $0x148] ss:$16 sps:$4 sm:$0xff]   ;;  %s16046_s10 = scalar_lea.vmem %s20333_s0, %s13730_s18  ;;  %v13806_v44 = vld [vmem:[%s20334_s1 + $0x164] ss:$16 sps:$4 sm:$0xff]  }
  0x15   : > { %v13808_v45 = vld [vmem:[%s20334_s1 + $0x16c] ss:$16 sps:$4 sm:$0xff]   ;;  %v278_v46 = vld [vmem:[%s16046_s10] sm:$0xff]  ;;  %v13811_v49 = vld [vmem:[%s20334_s1 + $0x168] ss:$16 sps:$4 sm:$0xff]  }
  0x16   : > { %v13810_v47 = vld [vmem:[%s20334_s1 + $0x160] ss:$16 sps:$4 sm:$0xff]   ;;  %v11101_v48 = vcombine.high %v278_v46, %v278_v46  ;;  %v13812_v50 = vld [vmem:[%s20334_s1 + $0x184] ss:$16 sps:$4 sm:$0xff]   ;;  %v13814_v51 = vld [vmem:[%s20334_s1 + $0x18c] ss:$16 sps:$4 sm:$0xff]   ;;  %v11100_v4 = vcombine.low %v278_v46, %v278_v46 }
  0x17   : > { %1682 = vmatpush1.bf16.msra.mxu0 %v13768_v18  ;;  %1846 = vmatpush1.bf16.msra.mxu1 %v13769_v19  ;;  %v13816_v52 = vld [vmem:[%s20334_s1 + $0x180] ss:$16 sps:$4 sm:$0xff]   ;;  %v13817_v53 = vld [vmem:[%s20334_s1 + $0x188] ss:$16 sps:$4 sm:$0xff]   ;;  %v13818_v54 = vld [vmem:[%s20334_s1 + $0x1a4] ss:$16 sps:$4 sm:$0xff]  }
  0x18   : > { %1683 = vmatprep.subr.bf16.mxu0 %v13770_v20  ;;  %1847 = vmatprep.subr.bf16.mxu1 %v13772_v21  ;;  %v13820_v55 = vld [vmem:[%s20334_s1 + $0x1ac] ss:$16 sps:$4 sm:$0xff]   ;;  %v13822_v56 = vld [vmem:[%s20334_s1 + $0x1a0] ss:$16 sps:$4 sm:$0xff]   ;;  %v13823_v57 = vld [vmem:[%s20334_s1 + $0x1a8] ss:$16 sps:$4 sm:$0xff]  }
  0x19   : > { %1705 = vmatprep.mubr.bf16.mxu0 %v11101_v48  ;;  %1869 = vmatprep.mubr.bf16.mxu1 %v11101_v48  ;;  %v13824_v58 = vld [vmem:[%s20334_s1 + $0x1c4] ss:$16 sps:$4 sm:$0xff]   ;;  %v13826_v59 = vld [vmem:[%s20334_s1 + $0x1cc] ss:$16 sps:$4 sm:$0xff]   ;;  %v13828_v60 = vld [vmem:[%s20334_s1 + $0x1c0] ss:$16 sps:$4 sm:$0xff]  }
  0x1a   : > { %v13829_v61 = vld [vmem:[%s20334_s1 + $0x1c8] ss:$16 sps:$4 sm:$0xff]   ;;  %v13830_v62 = vld [vmem:[%s20334_s1 + $0x1e4] ss:$16 sps:$4 sm:$0xff]   ;;  %v13832_v63 = vld [vmem:[%s20334_s1 + $0x1ec] ss:$16 sps:$4 sm:$0xff]  }
  0x1b   : > { %1684 = vmatpush1.bf16.msra.mxu0 %v13774_v22  ;;  %1848 = vmatpush1.bf16.msra.mxu1 %v13775_v23  ;;  %v13834_v0 = vld [vmem:[%s20334_s1 + $0x1e0] ss:$16 sps:$4 sm:$0xff]   ;;  %v13835_v1 = vld [vmem:[%s20334_s1 + $0x1e8] ss:$16 sps:$4 sm:$0xff]   ;;  %v13840_v2 = vld [vmem:[%s20334_s1 + $0x204] ss:$16 sps:$4 sm:$0xff]  }
  0x1c   : > { %1685 = vmatprep.subr.bf16.mxu0 %v13776_v24  ;;  %1849 = vmatprep.subr.bf16.mxu1 %v13778_v25  ;;  %v13843_v3 = vld [vmem:[%s20334_s1 + $0x20c] ss:$16 sps:$4 sm:$0xff]   ;;  %v13838_v5 = vld [vmem:[%s20334_s1 + $0x200] ss:$16 sps:$4 sm:$0xff]   ;;  %v13841_v6 = vld [vmem:[%s20334_s1 + $0x208] ss:$16 sps:$4 sm:$0xff]  }
  0x1d   : > { %v13846_v7 = vld [vmem:[%s20334_s1 + $0x224] ss:$16 sps:$4 sm:$0xff]   ;;  %v13849_v8 = vld [vmem:[%s20334_s1 + $0x22c] ss:$16 sps:$4 sm:$0xff]   ;;  %v13844_v9 = vld [vmem:[%s20334_s1 + $0x220] ss:$16 sps:$4 sm:$0xff]  }
  0x1e   : > { %v13847_v10 = vld [vmem:[%s20334_s1 + $0x228] ss:$16 sps:$4 sm:$0xff]   ;;  %v13852_v11 = vld [vmem:[%s20334_s1 + $0x244] ss:$16 sps:$4 sm:$0xff]   ;;  %v13855_v12 = vld [vmem:[%s20334_s1 + $0x24c] ss:$16 sps:$4 sm:$0xff]  }
  0x1f   : > { %1686 = vmatpush1.bf16.msra.mxu0 %v13780_v26  ;;  %1850 = vmatpush1.bf16.msra.mxu1 %v13781_v27  ;;  %v13850_v13 = vld [vmem:[%s20334_s1 + $0x240] ss:$16 sps:$4 sm:$0xff]   ;;  %v13853_v14 = vld [vmem:[%s20334_s1 + $0x248] ss:$16 sps:$4 sm:$0xff]   ;;  %v13858_v15 = vld [vmem:[%s20334_s1 + $0x264] ss:$16 sps:$4 sm:$0xff]  }
  0x20   : > { %1687 = vmatprep.subr.bf16.mxu0 %v13782_v28  ;;  %1851 = vmatprep.subr.bf16.mxu1 %v13784_v29  ;;  %v13861_v16 = vld [vmem:[%s20334_s1 + $0x26c] ss:$16 sps:$4 sm:$0xff]   ;;  %v13856_v17 = vld [vmem:[%s20334_s1 + $0x260] ss:$16 sps:$4 sm:$0xff]   ;;  %v13859_v18 = vld [vmem:[%s20334_s1 + $0x268] ss:$16 sps:$4 sm:$0xff]  }
  0x21   : > { %v13864_v19 = vld [vmem:[%s20334_s1 + $0x284] ss:$16 sps:$4 sm:$0xff]   ;;  %v13867_v20 = vld [vmem:[%s20334_s1 + $0x28c] ss:$16 sps:$4 sm:$0xff]   ;;  %v13862_v21 = vld [vmem:[%s20334_s1 + $0x280] ss:$16 sps:$4 sm:$0xff]  }
  0x22   : > { %v13865_v22 = vld [vmem:[%s20334_s1 + $0x288] ss:$16 sps:$4 sm:$0xff]   ;;  %v13870_v23 = vld [vmem:[%s20334_s1 + $0x2a4] ss:$16 sps:$4 sm:$0xff]   ;;  %v13873_v24 = vld [vmem:[%s20334_s1 + $0x2ac] ss:$16 sps:$4 sm:$0xff]  }
  0x23   : > { %1688 = vmatpush1.bf16.msra.mxu0 %v13786_v30  ;;  %1852 = vmatpush1.bf16.msra.mxu1 %v13787_v31  ;;  %v13868_v25 = vld [vmem:[%s20334_s1 + $0x2a0] ss:$16 sps:$4 sm:$0xff]   ;;  %v13871_v26 = vld [vmem:[%s20334_s1 + $0x2a8] ss:$16 sps:$4 sm:$0xff]   ;;  %v13876_v27 = vld [vmem:[%s20334_s1 + $0x2c4] ss:$16 sps:$4 sm:$0xff]  }
  0x24   : > { %1689 = vmatprep.subr.bf16.mxu0 %v13788_v32  ;;  %1853 = vmatprep.subr.bf16.mxu1 %v13790_v33  ;;  %v13879_v28 = vld [vmem:[%s20334_s1 + $0x2cc] ss:$16 sps:$4 sm:$0xff]   ;;  %v13874_v31 = vld [vmem:[%s20334_s1 + $0x2c0] ss:$16 sps:$4 sm:$0xff]   ;;  %v13877_v32 = vld [vmem:[%s20334_s1 + $0x2c8] ss:$16 sps:$4 sm:$0xff]  }
  0x25   : > { %v16188_v29 = vld [vmem:[%s16046_s10 + $0x8] sm:$0xff]  ;;  %v13882_v33 = vld [vmem:[%s20334_s1 + $0x2e4] ss:$16 sps:$4 sm:$0xff]  }
  0x26   : > { %v11103_v30 = vcombine.high %v16188_v29, %v16188_v29  ;;  %v13903_v46 = vld [vmem:[%s20334_s1 + $0x34c] ss:$16 sps:$4 sm:$0xff]   ;;  %v13901_v48 = vld [vmem:[%s20334_s1 + $0x348] ss:$16 sps:$4 sm:$0xff]  }
  0x27   : > { %1690 = vmatpush1.bf16.msra.mxu0 %v13792_v34  ;;  %1854 = vmatpush1.bf16.msra.mxu1 %v13793_v35  ;;  %v13885_v34 = vld [vmem:[%s20334_s1 + $0x2ec] ss:$16 sps:$4 sm:$0xff]   ;;  %v13880_v35 = vld [vmem:[%s20334_s1 + $0x2e0] ss:$16 sps:$4 sm:$0xff]  }
  0x28   : > { %1691 = vmatprep.subr.bf16.mxu0 %v13794_v36  ;;  %1855 = vmatprep.subr.bf16.mxu1 %v13796_v37  ;;  %v13883_v36 = vld [vmem:[%s20334_s1 + $0x2e8] ss:$16 sps:$4 sm:$0xff]   ;;  %v13888_v37 = vld [vmem:[%s20334_s1 + $0x304] ss:$16 sps:$4 sm:$0xff]  }
  0x2b   : > { %1692 = vmatpush1.bf16.msra.mxu0 %v13798_v38  ;;  %1856 = vmatpush1.bf16.msra.mxu1 %v13799_v39  ;;  %v13891_v38 = vld [vmem:[%s20334_s1 + $0x30c] ss:$16 sps:$4 sm:$0xff]   ;;  %v13886_v39 = vld [vmem:[%s20334_s1 + $0x300] ss:$16 sps:$4 sm:$0xff]  }
  0x2c   : > { %1693 = vmatprep.subr.bf16.mxu0 %v13800_v40  ;;  %1857 = vmatprep.subr.bf16.mxu1 %v13802_v41  ;;  %v13889_v40 = vld [vmem:[%s20334_s1 + $0x308] ss:$16 sps:$4 sm:$0xff]   ;;  %v13894_v41 = vld [vmem:[%s20334_s1 + $0x324] ss:$16 sps:$4 sm:$0xff]  }
  0x2f   : > { %1694 = vmatpush1.bf16.msra.mxu0 %v13804_v42  ;;  %1858 = vmatpush1.bf16.msra.mxu1 %v13805_v43  ;;  %v13897_v42 = vld [vmem:[%s20334_s1 + $0x32c] ss:$16 sps:$4 sm:$0xff]   ;;  %v13892_v43 = vld [vmem:[%s20334_s1 + $0x320] ss:$16 sps:$4 sm:$0xff]  }
  0x30   : > { %1695 = vmatprep.subr.bf16.mxu0 %v13806_v44  ;;  %1859 = vmatprep.subr.bf16.mxu1 %v13808_v45  ;;  %v13895_v44 = vld [vmem:[%s20334_s1 + $0x328] ss:$16 sps:$4 sm:$0xff]   ;;  %v13900_v45 = vld [vmem:[%s20334_s1 + $0x344] ss:$16 sps:$4 sm:$0xff]  }
  0x33   : > { %1696 = vmatpush1.bf16.msra.mxu0 %v13810_v47  ;;  %1860 = vmatpush1.bf16.msra.mxu1 %v13811_v49  ;;  %v13898_v47 = vld [vmem:[%s20334_s1 + $0x340] ss:$16 sps:$4 sm:$0xff]   ;;  %v13906_v49 = vld [vmem:[%s20334_s1 + $0x364] ss:$16 sps:$4 sm:$0xff]  }
  0x34   : > { %1697 = vmatprep.subr.bf16.mxu0 %v13812_v50  ;;  %1861 = vmatprep.subr.bf16.mxu1 %v13814_v51  ;;  %v13909_v50 = vld [vmem:[%s20334_s1 + $0x36c] ss:$16 sps:$4 sm:$0xff]   ;;  %v13904_v51 = vld [vmem:[%s20334_s1 + $0x360] ss:$16 sps:$4 sm:$0xff]  }
  0x37   : > { %1698 = vmatpush1.bf16.msra.mxu0 %v13816_v52  ;;  %1862 = vmatpush1.bf16.msra.mxu1 %v13817_v53  ;;  %v13907_v52 = vld [vmem:[%s20334_s1 + $0x368] ss:$16 sps:$4 sm:$0xff]   ;;  %v13912_v53 = vld [vmem:[%s20334_s1 + $0x384] ss:$16 sps:$4 sm:$0xff]  }
  0x38   : > { %1699 = vmatprep.subr.bf16.mxu0 %v13818_v54  ;;  %1863 = vmatprep.subr.bf16.mxu1 %v13820_v55  ;;  %v13915_v54 = vld [vmem:[%s20334_s1 + $0x38c] ss:$16 sps:$4 sm:$0xff]   ;;  %v13910_v55 = vld [vmem:[%s20334_s1 + $0x380] ss:$16 sps:$4 sm:$0xff]  }
  0x3b   : > { %1700 = vmatpush1.bf16.msra.mxu0 %v13822_v56  ;;  %1864 = vmatpush1.bf16.msra.mxu1 %v13823_v57  ;;  %v13913_v56 = vld [vmem:[%s20334_s1 + $0x388] ss:$16 sps:$4 sm:$0xff]   ;;  %v13918_v57 = vld [vmem:[%s20334_s1 + $0x3a4] ss:$16 sps:$4 sm:$0xff]  }
  0x3c   : > { %1701 = vmatprep.subr.bf16.mxu0 %v13824_v58  ;;  %1865 = vmatprep.subr.bf16.mxu1 %v13826_v59  ;;  %v13921_v58 = vld [vmem:[%s20334_s1 + $0x3ac] ss:$16 sps:$4 sm:$0xff]   ;;  %v13916_v59 = vld [vmem:[%s20334_s1 + $0x3a0] ss:$16 sps:$4 sm:$0xff]  }
  0x3f   : > { %1702 = vmatpush1.bf16.msra.mxu0 %v13828_v60  ;;  %1866 = vmatpush1.bf16.msra.mxu1 %v13829_v61  ;;  %v13919_v60 = vld [vmem:[%s20334_s1 + $0x3a8] ss:$16 sps:$4 sm:$0xff]   ;;  %v13924_v61 = vld [vmem:[%s20334_s1 + $0x3c4] ss:$16 sps:$4 sm:$0xff]  }
  0x40   : > { %1703 = vmatprep.subr.bf16.mxu0 %v13830_v62  ;;  %1867 = vmatprep.subr.bf16.mxu1 %v13832_v63  ;;  %v13927_v62 = vld [vmem:[%s20334_s1 + $0x3cc] ss:$16 sps:$4 sm:$0xff]   ;;  %v13922_v63 = vld [vmem:[%s20334_s1 + $0x3c0] ss:$16 sps:$4 sm:$0xff]  }
  0x43   : > { %1704 = vmatpush1.bf16.msra.mxu0 %v13834_v0  ;;  %1868 = vmatpush1.bf16.msra.mxu1 %v13835_v1  ;;  %v13925_v0 = vld [vmem:[%s20334_s1 + $0x3c8] ss:$16 sps:$4 sm:$0xff]   ;;  %v13930_v1 = vld [vmem:[%s20334_s1 + $0x3e4] ss:$16 sps:$4 sm:$0xff]  }
  0x44   : > { %1714 = vmatprep.subr.bf16.mxu0 %v13840_v2  ;;  %1878 = vmatprep.subr.bf16.mxu1 %v13843_v3  ;;  %v13933_v2 = vld [vmem:[%s20334_s1 + $0x3ec] ss:$16 sps:$4 sm:$0xff]   ;;  %v13928_v3 = vld [vmem:[%s20334_s1 + $0x3e0] ss:$16 sps:$4 sm:$0xff]  }
  0x46   : > { %1706 = vmatmul.mubr.bf16.vlgmr.msra.gmra.mrb[0].mxu0 %v11100_v4  ;;  %1870 = vmatmul.mubr.bf16.vlgmr.msra.gmra.mrb[0].mxu1 %v11100_v4  ;;  %v13931_v4 = vld [vmem:[%s20334_s1 + $0x3e8] ss:$16 sps:$4 sm:$0xff]  }
  0x47   : > { %1715 = vmatpush1.bf16.msra.mxu0 %v13838_v5  ;;  %1879 = vmatpush1.bf16.msra.mxu1 %v13841_v6  ;;  %v13938_v5 = vld [vmem:[%s20334_s1 + $0x404] ss:$16 sps:$4 sm:$0xff]   ;;  %v13941_v6 = vld [vmem:[%s20334_s1 + $0x40c] ss:$16 sps:$4 sm:$0xff]  }
  0x48   : > { %1716 = vmatprep.subr.bf16.mxu0 %v13846_v7  ;;  %1880 = vmatprep.subr.bf16.mxu1 %v13849_v8  ;;  %v11102_v7 = vcombine.low %v16188_v29, %v16188_v29  ;;  %v13936_v8 = vld [vmem:[%s20334_s1 + $0x400] ss:$16 sps:$4 sm:$0xff]   ;;  %v13971_v29 = vld [vmem:[%s20334_s1 + $0x4ac] ss:$16 sps:$4 sm:$0xff]  }
  0x49   : > { %1746 = vmatprep.mubr.bf16.mxu0 %v11103_v30  ;;  %1910 = vmatprep.mubr.bf16.mxu1 %v11103_v30  ;;  %v13966_v30 = vld [vmem:[%s20334_s1 + $0x4a0] ss:$16 sps:$4 sm:$0xff]  }
  0x4b   : > { %1717 = vmatpush1.bf16.msra.mxu0 %v13844_v9  ;;  %1881 = vmatpush1.bf16.msra.mxu1 %v13847_v10  ;;  %v13939_v9 = vld [vmem:[%s20334_s1 + $0x408] ss:$16 sps:$4 sm:$0xff]   ;;  %v13944_v10 = vld [vmem:[%s20334_s1 + $0x424] ss:$16 sps:$4 sm:$0xff]  }
  0x4c   : > { %1718 = vmatprep.subr.bf16.mxu0 %v13852_v11  ;;  %1882 = vmatprep.subr.bf16.mxu1 %v13855_v12  ;;  %v16324_v11 = vld [vmem:[%s16046_s10 + $0x10] sm:$0xff]  ;;  %v13947_v12 = vld [vmem:[%s20334_s1 + $0x42c] ss:$16 sps:$4 sm:$0xff]  }
  0x4f   : > { %1719 = vmatpush1.bf16.msra.mxu0 %v13850_v13  ;;  %1883 = vmatpush1.bf16.msra.mxu1 %v13853_v14  ;;  %v11105_v13 = vcombine.high %v16324_v11, %v16324_v11  ;;  %v13942_v14 = vld [vmem:[%s20334_s1 + $0x420] ss:$16 sps:$4 sm:$0xff]  }
  0x50   : > { %1720 = vmatprep.subr.bf16.mxu0 %v13858_v15  ;;  %1884 = vmatprep.subr.bf16.mxu1 %v13861_v16  ;;  %v13945_v15 = vld [vmem:[%s20334_s1 + $0x428] ss:$16 sps:$4 sm:$0xff]   ;;  %v13950_v16 = vld [vmem:[%s20334_s1 + $0x444] ss:$16 sps:$4 sm:$0xff]  }
  0x53   : > { %1721 = vmatpush1.bf16.msra.mxu0 %v13856_v17  ;;  %1885 = vmatpush1.bf16.msra.mxu1 %v13859_v18  ;;  %v13953_v17 = vld [vmem:[%s20334_s1 + $0x44c] ss:$16 sps:$4 sm:$0xff]   ;;  %v13948_v18 = vld [vmem:[%s20334_s1 + $0x440] ss:$16 sps:$4 sm:$0xff]  }
  0x54   : > { %1722 = vmatprep.subr.bf16.mxu0 %v13864_v19  ;;  %1886 = vmatprep.subr.bf16.mxu1 %v13867_v20  ;;  %v13951_v19 = vld [vmem:[%s20334_s1 + $0x448] ss:$16 sps:$4 sm:$0xff]   ;;  %v13956_v20 = vld [vmem:[%s20334_s1 + $0x464] ss:$16 sps:$4 sm:$0xff]  }
  0x57   : > { %1723 = vmatpush1.bf16.msra.mxu0 %v13862_v21  ;;  %1887 = vmatpush1.bf16.msra.mxu1 %v13865_v22  ;;  %v13959_v21 = vld [vmem:[%s20334_s1 + $0x46c] ss:$16 sps:$4 sm:$0xff]   ;;  %v13954_v22 = vld [vmem:[%s20334_s1 + $0x460] ss:$16 sps:$4 sm:$0xff]  }
  0x58   : > { %1724 = vmatprep.subr.bf16.mxu0 %v13870_v23  ;;  %1888 = vmatprep.subr.bf16.mxu1 %v13873_v24  ;;  %v13957_v23 = vld [vmem:[%s20334_s1 + $0x468] ss:$16 sps:$4 sm:$0xff]   ;;  %v13962_v24 = vld [vmem:[%s20334_s1 + $0x484] ss:$16 sps:$4 sm:$0xff]  }
  0x5b   : > { %1725 = vmatpush1.bf16.msra.mxu0 %v13868_v25  ;;  %1889 = vmatpush1.bf16.msra.mxu1 %v13871_v26  ;;  %v13965_v25 = vld [vmem:[%s20334_s1 + $0x48c] ss:$16 sps:$4 sm:$0xff]   ;;  %v13960_v26 = vld [vmem:[%s20334_s1 + $0x480] ss:$16 sps:$4 sm:$0xff]  }
  0x5c   : > { %1726 = vmatprep.subr.bf16.mxu0 %v13876_v27  ;;  %1890 = vmatprep.subr.bf16.mxu1 %v13879_v28  ;;  %v13963_v27 = vld [vmem:[%s20334_s1 + $0x488] ss:$16 sps:$4 sm:$0xff]   ;;  %v13968_v28 = vld [vmem:[%s20334_s1 + $0x4a4] ss:$16 sps:$4 sm:$0xff]  }
  0x5f   : > { %1727 = vmatpush1.bf16.msra.mxu0 %v13874_v31  ;;  %1891 = vmatpush1.bf16.msra.mxu1 %v13877_v32  ;;  %v13969_v31 = vld [vmem:[%s20334_s1 + $0x4a8] ss:$16 sps:$4 sm:$0xff]   ;;  %v13974_v32 = vld [vmem:[%s20334_s1 + $0x4c4] ss:$16 sps:$4 sm:$0xff]  }
  0x60   : > { %1728 = vmatprep.subr.bf16.mxu0 %v13882_v33  ;;  %1892 = vmatprep.subr.bf16.mxu1 %v13885_v34  ;;  %v13977_v33 = vld [vmem:[%s20334_s1 + $0x4cc] ss:$16 sps:$4 sm:$0xff]   ;;  %v13972_v34 = vld [vmem:[%s20334_s1 + $0x4c0] ss:$16 sps:$4 sm:$0xff]  }
  0x63   : > { %1729 = vmatpush1.bf16.msra.mxu0 %v13880_v35  ;;  %1893 = vmatpush1.bf16.msra.mxu1 %v13883_v36  ;;  %v13975_v35 = vld [vmem:[%s20334_s1 + $0x4c8] ss:$16 sps:$4 sm:$0xff]   ;;  %v13980_v36 = vld [vmem:[%s20334_s1 + $0x4e4] ss:$16 sps:$4 sm:$0xff]  }
  0x64   : > { %1730 = vmatprep.subr.bf16.mxu0 %v13888_v37  ;;  %1894 = vmatprep.subr.bf16.mxu1 %v13891_v38  ;;  %v13983_v37 = vld [vmem:[%s20334_s1 + $0x4ec] ss:$16 sps:$4 sm:$0xff]   ;;  %v13978_v38 = vld [vmem:[%s20334_s1 + $0x4e0] ss:$16 sps:$4 sm:$0xff]  }
  0x67   : > { %1731 = vmatpush1.bf16.msra.mxu0 %v13886_v39  ;;  %1895 = vmatpush1.bf16.msra.mxu1 %v13889_v40  ;;  %v13981_v39 = vld [vmem:[%s20334_s1 + $0x4e8] ss:$16 sps:$4 sm:$0xff]   ;;  %v13986_v40 = vld [vmem:[%s20334_s1 + $0x504] ss:$16 sps:$4 sm:$0xff]  }
  0x68   : > { %1732 = vmatprep.subr.bf16.mxu0 %v13894_v41  ;;  %1896 = vmatprep.subr.bf16.mxu1 %v13897_v42  ;;  %v13989_v41 = vld [vmem:[%s20334_s1 + $0x50c] ss:$16 sps:$4 sm:$0xff]   ;;  %v13984_v42 = vld [vmem:[%s20334_s1 + $0x500] ss:$16 sps:$4 sm:$0xff]  }
  0x6b   : > { %1733 = vmatpush1.bf16.msra.mxu0 %v13892_v43  ;;  %1897 = vmatpush1.bf16.msra.mxu1 %v13895_v44  ;;  %v13987_v43 = vld [vmem:[%s20334_s1 + $0x508] ss:$16 sps:$4 sm:$0xff]   ;;  %v13992_v44 = vld [vmem:[%s20334_s1 + $0x524] ss:$16 sps:$4 sm:$0xff]  }
  0x6c   : > { %1734 = vmatprep.subr.bf16.mxu0 %v13900_v45  ;;  %1898 = vmatprep.subr.bf16.mxu1 %v13903_v46  ;;  %v13995_v45 = vld [vmem:[%s20334_s1 + $0x52c] ss:$16 sps:$4 sm:$0xff]   ;;  %v13990_v46 = vld [vmem:[%s20334_s1 + $0x520] ss:$16 sps:$4 sm:$0xff]  }
  0x6f   : > { %1735 = vmatpush1.bf16.msra.mxu0 %v13898_v47  ;;  %1899 = vmatpush1.bf16.msra.mxu1 %v13901_v48  ;;  %v13993_v47 = vld [vmem:[%s20334_s1 + $0x528] ss:$16 sps:$4 sm:$0xff]   ;;  %v13998_v48 = vld [vmem:[%s20334_s1 + $0x544] ss:$16 sps:$4 sm:$0xff]  }
  0x70   : > { %1736 = vmatprep.subr.bf16.mxu0 %v13906_v49  ;;  %1900 = vmatprep.subr.bf16.mxu1 %v13909_v50  ;;  %v14001_v49 = vld [vmem:[%s20334_s1 + $0x54c] ss:$16 sps:$4 sm:$0xff]   ;;  %v13996_v50 = vld [vmem:[%s20334_s1 + $0x540] ss:$16 sps:$4 sm:$0xff]  }
  0x73   : > { %1737 = vmatpush1.bf16.msra.mxu0 %v13904_v51  ;;  %1901 = vmatpush1.bf16.msra.mxu1 %v13907_v52  ;;  %v13999_v51 = vld [vmem:[%s20334_s1 + $0x548] ss:$16 sps:$4 sm:$0xff]   ;;  %v14004_v52 = vld [vmem:[%s20334_s1 + $0x564] ss:$16 sps:$4 sm:$0xff]  }
  0x74   : > { %1738 = vmatprep.subr.bf16.mxu0 %v13912_v53  ;;  %1902 = vmatprep.subr.bf16.mxu1 %v13915_v54  ;;  %v14007_v53 = vld [vmem:[%s20334_s1 + $0x56c] ss:$16 sps:$4 sm:$0xff]   ;;  %v14002_v54 = vld [vmem:[%s20334_s1 + $0x560] ss:$16 sps:$4 sm:$0xff]  }
  0x77   : > { %1739 = vmatpush1.bf16.msra.mxu0 %v13910_v55  ;;  %1903 = vmatpush1.bf16.msra.mxu1 %v13913_v56  ;;  %v14005_v55 = vld [vmem:[%s20334_s1 + $0x568] ss:$16 sps:$4 sm:$0xff]   ;;  %v14010_v56 = vld [vmem:[%s20334_s1 + $0x584] ss:$16 sps:$4 sm:$0xff]  }
  0x78   : > { %1740 = vmatprep.subr.bf16.mxu0 %v13918_v57  ;;  %1904 = vmatprep.subr.bf16.mxu1 %v13921_v58  ;;  %v14013_v57 = vld [vmem:[%s20334_s1 + $0x58c] ss:$16 sps:$4 sm:$0xff]   ;;  %v14008_v58 = vld [vmem:[%s20334_s1 + $0x580] ss:$16 sps:$4 sm:$0xff]  }
  0x7b   : > { %1741 = vmatpush1.bf16.msra.mxu0 %v13916_v59  ;;  %1905 = vmatpush1.bf16.msra.mxu1 %v13919_v60  ;;  %v14011_v59 = vld [vmem:[%s20334_s1 + $0x588] ss:$16 sps:$4 sm:$0xff]   ;;  %v14016_v60 = vld [vmem:[%s20334_s1 + $0x5a4] ss:$16 sps:$4 sm:$0xff]  }
  0x7c   : > { %1742 = vmatprep.subr.bf16.mxu0 %v13924_v61  ;;  %1906 = vmatprep.subr.bf16.mxu1 %v13927_v62  ;;  %v14019_v61 = vld [vmem:[%s20334_s1 + $0x5ac] ss:$16 sps:$4 sm:$0xff]   ;;  %v14014_v62 = vld [vmem:[%s20334_s1 + $0x5a0] ss:$16 sps:$4 sm:$0xff]  }
  0x7f   : > { %1743 = vmatpush1.bf16.msra.mxu0 %v13922_v63  ;;  %1907 = vmatpush1.bf16.msra.mxu1 %v13925_v0  ;;  %v14017_v63 = vld [vmem:[%s20334_s1 + $0x5a8] ss:$16 sps:$4 sm:$0xff]   ;;  %v14022_v0 = vld [vmem:[%s20334_s1 + $0x5c4] ss:$16 sps:$4 sm:$0xff]  }
  0x80   : > { %1744 = vmatprep.subr.bf16.mxu0 %v13930_v1  ;;  %1908 = vmatprep.subr.bf16.mxu1 %v13933_v2  ;;  %v14025_v1 = vld [vmem:[%s20334_s1 + $0x5cc] ss:$16 sps:$4 sm:$0xff]   ;;  %v14020_v2 = vld [vmem:[%s20334_s1 + $0x5c0] ss:$16 sps:$4 sm:$0xff]  }
  0x83   : > { %1745 = vmatpush1.bf16.msra.mxu0 %v13928_v3  ;;  %1909 = vmatpush1.bf16.msra.mxu1 %v13931_v4  ;;  %v14023_v3 = vld [vmem:[%s20334_s1 + $0x5c8] ss:$16 sps:$4 sm:$0xff]   ;;  %v14028_v4 = vld [vmem:[%s20334_s1 + $0x5e4] ss:$16 sps:$4 sm:$0xff]  }
  0x84   : > { %1755 = vmatprep.subr.bf16.mxu0 %v13938_v5  ;;  %1919 = vmatprep.subr.bf16.mxu1 %v13941_v6  ;;  %v14031_v5 = vld [vmem:[%s20334_s1 + $0x5ec] ss:$16 sps:$4 sm:$0xff]   ;;  %v14026_v6 = vld [vmem:[%s20334_s1 + $0x5e0] ss:$16 sps:$4 sm:$0xff]  }
  0x86   : > { %1747 = vmatmul.mubr.bf16.vlgmr.msra.gmra.mrb[0].mxu0 %v11102_v7  ;;  %1911 = vmatmul.mubr.bf16.vlgmr.msra.gmra.mrb[0].mxu1 %v11102_v7  ;;  %v14029_v7 = vld [vmem:[%s20334_s1 + $0x5e8] ss:$16 sps:$4 sm:$0xff]  }
  0x87   : > { %1756 = vmatpush1.bf16.msra.mxu0 %v13936_v8  ;;  %1920 = vmatpush1.bf16.msra.mxu1 %v13939_v9  ;;  %v14036_v8 = vld [vmem:[%s20334_s1 + $0x604] ss:$16 sps:$4 sm:$0xff]   ;;  %v14039_v9 = vld [vmem:[%s20334_s1 + $0x60c] ss:$16 sps:$4 sm:$0xff]  }
  0x88   : > { %1757 = vmatprep.subr.bf16.mxu0 %v13944_v10  ;;  %1921 = vmatprep.subr.bf16.mxu1 %v13947_v12  ;;  %v14034_v10 = vld [vmem:[%s20334_s1 + $0x600] ss:$16 sps:$4 sm:$0xff]   ;;  %v14037_v12 = vld [vmem:[%s20334_s1 + $0x608] ss:$16 sps:$4 sm:$0xff]  }
  0x89   : > { %1787 = vmatprep.mubr.bf16.mxu0 %v11105_v13  ;;  %1951 = vmatprep.mubr.bf16.mxu1 %v11105_v13  ;;  %v11104_v13 = vcombine.low %v16324_v11, %v16324_v11  ;;  %v14043_v11 = vld [vmem:[%s20334_s1 + $0x628] ss:$16 sps:$4 sm:$0xff]  }
  0x8b   : > { %1758 = vmatpush1.bf16.msra.mxu0 %v13942_v14  ;;  %1922 = vmatpush1.bf16.msra.mxu1 %v13945_v15  ;;  %v14042_v14 = vld [vmem:[%s20334_s1 + $0x624] ss:$16 sps:$4 sm:$0xff]   ;;  %v14045_v15 = vld [vmem:[%s20334_s1 + $0x62c] ss:$16 sps:$4 sm:$0xff]  }
  0x8c   : > { %1759 = vmatprep.subr.bf16.mxu0 %v13950_v16  ;;  %1923 = vmatprep.subr.bf16.mxu1 %v13953_v17  ;;  %v14040_v16 = vld [vmem:[%s20334_s1 + $0x620] ss:$16 sps:$4 sm:$0xff]   ;;  %v14048_v17 = vld [vmem:[%s20334_s1 + $0x644] ss:$16 sps:$4 sm:$0xff]  }
  0x8f   : > { %1760 = vmatpush1.bf16.msra.mxu0 %v13948_v18  ;;  %1924 = vmatpush1.bf16.msra.mxu1 %v13951_v19  ;;  %v14051_v18 = vld [vmem:[%s20334_s1 + $0x64c] ss:$16 sps:$4 sm:$0xff]   ;;  %v14046_v19 = vld [vmem:[%s20334_s1 + $0x640] ss:$16 sps:$4 sm:$0xff]  }
  0x90   : > { %1761 = vmatprep.subr.bf16.mxu0 %v13956_v20  ;;  %1925 = vmatprep.subr.bf16.mxu1 %v13959_v21  ;;  %v14049_v20 = vld [vmem:[%s20334_s1 + $0x648] ss:$16 sps:$4 sm:$0xff]   ;;  %v15855_v21 = vmov 0  }
  0x93   : > { %1762 = vmatpush1.bf16.msra.mxu0 %v13954_v22  ;;  %1926 = vmatpush1.bf16.msra.mxu1 %v13957_v23  ;;  %v14054_v22 = vld [vmem:[%s20334_s1 + $0x664] ss:$16 sps:$4 sm:$0xff]   ;;  %v14057_v23 = vld [vmem:[%s20334_s1 + $0x66c] ss:$16 sps:$4 sm:$0xff]  }
  0x94   : > { %1763 = vmatprep.subr.bf16.mxu0 %v13962_v24  ;;  %1927 = vmatprep.subr.bf16.mxu1 %v13965_v25  ;;  %v14052_v24 = vld [vmem:[%s20334_s1 + $0x660] ss:$16 sps:$4 sm:$0xff]   ;;  %v14055_v25 = vld [vmem:[%s20334_s1 + $0x668] ss:$16 sps:$4 sm:$0xff]  }
  0x97   : > { %1764 = vmatpush1.bf16.msra.mxu0 %v13960_v26  ;;  %1928 = vmatpush1.bf16.msra.mxu1 %v13963_v27  ;;  %v14060_v26 = vld [vmem:[%s20334_s1 + $0x684] ss:$16 sps:$4 sm:$0xff]   ;;  %v14063_v27 = vld [vmem:[%s20334_s1 + $0x68c] ss:$16 sps:$4 sm:$0xff]  }
  0x98   : > { %1765 = vmatprep.subr.bf16.mxu0 %v13968_v28  ;;  %1929 = vmatprep.subr.bf16.mxu1 %v13971_v29  ;;  %v14058_v28 = vld [vmem:[%s20334_s1 + $0x680] ss:$16 sps:$4 sm:$0xff]   ;;  %v14061_v29 = vld [vmem:[%s20334_s1 + $0x688] ss:$16 sps:$4 sm:$0xff]  }
  0x9b   : > { %1766 = vmatpush1.bf16.msra.mxu0 %v13966_v30  ;;  %1930 = vmatpush1.bf16.msra.mxu1 %v13969_v31  ;;  %v14066_v30 = vld [vmem:[%s20334_s1 + $0x6a4] ss:$16 sps:$4 sm:$0xff]   ;;  %v14069_v31 = vld [vmem:[%s20334_s1 + $0x6ac] ss:$16 sps:$4 sm:$0xff]  }
  0x9c   : > { %1767 = vmatprep.subr.bf16.mxu0 %v13974_v32  ;;  %1931 = vmatprep.subr.bf16.mxu1 %v13977_v33  ;;  %v14064_v32 = vld [vmem:[%s20334_s1 + $0x6a0] ss:$16 sps:$4 sm:$0xff]   ;;  %v14067_v33 = vld [vmem:[%s20334_s1 + $0x6a8] ss:$16 sps:$4 sm:$0xff]  }
  0x9f   : > { %1768 = vmatpush1.bf16.msra.mxu0 %v13972_v34  ;;  %1932 = vmatpush1.bf16.msra.mxu1 %v13975_v35  ;;  %v14072_v34 = vld [vmem:[%s20334_s1 + $0x6c4] ss:$16 sps:$4 sm:$0xff]   ;;  %v14075_v35 = vld [vmem:[%s20334_s1 + $0x6cc] ss:$16 sps:$4 sm:$0xff]  }
  0xa0   : > { %1769 = vmatprep.subr.bf16.mxu0 %v13980_v36  ;;  %1933 = vmatprep.subr.bf16.mxu1 %v13983_v37  ;;  %v14070_v36 = vld [vmem:[%s20334_s1 + $0x6c0] ss:$16 sps:$4 sm:$0xff]   ;;  %v14073_v37 = vld [vmem:[%s20334_s1 + $0x6c8] ss:$16 sps:$4 sm:$0xff]  }
  0xa3   : > { %1770 = vmatpush1.bf16.msra.mxu0 %v13978_v38  ;;  %1934 = vmatpush1.bf16.msra.mxu1 %v13981_v39  ;;  %v14078_v38 = vld [vmem:[%s20334_s1 + $0x6e4] ss:$16 sps:$4 sm:$0xff]   ;;  %v14081_v39 = vld [vmem:[%s20334_s1 + $0x6ec] ss:$16 sps:$4 sm:$0xff]  }
  0xa4   : > { %1771 = vmatprep.subr.bf16.mxu0 %v13986_v40  ;;  %1935 = vmatprep.subr.bf16.mxu1 %v13989_v41  ;;  %v14076_v40 = vld [vmem:[%s20334_s1 + $0x6e0] ss:$16 sps:$4 sm:$0xff]   ;;  %v14079_v41 = vld [vmem:[%s20334_s1 + $0x6e8] ss:$16 sps:$4 sm:$0xff]  }
  0xa7   : > { %1772 = vmatpush1.bf16.msra.mxu0 %v13984_v42  ;;  %1936 = vmatpush1.bf16.msra.mxu1 %v13987_v43  ;;  %v14085_v42 = vld [vmem:[%s20336_s3 + $0x4] ss:$16 sps:$4 sm:$0xff]   ;;  %v14088_v43 = vld [vmem:[%s20336_s3 + $0xc] ss:$16 sps:$4 sm:$0xff]  }
  0xa8   : > { %1773 = vmatprep.subr.bf16.mxu0 %v13992_v44  ;;  %1937 = vmatprep.subr.bf16.mxu1 %v13995_v45  ;;  %v14082_v44 = vld [vmem:[%s16046_s10 + $0x18] ss:$0 sps:$4 sm:$0xff]   ;;  %v14083_v45 = vld [vmem:[%s20336_s3] ss:$16 sps:$4 sm:$0xff]  }
  0xab   : > { %1774 = vmatpush1.bf16.msra.mxu0 %v13990_v46  ;;  %1938 = vmatpush1.bf16.msra.mxu1 %v13993_v47  ;;  %v14086_v46 = vld [vmem:[%s20336_s3 + $0x8] ss:$16 sps:$4 sm:$0xff]   ;;  %v14091_v47 = vld [vmem:[%s20336_s3 + $0x24] ss:$16 sps:$4 sm:$0xff]  }
  0xac   : > { %1775 = vmatprep.subr.bf16.mxu0 %v13998_v48  ;;  %1939 = vmatprep.subr.bf16.mxu1 %v14001_v49  ;;  %v14094_v48 = vld [vmem:[%s20336_s3 + $0x2c] ss:$16 sps:$4 sm:$0xff]   ;;  %v14089_v49 = vld [vmem:[%s20336_s3 + $0x20] ss:$16 sps:$4 sm:$0xff]  }
  0xaf   : > { %1776 = vmatpush1.bf16.msra.mxu0 %v13996_v50  ;;  %1940 = vmatpush1.bf16.msra.mxu1 %v13999_v51  ;;  %v14092_v50 = vld [vmem:[%s20336_s3 + $0x28] ss:$16 sps:$4 sm:$0xff]   ;;  %v14097_v51 = vld [vmem:[%s20336_s3 + $0x44] ss:$16 sps:$4 sm:$0xff]  }
  0xb0   : > { %1777 = vmatprep.subr.bf16.mxu0 %v14004_v52  ;;  %1941 = vmatprep.subr.bf16.mxu1 %v14007_v53  ;;  %v14100_v52 = vld [vmem:[%s20336_s3 + $0x4c] ss:$16 sps:$4 sm:$0xff]   ;;  %v14095_v53 = vld [vmem:[%s20336_s3 + $0x40] ss:$16 sps:$4 sm:$0xff]  }
  0xb3   : > { %1778 = vmatpush1.bf16.msra.mxu0 %v14002_v54  ;;  %1942 = vmatpush1.bf16.msra.mxu1 %v14005_v55  ;;  %v14098_v54 = vld [vmem:[%s20336_s3 + $0x48] ss:$16 sps:$4 sm:$0xff]   ;;  %v14103_v55 = vld [vmem:[%s20336_s3 + $0x64] ss:$16 sps:$4 sm:$0xff]  }
  0xb4   : > { %1779 = vmatprep.subr.bf16.mxu0 %v14010_v56  ;;  %1943 = vmatprep.subr.bf16.mxu1 %v14013_v57  ;;  %v14106_v56 = vld [vmem:[%s20336_s3 + $0x6c] ss:$16 sps:$4 sm:$0xff]   ;;  %v14101_v57 = vld [vmem:[%s20336_s3 + $0x60] ss:$16 sps:$4 sm:$0xff]  }
  0xb7   : > { %1780 = vmatpush1.bf16.msra.mxu0 %v14008_v58  ;;  %1944 = vmatpush1.bf16.msra.mxu1 %v14011_v59  ;;  %v14104_v58 = vld [vmem:[%s20336_s3 + $0x68] ss:$16 sps:$4 sm:$0xff]   ;;  %v14109_v59 = vld [vmem:[%s20336_s3 + $0x84] ss:$16 sps:$4 sm:$0xff]  }
  0xb8   : > { %1781 = vmatprep.subr.bf16.mxu0 %v14016_v60  ;;  %1945 = vmatprep.subr.bf16.mxu1 %v14019_v61  ;;  %v14112_v60 = vld [vmem:[%s20336_s3 + $0x8c] ss:$16 sps:$4 sm:$0xff]   ;;  %v14107_v61 = vld [vmem:[%s20336_s3 + $0x80] ss:$16 sps:$4 sm:$0xff]  }
  0xbb   : > { %1782 = vmatpush1.bf16.msra.mxu0 %v14014_v62  ;;  %1946 = vmatpush1.bf16.msra.mxu1 %v14017_v63  ;;  %v14110_v62 = vld [vmem:[%s20336_s3 + $0x88] ss:$16 sps:$4 sm:$0xff]   ;;  %v14115_v63 = vld [vmem:[%s20336_s3 + $0xa4] ss:$16 sps:$4 sm:$0xff]  }
  0xbc   : > { %1783 = vmatprep.subr.bf16.mxu0 %v14022_v0  ;;  %1947 = vmatprep.subr.bf16.mxu1 %v14025_v1  ;;  %v14118_v0 = vld [vmem:[%s20336_s3 + $0xac] ss:$16 sps:$4 sm:$0xff]   ;;  %v14113_v1 = vld [vmem:[%s20336_s3 + $0xa0] ss:$16 sps:$4 sm:$0xff]  }
  0xbf   : > { %1784 = vmatpush1.bf16.msra.mxu0 %v14020_v2  ;;  %1948 = vmatpush1.bf16.msra.mxu1 %v14023_v3  ;;  %v14116_v2 = vld [vmem:[%s20336_s3 + $0xa8] ss:$16 sps:$4 sm:$0xff]   ;;  %v14121_v3 = vld [vmem:[%s20336_s3 + $0xc4] ss:$16 sps:$4 sm:$0xff]  }
  0xc0   : > { %1785 = vmatprep.subr.bf16.mxu0 %v14028_v4  ;;  %1949 = vmatprep.subr.bf16.mxu1 %v14031_v5  ;;  %v14124_v4 = vld [vmem:[%s20336_s3 + $0xcc] ss:$16 sps:$4 sm:$0xff]   ;;  %v14119_v5 = vld [vmem:[%s20336_s3 + $0xc0] ss:$16 sps:$4 sm:$0xff]  }
  0xc3   : > { %1786 = vmatpush1.bf16.msra.mxu0 %v14026_v6  ;;  %1950 = vmatpush1.bf16.msra.mxu1 %v14029_v7  ;;  %v14122_v6 = vld [vmem:[%s20336_s3 + $0xc8] ss:$16 sps:$4 sm:$0xff]   ;;  %v14127_v7 = vld [vmem:[%s20336_s3 + $0xe4] ss:$16 sps:$4 sm:$0xff]  }
  0xc4   : > { %1796 = vmatprep.subr.bf16.mxu0 %v14036_v8  ;;  %1960 = vmatprep.subr.bf16.mxu1 %v14039_v9  ;;  %v14130_v8 = vld [vmem:[%s20336_s3 + $0xec] ss:$16 sps:$4 sm:$0xff]   ;;  %v14125_v9 = vld [vmem:[%s20336_s3 + $0xe0] ss:$16 sps:$4 sm:$0xff]  }
  0xc6   : > { %1788 = vmatmul.mubr.bf16.vlgmr.msra.gmra.mrb[0].mxu0 %v11104_v13  ;;  %1952 = vmatmul.mubr.bf16.vlgmr.msra.gmra.mrb[0].mxu1 %v11104_v13  ;;  %v14136_v13 = vld [vmem:[%s20336_s3 + $0x10c] ss:$16 sps:$4 sm:$0xff]  }
  0xc7   : > { %1797 = vmatpush1.bf16.msra.mxu0 %v14034_v10  ;;  %1961 = vmatpush1.bf16.msra.mxu1 %v14037_v12  ;;  %v14128_v10 = vld [vmem:[%s20336_s3 + $0xe8] ss:$16 sps:$4 sm:$0xff]   ;;  %v14133_v12 = vld [vmem:[%s20336_s3 + $0x104] ss:$16 sps:$4 sm:$0xff]  }
  0xc8   : > { %1798 = vmatprep.subr.bf16.mxu0 %v14042_v14  ;;  %1962 = vmatprep.subr.bf16.mxu1 %v14045_v15  ;;  %v14131_v14 = vld [vmem:[%s20336_s3 + $0x100] ss:$16 sps:$4 sm:$0xff]   ;;  %v14134_v15 = vld [vmem:[%s20336_s3 + $0x108] ss:$16 sps:$4 sm:$0xff]  }
  0xc9   : > { %1828 = vmatprep.mubr.bf16.mxu0 %v15855_v21  ;;  %1992 = vmatprep.mubr.bf16.mxu1 %v15855_v21  ;;  %v14143_v21 = vld [vmem:[%s20336_s3 + $0x140] ss:$16 sps:$4 sm:$0xff]  }
  0xcb   : > { %1799 = vmatpush1.bf16.msra.mxu0 %v14040_v16  ;;  %1963 = vmatpush1.bf16.msra.mxu1 %v14043_v11  ;;  %v14139_v16 = vld [vmem:[%s20336_s3 + $0x124] ss:$16 sps:$4 sm:$0xff]   ;;  %v14142_v11 = vld [vmem:[%s20336_s3 + $0x12c] ss:$16 sps:$4 sm:$0xff]  }
  0xcc   : > { %1800 = vmatprep.subr.bf16.mxu0 %v14048_v17  ;;  %1964 = vmatprep.subr.bf16.mxu1 %v14051_v18  ;;  %v14137_v17 = vld [vmem:[%s20336_s3 + $0x120] ss:$16 sps:$4 sm:$0xff]   ;;  %v14140_v18 = vld [vmem:[%s20336_s3 + $0x128] ss:$16 sps:$4 sm:$0xff]  }
  0xcf   : > { %1801 = vmatpush1.bf16.msra.mxu0 %v14046_v19  ;;  %1965 = vmatpush1.bf16.msra.mxu1 %v14049_v20  ;;  %v14145_v19 = vld [vmem:[%s20336_s3 + $0x144] ss:$16 sps:$4 sm:$0xff]   ;;  %v14148_v20 = vld [vmem:[%s20336_s3 + $0x14c] ss:$16 sps:$4 sm:$0xff]  }
  0xd0   : > { %1802 = vmatprep.subr.bf16.mxu0 %v14054_v22  ;;  %1966 = vmatprep.subr.bf16.mxu1 %v14057_v23  ;;  %v14146_v22 = vld [vmem:[%s20336_s3 + $0x148] ss:$16 sps:$4 sm:$0xff]   ;;  %v14151_v23 = vld [vmem:[%s20336_s3 + $0x164] ss:$16 sps:$4 sm:$0xff]  }
  0xd3   : > { %1803 = vmatpush1.bf16.msra.mxu0 %v14052_v24  ;;  %1967 = vmatpush1.bf16.msra.mxu1 %v14055_v25  ;;  %v14154_v24 = vld [vmem:[%s20336_s3 + $0x16c] ss:$16 sps:$4 sm:$0xff]   ;;  %v14149_v25 = vld [vmem:[%s20336_s3 + $0x160] ss:$16 sps:$4 sm:$0xff]  }
  0xd4   : > { %1804 = vmatprep.subr.bf16.mxu0 %v14060_v26  ;;  %1968 = vmatprep.subr.bf16.mxu1 %v14063_v27  ;;  %v14152_v26 = vld [vmem:[%s20336_s3 + $0x168] ss:$16 sps:$4 sm:$0xff]   ;;  %v14157_v27 = vld [vmem:[%s20336_s3 + $0x184] ss:$16 sps:$4 sm:$0xff]  }
  0xd7   : > { %1805 = vmatpush1.bf16.msra.mxu0 %v14058_v28  ;;  %1969 = vmatpush1.bf16.msra.mxu1 %v14061_v29  ;;  %v14160_v28 = vld [vmem:[%s20336_s3 + $0x18c] ss:$16 sps:$4 sm:$0xff]   ;;  %v14155_v29 = vld [vmem:[%s20336_s3 + $0x180] ss:$16 sps:$4 sm:$0xff]  }
  0xd8   : > { %1806 = vmatprep.subr.bf16.mxu0 %v14066_v30  ;;  %1970 = vmatprep.subr.bf16.mxu1 %v14069_v31  ;;  %v14158_v30 = vld [vmem:[%s20336_s3 + $0x188] ss:$16 sps:$4 sm:$0xff]   ;;  %v14163_v31 = vld [vmem:[%s20336_s3 + $0x1a4] ss:$16 sps:$4 sm:$0xff]  }
  0xdb   : > { %1807 = vmatpush1.bf16.msra.mxu0 %v14064_v32  ;;  %1971 = vmatpush1.bf16.msra.mxu1 %v14067_v33  ;;  %v14166_v32 = vld [vmem:[%s20336_s3 + $0x1ac] ss:$16 sps:$4 sm:$0xff]   ;;  %v14161_v33 = vld [vmem:[%s20336_s3 + $0x1a0] ss:$16 sps:$4 sm:$0xff]  }
  0xdc   : > { %1808 = vmatprep.subr.bf16.mxu0 %v14072_v34  ;;  %1972 = vmatprep.subr.bf16.mxu1 %v14075_v35  ;;  %v14164_v34 = vld [vmem:[%s20336_s3 + $0x1a8] ss:$16 sps:$4 sm:$0xff]   ;;  %v14169_v35 = vld [vmem:[%s20336_s3 + $0x1c4] ss:$16 sps:$4 sm:$0xff]  }
  0xdf   : > { %1809 = vmatpush1.bf16.msra.mxu0 %v14070_v36  ;;  %1973 = vmatpush1.bf16.msra.mxu1 %v14073_v37  ;;  %v14172_v36 = vld [vmem:[%s20336_s3 + $0x1cc] ss:$16 sps:$4 sm:$0xff]   ;;  %v14167_v37 = vld [vmem:[%s20336_s3 + $0x1c0] ss:$16 sps:$4 sm:$0xff]  }
  0xe0   : > { %1810 = vmatprep.subr.bf16.mxu0 %v14078_v38  ;;  %1974 = vmatprep.subr.bf16.mxu1 %v14081_v39  ;;  %v14170_v38 = vld [vmem:[%s20336_s3 + $0x1c8] ss:$16 sps:$4 sm:$0xff]   ;;  %v14175_v39 = vld [vmem:[%s20336_s3 + $0x1e4] ss:$16 sps:$4 sm:$0xff]  }
  0xe3   : > { %1811 = vmatpush1.bf16.msra.mxu0 %v14076_v40  ;;  %1975 = vmatpush1.bf16.msra.mxu1 %v14079_v41  ;;  %v14178_v40 = vld [vmem:[%s20336_s3 + $0x1ec] ss:$16 sps:$4 sm:$0xff]   ;;  %v14173_v41 = vld [vmem:[%s20336_s3 + $0x1e0] ss:$16 sps:$4 sm:$0xff]  }
  0xe4   : > { %2799 = vmatprep.subr.bf16.mxu0 %v14085_v42  ;;  %2881 = vmatprep.subr.bf16.mxu1 %v14088_v43  ;;  %v14176_v42 = vld [vmem:[%s20336_s3 + $0x1e8] ss:$16 sps:$4 sm:$0xff]   ;;  %v14181_v43 = vld [vmem:[%s20336_s3 + $0x204] ss:$16 sps:$4 sm:$0xff]  }
  0xe6   : > { %1829 = vmatmul.mubr.bf16.vlgmr.msra.gmra.mrb[0].mxu0 %v14082_v44  ;;  %1993 = vmatmul.mubr.bf16.vlgmr.msra.gmra.mrb[0].mxu1 %v14082_v44  ;;  %v14184_v44 = vld [vmem:[%s20336_s3 + $0x20c] ss:$16 sps:$4 sm:$0xff]  }
  0xe7   : > { %2800 = vmatpush1.bf16.msra.mxu0 %v14083_v45  ;;  %2882 = vmatpush1.bf16.msra.mxu1 %v14086_v46  ;;  %v508_v45 = vlaneseq }
  0xe8   : > { %2801 = vmatprep.subr.bf16.mxu0 %v14091_v47  ;;  %2883 = vmatprep.subr.bf16.mxu1 %v14094_v48  ;;  %v16811_v48 = vld [vmem:[%s20335_s2] sm:$0xf] }
  0xe9   : > { %v16803_v46 = vshrl.u32 %v508_v45, 7 }
  0xeb   : > { %2802 = vmatpush1.bf16.msra.mxu0 %v14089_v49  ;;  %2884 = vmatpush1.bf16.msra.mxu1 %v14092_v50  ;;  %v16806_v47 = vsub.s32 0, %v16803_v46  ;;  %v16814_v49 = vsub.s32 1, %v16803_v46  ;;  %v16817_v50 = vsub.s32 3, %v16803_v46 }
  0xec   : > { %2803 = vmatprep.subr.bf16.mxu0 %v14097_v51  ;;  %2885 = vmatprep.subr.bf16.mxu1 %v14100_v52 }
  0xed   : > { %v511_v51 = vrot.slane %v16811_v48, %v16806_v47  ;;  %v515_v52 = vrot.slane %v16811_v48, %v16814_v49 }
  0xef   : > { %2804 = vmatpush1.bf16.msra.mxu0 %v14095_v53  ;;  %2886 = vmatpush1.bf16.msra.mxu1 %v14098_v54  ;;  %v523_v53 = vrot.slane %v16811_v48, %v16817_v50 }
  0xf0   : > { %2805 = vmatprep.subr.bf16.mxu0 %v14103_v55  ;;  %2887 = vmatprep.subr.bf16.mxu1 %v14106_v56 }
  0xf3   : > { %2806 = vmatpush1.bf16.msra.mxu0 %v14101_v57  ;;  %2888 = vmatpush1.bf16.msra.mxu1 %v14104_v58 }
  0xf4   : > { %2807 = vmatprep.subr.bf16.mxu0 %v14109_v59  ;;  %2889 = vmatprep.subr.bf16.mxu1 %v14112_v60 }
  0xf7   : > { %2808 = vmatpush1.bf16.msra.mxu0 %v14107_v61  ;;  %2890 = vmatpush1.bf16.msra.mxu1 %v14110_v62 }
  0xf8   : > { %2809 = vmatprep.subr.bf16.mxu0 %v14115_v63  ;;  %2891 = vmatprep.subr.bf16.mxu1 %v14118_v0 }
  0xfb   : > { %2810 = vmatpush1.bf16.msra.mxu0 %v14113_v1  ;;  %2892 = vmatpush1.bf16.msra.mxu1 %v14116_v2 }
  0xfc   : > { %2811 = vmatprep.subr.bf16.mxu0 %v14121_v3  ;;  %2893 = vmatprep.subr.bf16.mxu1 %v14124_v4  ;;  %v14179_v3 = vld [vmem:[%s20336_s3 + $0x200] ss:$16 sps:$4 sm:$0xff]   ;;  %v14182_v4 = vld [vmem:[%s20336_s3 + $0x208] ss:$16 sps:$4 sm:$0xff]  }
  0xff   : > { %2812 = vmatpush1.bf16.msra.mxu0 %v14119_v5  ;;  %2894 = vmatpush1.bf16.msra.mxu1 %v14122_v6 }
 0x100   : > { %2813 = vmatprep.subr.bf16.mxu0 %v14127_v7  ;;  %2895 = vmatprep.subr.bf16.mxu1 %v14130_v8  ;;  %v14187_v7 = vld [vmem:[%s20336_s3 + $0x224] ss:$16 sps:$4 sm:$0xff]   ;;  %v14190_v8 = vld [vmem:[%s20336_s3 + $0x22c] ss:$16 sps:$4 sm:$0xff]  }
 0x103   : > { %2814 = vmatpush1.bf16.msra.mxu0 %v14125_v9  ;;  %2896 = vmatpush1.bf16.msra.mxu1 %v14128_v10  ;;  %v14185_v10 = vld [vmem:[%s20336_s3 + $0x220] ss:$16 sps:$4 sm:$0xff]  }
 0x104   : > { %2815 = vmatprep.subr.bf16.mxu0 %v14133_v12  ;;  %2897 = vmatprep.subr.bf16.mxu1 %v14136_v13  ;;  %v14188_v12 = vld [vmem:[%s20336_s3 + $0x228] ss:$16 sps:$4 sm:$0xff]  }
 0x107   : > { %2816 = vmatpush1.bf16.msra.mxu0 %v14131_v14  ;;  %2898 = vmatpush1.bf16.msra.mxu1 %v14134_v15  ;;  %v14193_v14 = vld [vmem:[%s20336_s3 + $0x244] ss:$16 sps:$4 sm:$0xff]   ;;  %v14196_v15 = vld [vmem:[%s20336_s3 + $0x24c] ss:$16 sps:$4 sm:$0xff]  }
 0x108   : > { %2817 = vmatprep.subr.bf16.mxu0 %v14139_v16  ;;  %2899 = vmatprep.subr.bf16.mxu1 %v14142_v11  ;;  %v14191_v16 = vld [vmem:[%s20336_s3 + $0x240] ss:$16 sps:$4 sm:$0xff]   ;;  %v14194_v11 = vld [vmem:[%s20336_s3 + $0x248] ss:$16 sps:$4 sm:$0xff]  }
 0x10b   : > { %2818 = vmatpush1.bf16.msra.mxu0 %v14137_v17  ;;  %2900 = vmatpush1.bf16.msra.mxu1 %v14140_v18  ;;  %v14199_v17 = vld [vmem:[%s20336_s3 + $0x264] ss:$16 sps:$4 sm:$0xff]   ;;  %v14202_v18 = vld [vmem:[%s20336_s3 + $0x26c] ss:$16 sps:$4 sm:$0xff]  }
 0x10c   : > { %2819 = vmatprep.subr.bf16.mxu0 %v14145_v19  ;;  %2901 = vmatprep.subr.bf16.mxu1 %v14148_v20  ;;  %v14197_v19 = vld [vmem:[%s20336_s3 + $0x260] ss:$16 sps:$4 sm:$0xff]   ;;  %v14200_v20 = vld [vmem:[%s20336_s3 + $0x268] ss:$16 sps:$4 sm:$0xff]  }
 0x10f   : > { %2820 = vmatpush1.bf16.msra.mxu0 %v14143_v21  ;;  %2902 = vmatpush1.bf16.msra.mxu1 %v14146_v22  ;;  %v14205_v21 = vld [vmem:[%s20336_s3 + $0x284] ss:$16 sps:$4 sm:$0xff]   ;;  %v14208_v22 = vld [vmem:[%s20336_s3 + $0x28c] ss:$16 sps:$4 sm:$0xff]  }
 0x110   : > { %2821 = vmatprep.subr.bf16.mxu0 %v14151_v23  ;;  %2903 = vmatprep.subr.bf16.mxu1 %v14154_v24  ;;  %v14203_v23 = vld [vmem:[%s20336_s3 + $0x280] ss:$16 sps:$4 sm:$0xff]   ;;  %v14206_v24 = vld [vmem:[%s20336_s3 + $0x288] ss:$16 sps:$4 sm:$0xff]  }
 0x113   : > { %2822 = vmatpush1.bf16.msra.mxu0 %v14149_v25  ;;  %2904 = vmatpush1.bf16.msra.mxu1 %v14152_v26  ;;  %v14211_v25 = vld [vmem:[%s20336_s3 + $0x2a4] ss:$16 sps:$4 sm:$0xff]   ;;  %v14214_v26 = vld [vmem:[%s20336_s3 + $0x2ac] ss:$16 sps:$4 sm:$0xff]  }
 0x114   : > { %2823 = vmatprep.subr.bf16.mxu0 %v14157_v27  ;;  %2905 = vmatprep.subr.bf16.mxu1 %v14160_v28  ;;  %v14209_v27 = vld [vmem:[%s20336_s3 + $0x2a0] ss:$16 sps:$4 sm:$0xff]   ;;  %v14212_v28 = vld [vmem:[%s20336_s3 + $0x2a8] ss:$16 sps:$4 sm:$0xff]  }
 0x117   : > { %2824 = vmatpush1.bf16.msra.mxu0 %v14155_v29  ;;  %2906 = vmatpush1.bf16.msra.mxu1 %v14158_v30  ;;  %v14217_v29 = vld [vmem:[%s20336_s3 + $0x2c4] ss:$16 sps:$4 sm:$0xff]   ;;  %v14220_v30 = vld [vmem:[%s20336_s3 + $0x2cc] ss:$16 sps:$4 sm:$0xff]  }
 0x118   : > { %2825 = vmatprep.subr.bf16.mxu0 %v14163_v31  ;;  %2907 = vmatprep.subr.bf16.mxu1 %v14166_v32  ;;  %v14215_v31 = vld [vmem:[%s20336_s3 + $0x2c0] ss:$16 sps:$4 sm:$0xff]   ;;  %v14218_v32 = vld [vmem:[%s20336_s3 + $0x2c8] ss:$16 sps:$4 sm:$0xff]  }
 0x11b   : > { %2826 = vmatpush1.bf16.msra.mxu0 %v14161_v33  ;;  %2908 = vmatpush1.bf16.msra.mxu1 %v14164_v34  ;;  %v14223_v33 = vld [vmem:[%s20336_s3 + $0x2e4] ss:$16 sps:$4 sm:$0xff]   ;;  %v14226_v34 = vld [vmem:[%s20336_s3 + $0x2ec] ss:$16 sps:$4 sm:$0xff]  }
 0x11c   : > { %2827 = vmatprep.subr.bf16.mxu0 %v14169_v35  ;;  %2909 = vmatprep.subr.bf16.mxu1 %v14172_v36  ;;  %v14221_v35 = vld [vmem:[%s20336_s3 + $0x2e0] ss:$16 sps:$4 sm:$0xff]   ;;  %v14224_v36 = vld [vmem:[%s20336_s3 + $0x2e8] ss:$16 sps:$4 sm:$0xff]  }
 0x11f   : > { %2828 = vmatpush1.bf16.msra.mxu0 %v14167_v37  ;;  %2910 = vmatpush1.bf16.msra.mxu1 %v14170_v38  ;;  %v14229_v37 = vld [vmem:[%s20336_s3 + $0x304] ss:$16 sps:$4 sm:$0xff]   ;;  %v14232_v38 = vld [vmem:[%s20336_s3 + $0x30c] ss:$16 sps:$4 sm:$0xff]  }
 0x120   : > { %2829 = vmatprep.subr.bf16.mxu0 %v14175_v39  ;;  %2911 = vmatprep.subr.bf16.mxu1 %v14178_v40  ;;  %v14227_v39 = vld [vmem:[%s20336_s3 + $0x300] ss:$16 sps:$4 sm:$0xff]   ;;  %v14230_v40 = vld [vmem:[%s20336_s3 + $0x308] ss:$16 sps:$4 sm:$0xff]  }
 0x123   : > { %2830 = vmatpush1.bf16.msra.mxu0 %v14173_v41  ;;  %2912 = vmatpush1.bf16.msra.mxu1 %v14176_v42  ;;  %v14235_v41 = vld [vmem:[%s20336_s3 + $0x324] ss:$16 sps:$4 sm:$0xff]   ;;  %v14238_v42 = vld [vmem:[%s20336_s3 + $0x32c] ss:$16 sps:$4 sm:$0xff]  }
 0x124   : > { %2840 = vmatprep.subr.bf16.mxu0 %v14181_v43  ;;  %2922 = vmatprep.subr.bf16.mxu1 %v14184_v44  ;;  %v14233_v43 = vld [vmem:[%s20336_s3 + $0x320] ss:$16 sps:$4 sm:$0xff]   ;;  %v14236_v44 = vld [vmem:[%s20336_s3 + $0x328] ss:$16 sps:$4 sm:$0xff]  }
 0x1b9   : > { %v1830_v54 = vpop.f32.mrb[0].mxu0  ;;  %v16825_v55 = vpop.f32.mrb[0].mxu1 }
 0x1ba   : > { %v13594_v56 = vadd.f32 %v1830_v54, %v511_v51  ;;  %v1832_v57 = vpop.f32.mrb[1].mxu0  ;;  %v1996_v58 = vpop.f32.mrb[1].mxu1  ;;  %v14241_v51 = vld [vmem:[%s20336_s3 + $0x344] ss:$16 sps:$4 sm:$0xff]   ;;  %v14242_v54 = vld [vmem:[%s20336_s3 + $0x348] ss:$16 sps:$4 sm:$0xff]  }
 0x1bb   : > { %v13595_v59 = vadd.f32 %v1832_v57, %v515_v52  ;;  %v13597_v60 = vadd.f32 %v1996_v58, %v523_v53  ;;  %v1834_v61 = vpop.f32.mrb[2].mxu0  ;;  %v1998_v62 = vpop.f32.mrb[2].mxu1  ;;  %v14244_v52 = vld [vmem:[%s20336_s3 + $0x34c] ss:$16 sps:$4 sm:$0xff]   ;;  %v14239_v53 = vld [vmem:[%s20336_s3 + $0x340] ss:$16 sps:$4 sm:$0xff]  }
 0x1bc   : > { %v2001_v63 = vmax.f32 %v13594_v56, 0.0  ;;  %v1835_v0 = vpop.f32.mrb[3].mxu0  ;;  %v1999_v1 = vpop.f32.mrb[3].mxu1  ;;  %v14247_v56 = vld [vmem:[%s20336_s3 + $0x364] ss:$16 sps:$4 sm:$0xff]  }
 0x1bd   : > { %v2002_v2 = vmax.f32 %v13595_v59, 0.0  ;;  %v2004_v5 = vmax.f32 %v13597_v60, 0.0  ;;  %v14250_v57 = vld [vmem:[%s20336_s3 + $0x36c] ss:$16 sps:$4 sm:$0xff]   ;;  %v14245_v58 = vld [vmem:[%s20336_s3 + $0x360] ss:$16 sps:$4 sm:$0xff]  }
 0x1be   : > { %v2005_v9 = vpack.c.bf16 %v2001_v63, %v2001_v63  ;;  %v14248_v59 = vld [vmem:[%s20336_s3 + $0x368] ss:$16 sps:$4 sm:$0xff]   ;;  %v14253_v60 = vld [vmem:[%s20336_s3 + $0x384] ss:$16 sps:$4 sm:$0xff]   ;;  %v14256_v61 = vld [vmem:[%s20336_s3 + $0x38c] ss:$16 sps:$4 sm:$0xff]  }
 0x1bf   : > { %v2006_v6 = vpack.c.bf16 %v2002_v2, %v2002_v2  ;;  %v2008_v13 = vpack.c.bf16 %v2004_v5, %v2004_v5  ;;  %v14251_v62 = vld [vmem:[%s20336_s3 + $0x380] ss:$16 sps:$4 sm:$0xff]   ;;  %v14254_v63 = vld [vmem:[%s20336_s3 + $0x388] ss:$16 sps:$4 sm:$0xff]   ;;  %v14259_v0 = vld [vmem:[%s20336_s3 + $0x3a4] ss:$16 sps:$4 sm:$0xff]  }
 0x1c0   : > { %v14262_v1 = vld [vmem:[%s20336_s3 + $0x3ac] ss:$16 sps:$4 sm:$0xff]   ;;  %v16984_v2 = vsub.s32 2, %v16803_v46  ;;  %v14265_v5 = vld [vmem:[%s20336_s3 + $0x3c4] ss:$16 sps:$4 sm:$0xff]  }
 0x1c1   : > { %2831 = vmatprep.mubr.bf16.mxu0 %v2006_v6  ;;  %2913 = vmatprep.mubr.bf16.mxu1 %v2006_v6  ;;  %v14268_v6 = vld [vmem:[%s20336_s3 + $0x3cc] ss:$16 sps:$4 sm:$0xff]  }
 0x1c2   : > { %2832 = vmatmul.mubr.bf16.vlgmr.msra.gmra.mrb[4].mxu0 %v2005_v9  ;;  %2914 = vmatmul.mubr.bf16.vlgmr.msra.gmra.mrb[4].mxu1 %v2005_v9  ;;  %v519_v46 = vrot.slane %v16811_v48, %v16984_v2  ;;  %v14271_v9 = vld [vmem:[%s20336_s3 + $0x3e4] ss:$16 sps:$4 sm:$0xff]  }
 0x1c3   : > { %2841 = vmatpush1.bf16.msra.mxu0 %v14179_v3  ;;  %2923 = vmatpush1.bf16.msra.mxu1 %v14182_v4  ;;  %v14257_v3 = vld [vmem:[%s20336_s3 + $0x3a0] ss:$16 sps:$4 sm:$0xff]   ;;  %v14260_v4 = vld [vmem:[%s20336_s3 + $0x3a8] ss:$16 sps:$4 sm:$0xff]  }
 0x1c4   : > { %2872 = vmatprep.mubr.bf16.mxu0 %v2008_v13  ;;  %2954 = vmatprep.mubr.bf16.mxu1 %v2008_v13  ;;  %v13596_v48 = vadd.f32 %v16825_v55, %v519_v46  ;;  %v14272_v13 = vld [vmem:[%s20336_s3 + $0x3e8] ss:$16 sps:$4 sm:$0xff]   ;;  %v14352_v46 = vld [vmem:[%s20336_s3 + $0x58c] ss:$16 sps:$4 sm:$0xff]  }
 0x1c5   : > { %2842 = vmatprep.subr.bf16.mxu0 %v14187_v7  ;;  %2924 = vmatprep.subr.bf16.mxu1 %v14190_v8  ;;  %v14263_v7 = vld [vmem:[%s20336_s3 + $0x3c0] ss:$16 sps:$4 sm:$0xff]   ;;  %v14266_v8 = vld [vmem:[%s20336_s3 + $0x3c8] ss:$16 sps:$4 sm:$0xff]  }
 0x1c6   : > { %v2003_v55 = vmax.f32 %v13596_v48, 0.0  ;;  %v14353_v48 = vld [vmem:[%s20336_s3 + $0x5a0] ss:$16 sps:$4 sm:$0xff]  }
 0x1c7   : > { %2843 = vmatpush1.bf16.msra.mxu0 %v14185_v10  ;;  %2925 = vmatpush1.bf16.msra.mxu1 %v14188_v12  ;;  %v14274_v10 = vld [vmem:[%s20336_s3 + $0x3ec] ss:$16 sps:$4 sm:$0xff]   ;;  %v14269_v12 = vld [vmem:[%s20336_s3 + $0x3e0] ss:$16 sps:$4 sm:$0xff]  }
 0x1c8   : > { %2844 = vmatprep.subr.bf16.mxu0 %v14193_v14  ;;  %2926 = vmatprep.subr.bf16.mxu1 %v14196_v15  ;;  %v14277_v14 = vld [vmem:[%s20336_s3 + $0x404] ss:$16 sps:$4 sm:$0xff]   ;;  %v14280_v15 = vld [vmem:[%s20336_s3 + $0x40c] ss:$16 sps:$4 sm:$0xff]  }
 0x1cb   : > { %2845 = vmatpush1.bf16.msra.mxu0 %v14191_v16  ;;  %2927 = vmatpush1.bf16.msra.mxu1 %v14194_v11  ;;  %v14275_v16 = vld [vmem:[%s20336_s3 + $0x400] ss:$16 sps:$4 sm:$0xff]   ;;  %v14278_v11 = vld [vmem:[%s20336_s3 + $0x408] ss:$16 sps:$4 sm:$0xff]  }
 0x1cc   : > { %2846 = vmatprep.subr.bf16.mxu0 %v14199_v17  ;;  %2928 = vmatprep.subr.bf16.mxu1 %v14202_v18  ;;  %v14283_v17 = vld [vmem:[%s20336_s3 + $0x424] ss:$16 sps:$4 sm:$0xff]   ;;  %v14286_v18 = vld [vmem:[%s20336_s3 + $0x42c] ss:$16 sps:$4 sm:$0xff]  }
 0x1cf   : > { %2847 = vmatpush1.bf16.msra.mxu0 %v14197_v19  ;;  %2929 = vmatpush1.bf16.msra.mxu1 %v14200_v20  ;;  %v2007_v19 = vpack.c.bf16 %v2003_v55, %v2003_v55  ;;  %v14281_v20 = vld [vmem:[%s20336_s3 + $0x420] ss:$16 sps:$4 sm:$0xff]   ;;  %v14362_v55 = vld [vmem:[%s20336_s3 + $0x5c8] ss:$16 sps:$4 sm:$0xff]  }
 0x1d0   : > { %2848 = vmatprep.subr.bf16.mxu0 %v14205_v21  ;;  %2930 = vmatprep.subr.bf16.mxu1 %v14208_v22  ;;  %v14284_v21 = vld [vmem:[%s20336_s3 + $0x428] ss:$16 sps:$4 sm:$0xff]   ;;  %v14289_v22 = vld [vmem:[%s20336_s3 + $0x444] ss:$16 sps:$4 sm:$0xff]  }
 0x1d3   : > { %2849 = vmatpush1.bf16.msra.mxu0 %v14203_v23  ;;  %2931 = vmatpush1.bf16.msra.mxu1 %v14206_v24  ;;  %v14292_v23 = vld [vmem:[%s20336_s3 + $0x44c] ss:$16 sps:$4 sm:$0xff]   ;;  %v14287_v24 = vld [vmem:[%s20336_s3 + $0x440] ss:$16 sps:$4 sm:$0xff]  }
 0x1d4   : > { %2850 = vmatprep.subr.bf16.mxu0 %v14211_v25  ;;  %2932 = vmatprep.subr.bf16.mxu1 %v14214_v26  ;;  %v14290_v25 = vld [vmem:[%s20336_s3 + $0x448] ss:$16 sps:$4 sm:$0xff]   ;;  %v14295_v26 = vld [vmem:[%s20336_s3 + $0x464] ss:$16 sps:$4 sm:$0xff]  }
 0x1d7   : > { %2851 = vmatpush1.bf16.msra.mxu0 %v14209_v27  ;;  %2933 = vmatpush1.bf16.msra.mxu1 %v14212_v28  ;;  %v14298_v27 = vld [vmem:[%s20336_s3 + $0x46c] ss:$16 sps:$4 sm:$0xff]   ;;  %v14293_v28 = vld [vmem:[%s20336_s3 + $0x460] ss:$16 sps:$4 sm:$0xff]  }
 0x1d8   : > { %2852 = vmatprep.subr.bf16.mxu0 %v14217_v29  ;;  %2934 = vmatprep.subr.bf16.mxu1 %v14220_v30  ;;  %v14296_v29 = vld [vmem:[%s20336_s3 + $0x468] ss:$16 sps:$4 sm:$0xff]   ;;  %v14301_v30 = vld [vmem:[%s20336_s3 + $0x484] ss:$16 sps:$4 sm:$0xff]  }
 0x1db   : > { %2853 = vmatpush1.bf16.msra.mxu0 %v14215_v31  ;;  %2935 = vmatpush1.bf16.msra.mxu1 %v14218_v32  ;;  %v14304_v31 = vld [vmem:[%s20336_s3 + $0x48c] ss:$16 sps:$4 sm:$0xff]   ;;  %v14299_v32 = vld [vmem:[%s20336_s3 + $0x480] ss:$16 sps:$4 sm:$0xff]  }
 0x1dc   : > { %2854 = vmatprep.subr.bf16.mxu0 %v14223_v33  ;;  %2936 = vmatprep.subr.bf16.mxu1 %v14226_v34  ;;  %v14302_v33 = vld [vmem:[%s20336_s3 + $0x488] ss:$16 sps:$4 sm:$0xff]   ;;  %v14307_v34 = vld [vmem:[%s20336_s3 + $0x4a4] ss:$16 sps:$4 sm:$0xff]  }
 0x1df   : > { %2855 = vmatpush1.bf16.msra.mxu0 %v14221_v35  ;;  %2937 = vmatpush1.bf16.msra.mxu1 %v14224_v36  ;;  %v14310_v35 = vld [vmem:[%s20336_s3 + $0x4ac] ss:$16 sps:$4 sm:$0xff]   ;;  %v14305_v36 = vld [vmem:[%s20336_s3 + $0x4a0] ss:$16 sps:$4 sm:$0xff]  }
 0x1e0   : > { %2856 = vmatprep.subr.bf16.mxu0 %v14229_v37  ;;  %2938 = vmatprep.subr.bf16.mxu1 %v14232_v38  ;;  %v14308_v37 = vld [vmem:[%s20336_s3 + $0x4a8] ss:$16 sps:$4 sm:$0xff]   ;;  %v14313_v38 = vld [vmem:[%s20336_s3 + $0x4c4] ss:$16 sps:$4 sm:$0xff]  }
 0x1e3   : > { %2857 = vmatpush1.bf16.msra.mxu0 %v14227_v39  ;;  %2939 = vmatpush1.bf16.msra.mxu1 %v14230_v40  ;;  %v14316_v39 = vld [vmem:[%s20336_s3 + $0x4cc] ss:$16 sps:$4 sm:$0xff]   ;;  %v14311_v40 = vld [vmem:[%s20336_s3 + $0x4c0] ss:$16 sps:$4 sm:$0xff]  }
 0x1e4   : > { %2858 = vmatprep.subr.bf16.mxu0 %v14235_v41  ;;  %2940 = vmatprep.subr.bf16.mxu1 %v14238_v42  ;;  %v14314_v41 = vld [vmem:[%s20336_s3 + $0x4c8] ss:$16 sps:$4 sm:$0xff]   ;;  %v14319_v42 = vld [vmem:[%s20336_s3 + $0x4e4] ss:$16 sps:$4 sm:$0xff]  }
 0x1e7   : > { %2859 = vmatpush1.bf16.msra.mxu0 %v14233_v43  ;;  %2941 = vmatpush1.bf16.msra.mxu1 %v14236_v44  ;;  %v14322_v43 = vld [vmem:[%s20336_s3 + $0x4ec] ss:$16 sps:$4 sm:$0xff]   ;;  %v14317_v44 = vld [vmem:[%s20336_s3 + $0x4e0] ss:$16 sps:$4 sm:$0xff]  }
 0x1e8   : > { %2860 = vmatprep.subr.bf16.mxu0 %v14241_v51  ;;  %2942 = vmatprep.subr.bf16.mxu1 %v14244_v52  ;;  %v14320_v51 = vld [vmem:[%s20336_s3 + $0x4e8] ss:$16 sps:$4 sm:$0xff]   ;;  %v14325_v52 = vld [vmem:[%s20336_s3 + $0x504] ss:$16 sps:$4 sm:$0xff]  }
 0x1eb   : > { %2861 = vmatpush1.bf16.msra.mxu0 %v14239_v53  ;;  %2943 = vmatpush1.bf16.msra.mxu1 %v14242_v54  ;;  %v14328_v53 = vld [vmem:[%s20336_s3 + $0x50c] ss:$16 sps:$4 sm:$0xff]   ;;  %v14323_v54 = vld [vmem:[%s20336_s3 + $0x500] ss:$16 sps:$4 sm:$0xff]  }
 0x1ec   : > { %2862 = vmatprep.subr.bf16.mxu0 %v14247_v56  ;;  %2944 = vmatprep.subr.bf16.mxu1 %v14250_v57  ;;  %v14326_v56 = vld [vmem:[%s20336_s3 + $0x508] ss:$16 sps:$4 sm:$0xff]   ;;  %v14331_v57 = vld [vmem:[%s20336_s3 + $0x524] ss:$16 sps:$4 sm:$0xff]  }
 0x1ef   : > { %2863 = vmatpush1.bf16.msra.mxu0 %v14245_v58  ;;  %2945 = vmatpush1.bf16.msra.mxu1 %v14248_v59  ;;  %v14334_v58 = vld [vmem:[%s20336_s3 + $0x52c] ss:$16 sps:$4 sm:$0xff]   ;;  %v14329_v59 = vld [vmem:[%s20336_s3 + $0x520] ss:$16 sps:$4 sm:$0xff]  }
 0x1f0   : > { %2864 = vmatprep.subr.bf16.mxu0 %v14253_v60  ;;  %2946 = vmatprep.subr.bf16.mxu1 %v14256_v61  ;;  %v14332_v60 = vld [vmem:[%s20336_s3 + $0x528] ss:$16 sps:$4 sm:$0xff]   ;;  %v14337_v61 = vld [vmem:[%s20336_s3 + $0x544] ss:$16 sps:$4 sm:$0xff]  }
 0x1f3   : > { %2865 = vmatpush1.bf16.msra.mxu0 %v14251_v62  ;;  %2947 = vmatpush1.bf16.msra.mxu1 %v14254_v63  ;;  %v14340_v62 = vld [vmem:[%s20336_s3 + $0x54c] ss:$16 sps:$4 sm:$0xff]   ;;  %v14335_v63 = vld [vmem:[%s20336_s3 + $0x540] ss:$16 sps:$4 sm:$0xff]  }
 0x1f4   : > { %2866 = vmatprep.subr.bf16.mxu0 %v14259_v0  ;;  %2948 = vmatprep.subr.bf16.mxu1 %v14262_v1  ;;  %v14338_v0 = vld [vmem:[%s20336_s3 + $0x548] ss:$16 sps:$4 sm:$0xff]   ;;  %v14343_v1 = vld [vmem:[%s20336_s3 + $0x564] ss:$16 sps:$4 sm:$0xff]  }
 0x1f7   : > { %2867 = vmatpush1.bf16.msra.mxu0 %v14257_v3  ;;  %2949 = vmatpush1.bf16.msra.mxu1 %v14260_v4  ;;  %v14346_v3 = vld [vmem:[%s20336_s3 + $0x56c] ss:$16 sps:$4 sm:$0xff]   ;;  %v14341_v4 = vld [vmem:[%s20336_s3 + $0x560] ss:$16 sps:$4 sm:$0xff]  }
 0x1f8   : > { %2868 = vmatprep.subr.bf16.mxu0 %v14265_v5  ;;  %2950 = vmatprep.subr.bf16.mxu1 %v14268_v6  ;;  %v14344_v5 = vld [vmem:[%s20336_s3 + $0x568] ss:$16 sps:$4 sm:$0xff]   ;;  %v14349_v6 = vld [vmem:[%s20336_s3 + $0x584] ss:$16 sps:$4 sm:$0xff]  }
 0x1fb   : > { %2869 = vmatpush1.bf16.msra.mxu0 %v14263_v7  ;;  %2951 = vmatpush1.bf16.msra.mxu1 %v14266_v8  ;;  %v14347_v7 = vld [vmem:[%s20336_s3 + $0x580] ss:$16 sps:$4 sm:$0xff]   ;;  %v14350_v8 = vld [vmem:[%s20336_s3 + $0x588] ss:$16 sps:$4 sm:$0xff]  }
 0x1fc   : > { %2870 = vmatprep.subr.bf16.mxu0 %v14271_v9  ;;  %2952 = vmatprep.subr.bf16.mxu1 %v14274_v10  ;;  %v14355_v9 = vld [vmem:[%s20336_s3 + $0x5a4] ss:$16 sps:$4 sm:$0xff]   ;;  %v14358_v10 = vld [vmem:[%s20336_s3 + $0x5ac] ss:$16 sps:$4 sm:$0xff]  }
 0x1ff   : > { %2871 = vmatpush1.bf16.msra.mxu0 %v14269_v12  ;;  %2953 = vmatpush1.bf16.msra.mxu1 %v14272_v13  ;;  %v14356_v12 = vld [vmem:[%s20336_s3 + $0x5a8] ss:$16 sps:$4 sm:$0xff]   ;;  %v14361_v13 = vld [vmem:[%s20336_s3 + $0x5c4] ss:$16 sps:$4 sm:$0xff]  }
 0x200   : > { %3763 = vmatprep.subr.bf16.mxu0 %v14277_v14  ;;  %3845 = vmatprep.subr.bf16.mxu1 %v14280_v15  ;;  %v14364_v14 = vld [vmem:[%s20336_s3 + $0x5cc] ss:$16 sps:$4 sm:$0xff]   ;;  %v14359_v15 = vld [vmem:[%s20336_s3 + $0x5c0] ss:$16 sps:$4 sm:$0xff]  }
 0x202   : > { %2873 = vmatmul.mubr.bf16.vlgmr.msra.gmra.mrb[4].mxu0 %v2007_v19  ;;  %2955 = vmatmul.mubr.bf16.vlgmr.msra.gmra.mrb[4].mxu1 %v2007_v19  ;;  %v14373_v19 = vld [vmem:[%s20336_s3 + $0x604] ss:$16 sps:$4 sm:$0xff]  }
 0x203   : > { %3764 = vmatpush1.bf16.msra.mxu0 %v14275_v16  ;;  %3846 = vmatpush1.bf16.msra.mxu1 %v14278_v11  ;;  %v14367_v16 = vld [vmem:[%s20336_s3 + $0x5e4] ss:$16 sps:$4 sm:$0xff]   ;;  %v14370_v11 = vld [vmem:[%s20336_s3 + $0x5ec] ss:$16 sps:$4 sm:$0xff]  }
 0x204   : > { %3765 = vmatprep.subr.bf16.mxu0 %v14283_v17  ;;  %3847 = vmatprep.subr.bf16.mxu1 %v14286_v18  ;;  %v14365_v17 = vld [vmem:[%s20336_s3 + $0x5e0] ss:$16 sps:$4 sm:$0xff]   ;;  %v14368_v18 = vld [vmem:[%s20336_s3 + $0x5e8] ss:$16 sps:$4 sm:$0xff]  }
 0x207   : > { %3766 = vmatpush1.bf16.msra.mxu0 %v14281_v20  ;;  %3848 = vmatpush1.bf16.msra.mxu1 %v14284_v21  ;;  %v14376_v20 = vld [vmem:[%s20336_s3 + $0x60c] ss:$16 sps:$4 sm:$0xff]   ;;  %v17220_v21 = vld [vmem:[%s20337_s4] sm:$0xf] }
 0x208   : > { %3767 = vmatprep.subr.bf16.mxu0 %v14289_v22  ;;  %3849 = vmatprep.subr.bf16.mxu1 %v14292_v23  ;;  %v2142_v22 = vrot.slane %v17220_v21, %v16806_v47  ;;  %v2146_v23 = vrot.slane %v17220_v21, %v16814_v49 }
 0x20b   : > { %3768 = vmatpush1.bf16.msra.mxu0 %v14287_v24  ;;  %3850 = vmatpush1.bf16.msra.mxu1 %v14290_v25  ;;  %v2154_v24 = vrot.slane %v17220_v21, %v16817_v50 }
 0x20c   : > { %3769 = vmatprep.subr.bf16.mxu0 %v14295_v26  ;;  %3851 = vmatprep.subr.bf16.mxu1 %v14298_v27 }
 0x20f   : > { %3770 = vmatpush1.bf16.msra.mxu0 %v14293_v28  ;;  %3852 = vmatpush1.bf16.msra.mxu1 %v14296_v29 }
 0x210   : > { %3771 = vmatprep.subr.bf16.mxu0 %v14301_v30  ;;  %3853 = vmatprep.subr.bf16.mxu1 %v14304_v31 }
 0x213   : > { %3772 = vmatpush1.bf16.msra.mxu0 %v14299_v32  ;;  %3854 = vmatpush1.bf16.msra.mxu1 %v14302_v33 }
 0x214   : > { %3773 = vmatprep.subr.bf16.mxu0 %v14307_v34  ;;  %3855 = vmatprep.subr.bf16.mxu1 %v14310_v35 }
 0x217   : > { %3774 = vmatpush1.bf16.msra.mxu0 %v14305_v36  ;;  %3856 = vmatpush1.bf16.msra.mxu1 %v14308_v37 }
 0x218   : > { %3775 = vmatprep.subr.bf16.mxu0 %v14313_v38  ;;  %3857 = vmatprep.subr.bf16.mxu1 %v14316_v39 }
 0x21b   : > { %3776 = vmatpush1.bf16.msra.mxu0 %v14311_v40  ;;  %3858 = vmatpush1.bf16.msra.mxu1 %v14314_v41  ;;  %v14371_v40 = vld [vmem:[%s20336_s3 + $0x600] ss:$16 sps:$4 sm:$0xff]   ;;  %v14374_v41 = vld [vmem:[%s20336_s3 + $0x608] ss:$16 sps:$4 sm:$0xff]  }
 0x21c   : > { %3777 = vmatprep.subr.bf16.mxu0 %v14319_v42  ;;  %3859 = vmatprep.subr.bf16.mxu1 %v14322_v43  ;;  %v14379_v43 = vld [vmem:[%s20336_s3 + $0x624] ss:$16 sps:$4 sm:$0xff]  }
 0x21f   : > { %3778 = vmatpush1.bf16.msra.mxu0 %v14317_v44  ;;  %3860 = vmatpush1.bf16.msra.mxu1 %v14320_v51  ;;  %v14382_v44 = vld [vmem:[%s20336_s3 + $0x62c] ss:$16 sps:$4 sm:$0xff]  }
 0x220   : > { %3779 = vmatprep.subr.bf16.mxu0 %v14325_v52  ;;  %3861 = vmatprep.subr.bf16.mxu1 %v14328_v53  ;;  %v14377_v52 = vld [vmem:[%s20336_s3 + $0x620] ss:$16 sps:$4 sm:$0xff]   ;;  %v14380_v53 = vld [vmem:[%s20336_s3 + $0x628] ss:$16 sps:$4 sm:$0xff]  }
 0x223   : > { %3780 = vmatpush1.bf16.msra.mxu0 %v14323_v54  ;;  %3862 = vmatpush1.bf16.msra.mxu1 %v14326_v56  ;;  %v14385_v54 = vld [vmem:[%s20336_s3 + $0x644] ss:$16 sps:$4 sm:$0xff]   ;;  %v14388_v56 = vld [vmem:[%s20336_s3 + $0x64c] ss:$16 sps:$4 sm:$0xff]  }
 0x224   : > { %3781 = vmatprep.subr.bf16.mxu0 %v14331_v57  ;;  %3863 = vmatprep.subr.bf16.mxu1 %v14334_v58  ;;  %v14383_v57 = vld [vmem:[%s20336_s3 + $0x640] ss:$16 sps:$4 sm:$0xff]   ;;  %v14386_v58 = vld [vmem:[%s20336_s3 + $0x648] ss:$16 sps:$4 sm:$0xff]  }
 0x227   : > { %3782 = vmatpush1.bf16.msra.mxu0 %v14329_v59  ;;  %3864 = vmatpush1.bf16.msra.mxu1 %v14332_v60  ;;  %v14391_v59 = vld [vmem:[%s20336_s3 + $0x664] ss:$16 sps:$4 sm:$0xff]   ;;  %v14394_v60 = vld [vmem:[%s20336_s3 + $0x66c] ss:$16 sps:$4 sm:$0xff]  }
 0x228   : > { %3783 = vmatprep.subr.bf16.mxu0 %v14337_v61  ;;  %3865 = vmatprep.subr.bf16.mxu1 %v14340_v62  ;;  %v14389_v61 = vld [vmem:[%s20336_s3 + $0x660] ss:$16 sps:$4 sm:$0xff]   ;;  %v14392_v62 = vld [vmem:[%s20336_s3 + $0x668] ss:$16 sps:$4 sm:$0xff]  }
 0x22b   : > { %3784 = vmatpush1.bf16.msra.mxu0 %v14335_v63  ;;  %3866 = vmatpush1.bf16.msra.mxu1 %v14338_v0  ;;  %v14397_v63 = vld [vmem:[%s20336_s3 + $0x684] ss:$16 sps:$4 sm:$0xff]   ;;  %v14400_v0 = vld [vmem:[%s20336_s3 + $0x68c] ss:$16 sps:$4 sm:$0xff]  }
 0x22c   : > { %3785 = vmatprep.subr.bf16.mxu0 %v14343_v1  ;;  %3867 = vmatprep.subr.bf16.mxu1 %v14346_v3  ;;  %v14395_v1 = vld [vmem:[%s20336_s3 + $0x680] ss:$16 sps:$4 sm:$0xff]   ;;  %v14398_v3 = vld [vmem:[%s20336_s3 + $0x688] ss:$16 sps:$4 sm:$0xff]  }
 0x22f   : > { %3786 = vmatpush1.bf16.msra.mxu0 %v14341_v4  ;;  %3868 = vmatpush1.bf16.msra.mxu1 %v14344_v5  ;;  %v14403_v4 = vld [vmem:[%s20336_s3 + $0x6a4] ss:$16 sps:$4 sm:$0xff]   ;;  %v14406_v5 = vld [vmem:[%s20336_s3 + $0x6ac] ss:$16 sps:$4 sm:$0xff]  }
 0x230   : > { %3787 = vmatprep.subr.bf16.mxu0 %v14349_v6  ;;  %3869 = vmatprep.subr.bf16.mxu1 %v14352_v46  ;;  %v14401_v6 = vld [vmem:[%s20336_s3 + $0x6a0] ss:$16 sps:$4 sm:$0xff]   ;;  %v14404_v46 = vld [vmem:[%s20336_s3 + $0x6a8] ss:$16 sps:$4 sm:$0xff]  }
 0x233   : > { %3788 = vmatpush1.bf16.msra.mxu0 %v14347_v7  ;;  %3870 = vmatpush1.bf16.msra.mxu1 %v14350_v8  ;;  %v14409_v7 = vld [vmem:[%s20336_s3 + $0x6c4] ss:$16 sps:$4 sm:$0xff]   ;;  %v14412_v8 = vld [vmem:[%s20336_s3 + $0x6cc] ss:$16 sps:$4 sm:$0xff]  }
 0x234   : > { %3789 = vmatprep.subr.bf16.mxu0 %v14355_v9  ;;  %3871 = vmatprep.subr.bf16.mxu1 %v14358_v10  ;;  %v14407_v9 = vld [vmem:[%s20336_s3 + $0x6c0] ss:$16 sps:$4 sm:$0xff]   ;;  %v14410_v10 = vld [vmem:[%s20336_s3 + $0x6c8] ss:$16 sps:$4 sm:$0xff]  }
 0x237   : > { %3790 = vmatpush1.bf16.msra.mxu0 %v14353_v48  ;;  %3872 = vmatpush1.bf16.msra.mxu1 %v14356_v12  ;;  %v14415_v48 = vld [vmem:[%s20336_s3 + $0x6e4] ss:$16 sps:$4 sm:$0xff]   ;;  %v14418_v12 = vld [vmem:[%s20336_s3 + $0x6ec] ss:$16 sps:$4 sm:$0xff]  }
 0x238   : > { %3791 = vmatprep.subr.bf16.mxu0 %v14361_v13  ;;  %3873 = vmatprep.subr.bf16.mxu1 %v14364_v14  ;;  %v14413_v13 = vld [vmem:[%s20336_s3 + $0x6e0] ss:$16 sps:$4 sm:$0xff]   ;;  %v14416_v14 = vld [vmem:[%s20336_s3 + $0x6e8] ss:$16 sps:$4 sm:$0xff]  }
 0x23b   : > { %3792 = vmatpush1.bf16.msra.mxu0 %v14359_v15  ;;  %3874 = vmatpush1.bf16.msra.mxu1 %v14362_v55  ;;  %v14421_v15 = vld [vmem:[%s20336_s3 + $0x704] ss:$16 sps:$4 sm:$0xff]   ;;  %v14424_v55 = vld [vmem:[%s20336_s3 + $0x70c] ss:$16 sps:$4 sm:$0xff]  }
 0x23c   : > { %3793 = vmatprep.subr.bf16.mxu0 %v14367_v16  ;;  %3875 = vmatprep.subr.bf16.mxu1 %v14370_v11  ;;  %v14419_v16 = vld [vmem:[%s20336_s3 + $0x700] ss:$16 sps:$4 sm:$0xff]   ;;  %v14422_v11 = vld [vmem:[%s20336_s3 + $0x708] ss:$16 sps:$4 sm:$0xff]  }
 0x23f   : > { %3794 = vmatpush1.bf16.msra.mxu0 %v14365_v17  ;;  %3876 = vmatpush1.bf16.msra.mxu1 %v14368_v18  ;;  %v14427_v17 = vld [vmem:[%s20336_s3 + $0x724] ss:$16 sps:$4 sm:$0xff]   ;;  %v14430_v18 = vld [vmem:[%s20336_s3 + $0x72c] ss:$16 sps:$4 sm:$0xff]  }
 0x240   : > { %3804 = vmatprep.subr.bf16.mxu0 %v14373_v19  ;;  %3886 = vmatprep.subr.bf16.mxu1 %v14376_v20  ;;  %v14425_v19 = vld [vmem:[%s20336_s3 + $0x720] ss:$16 sps:$4 sm:$0xff]   ;;  %v14428_v20 = vld [vmem:[%s20336_s3 + $0x728] ss:$16 sps:$4 sm:$0xff]  }
 0x2d5   : > { %v2874_v25 = vpop.f32.mrb[4].mxu0  ;;  %v17228_v26 = vpop.f32.mrb[4].mxu1 }
 0x2d6   : > { %v13598_v27 = vadd.f32 %v2874_v25, %v2142_v22  ;;  %v2876_v28 = vpop.f32.mrb[5].mxu0  ;;  %v2958_v29 = vpop.f32.mrb[5].mxu1  ;;  %v14433_v22 = vld [vmem:[%s20336_s3 + $0x744] ss:$16 sps:$4 sm:$0xff]   ;;  %v14434_v25 = vld [vmem:[%s20336_s3 + $0x748] ss:$16 sps:$4 sm:$0xff]  }
 0x2d7   : > { %v13599_v30 = vadd.f32 %v2876_v28, %v2146_v23  ;;  %v13601_v31 = vadd.f32 %v2958_v29, %v2154_v24  ;;  %v2878_v32 = vpop.f32.mrb[6].mxu0  ;;  %v2960_v33 = vpop.f32.mrb[6].mxu1  ;;  %v14436_v23 = vld [vmem:[%s20336_s3 + $0x74c] ss:$16 sps:$4 sm:$0xff]   ;;  %v14431_v24 = vld [vmem:[%s20336_s3 + $0x740] ss:$16 sps:$4 sm:$0xff]  }
 0x2d8   : > { %v2963_v34 = vmax.f32 %v13598_v27, 0.0  ;;  %v2879_v35 = vpop.f32.mrb[7].mxu0  ;;  %v2961_v36 = vpop.f32.mrb[7].mxu1  ;;  %v14439_v27 = vld [vmem:[%s20336_s3 + $0x764] ss:$16 sps:$4 sm:$0xff]  }
 0x2d9   : > { %v2964_v37 = vmax.f32 %v13599_v30, 0.0  ;;  %v2966_v38 = vmax.f32 %v13601_v31, 0.0  ;;  %v14442_v28 = vld [vmem:[%s20336_s3 + $0x76c] ss:$16 sps:$4 sm:$0xff]   ;;  %v14437_v29 = vld [vmem:[%s20336_s3 + $0x760] ss:$16 sps:$4 sm:$0xff]  }
 0x2da   : > { %v2967_v42 = vpack.c.bf16 %v2963_v34, %v2963_v34  ;;  %v14440_v30 = vld [vmem:[%s20336_s3 + $0x768] ss:$16 sps:$4 sm:$0xff]   ;;  %v14445_v31 = vld [vmem:[%s20336_s3 + $0x784] ss:$16 sps:$4 sm:$0xff]   ;;  %v14448_v32 = vld [vmem:[%s20336_s3 + $0x78c] ss:$16 sps:$4 sm:$0xff]  }
 0x2db   : > { %v2968_v39 = vpack.c.bf16 %v2964_v37, %v2964_v37  ;;  %v2970_v51 = vpack.c.bf16 %v2966_v38, %v2966_v38  ;;  %v14443_v33 = vld [vmem:[%s20336_s3 + $0x780] ss:$16 sps:$4 sm:$0xff]   ;;  %v14446_v34 = vld [vmem:[%s20336_s3 + $0x788] ss:$16 sps:$4 sm:$0xff]   ;;  %v14451_v35 = vld [vmem:[%s20336_s3 + $0x7a4] ss:$16 sps:$4 sm:$0xff]  }
 0x2dc   : > { %v14454_v36 = vld [vmem:[%s20336_s3 + $0x7ac] ss:$16 sps:$4 sm:$0xff]   ;;  %v14449_v37 = vld [vmem:[%s20336_s3 + $0x7a0] ss:$16 sps:$4 sm:$0xff]   ;;  %v14452_v38 = vld [vmem:[%s20336_s3 + $0x7a8] ss:$16 sps:$4 sm:$0xff]  }
 0x2dd   : > { %3795 = vmatprep.mubr.bf16.mxu0 %v2968_v39  ;;  %3877 = vmatprep.mubr.bf16.mxu1 %v2968_v39  ;;  %v2150_v39 = vrot.slane %v17220_v21, %v16984_v2  ;;  %v14458_v21 = vld [vmem:[%s20336_s3 + $0x7c8] ss:$16 sps:$4 sm:$0xff]  }
 0x2de   : > { %3796 = vmatmul.mubr.bf16.vlgmr.msra.gmra.mrb[8].mxu0 %v2967_v42  ;;  %3878 = vmatmul.mubr.bf16.vlgmr.msra.gmra.mrb[8].mxu1 %v2967_v42  ;;  %v14455_v42 = vld [vmem:[%s20336_s3 + $0x7c0] ss:$16 sps:$4 sm:$0xff]  }
 0x2df   : > { %3805 = vmatpush1.bf16.msra.mxu0 %v14371_v40  ;;  %3887 = vmatpush1.bf16.msra.mxu1 %v14374_v41  ;;  %v14457_v40 = vld [vmem:[%s20336_s3 + $0x7c4] ss:$16 sps:$4 sm:$0xff]   ;;  %v14460_v41 = vld [vmem:[%s20336_s3 + $0x7cc] ss:$16 sps:$4 sm:$0xff]  }
 0x2e0   : > { %3836 = vmatprep.mubr.bf16.mxu0 %v2970_v51  ;;  %3918 = vmatprep.mubr.bf16.mxu1 %v2970_v51  ;;  %v14466_v51 = vld [vmem:[%s20336_s3 + $0x7ec] ss:$16 sps:$4 sm:$0xff]  }
 0x2e1   : > { %3806 = vmatprep.subr.bf16.mxu0 %v14379_v43  ;;  %3888 = vmatprep.subr.bf16.mxu1 %v14382_v44  ;;  %v13600_v43 = vadd.f32 %v17228_v26, %v2150_v39  ;;  %v14463_v44 = vld [vmem:[%s20336_s3 + $0x7e4] ss:$16 sps:$4 sm:$0xff]   ;;  %v14464_v26 = vld [vmem:[%s20336_s3 + $0x7e8] ss:$16 sps:$4 sm:$0xff]  }
 0x2e2   : > { %v14536_v39 = vld [vmem:[%s20336_s3 + $0x968] ss:$16 sps:$4 sm:$0xff]  }
 0x2e3   : > { %3807 = vmatpush1.bf16.msra.mxu0 %v14377_v52  ;;  %3889 = vmatpush1.bf16.msra.mxu1 %v14380_v53  ;;  %v14461_v52 = vld [vmem:[%s20336_s3 + $0x7e0] ss:$16 sps:$4 sm:$0xff]   ;;  %v2965_v53 = vmax.f32 %v13600_v43, 0.0  ;;  %v14547_v43 = vld [vmem:[%s20336_s3 + $0x9a4] ss:$16 sps:$4 sm:$0xff]  }
 0x2e4   : > { %3808 = vmatprep.subr.bf16.mxu0 %v14385_v54  ;;  %3890 = vmatprep.subr.bf16.mxu1 %v14388_v56  ;;  %v14469_v54 = vld [vmem:[%s20336_s3 + $0x804] ss:$16 sps:$4 sm:$0xff]   ;;  %v14472_v56 = vld [vmem:[%s20336_s3 + $0x80c] ss:$16 sps:$4 sm:$0xff]  }
 0x2e7   : > { %3809 = vmatpush1.bf16.msra.mxu0 %v14383_v57  ;;  %3891 = vmatpush1.bf16.msra.mxu1 %v14386_v58  ;;  %v14467_v57 = vld [vmem:[%s20336_s3 + $0x800] ss:$16 sps:$4 sm:$0xff]   ;;  %v14470_v58 = vld [vmem:[%s20336_s3 + $0x808] ss:$16 sps:$4 sm:$0xff]  }
 0x2e8   : > { %3810 = vmatprep.subr.bf16.mxu0 %v14391_v59  ;;  %3892 = vmatprep.subr.bf16.mxu1 %v14394_v60  ;;  %v2969_v59 = vpack.c.bf16 %v2965_v53, %v2965_v53  ;;  %v14475_v60 = vld [vmem:[%s20336_s3 + $0x824] ss:$16 sps:$4 sm:$0xff]   ;;  %v14556_v53 = vld [vmem:[%s20336_s3 + $0x9cc] ss:$16 sps:$4 sm:$0xff]  }
 0x2eb   : > { %3811 = vmatpush1.bf16.msra.mxu0 %v14389_v61  ;;  %3893 = vmatpush1.bf16.msra.mxu1 %v14392_v62  ;;  %v14478_v61 = vld [vmem:[%s20336_s3 + $0x82c] ss:$16 sps:$4 sm:$0xff]   ;;  %v14473_v62 = vld [vmem:[%s20336_s3 + $0x820] ss:$16 sps:$4 sm:$0xff]  }
 0x2ec   : > { %3812 = vmatprep.subr.bf16.mxu0 %v14397_v63  ;;  %3894 = vmatprep.subr.bf16.mxu1 %v14400_v0  ;;  %v14476_v63 = vld [vmem:[%s20336_s3 + $0x828] ss:$16 sps:$4 sm:$0xff]   ;;  %v14481_v0 = vld [vmem:[%s20336_s3 + $0x844] ss:$16 sps:$4 sm:$0xff]  }
 0x2ef   : > { %3813 = vmatpush1.bf16.msra.mxu0 %v14395_v1  ;;  %3895 = vmatpush1.bf16.msra.mxu1 %v14398_v3  ;;  %v14484_v1 = vld [vmem:[%s20336_s3 + $0x84c] ss:$16 sps:$4 sm:$0xff]   ;;  %v14479_v3 = vld [vmem:[%s20336_s3 + $0x840] ss:$16 sps:$4 sm:$0xff]  }
 0x2f0   : > { %3814 = vmatprep.subr.bf16.mxu0 %v14403_v4  ;;  %3896 = vmatprep.subr.bf16.mxu1 %v14406_v5  ;;  %v14482_v4 = vld [vmem:[%s20336_s3 + $0x848] ss:$16 sps:$4 sm:$0xff]   ;;  %v14487_v5 = vld [vmem:[%s20336_s3 + $0x864] ss:$16 sps:$4 sm:$0xff]  }
 0x2f3   : > { %3815 = vmatpush1.bf16.msra.mxu0 %v14401_v6  ;;  %3897 = vmatpush1.bf16.msra.mxu1 %v14404_v46  ;;  %v14490_v6 = vld [vmem:[%s20336_s3 + $0x86c] ss:$16 sps:$4 sm:$0xff]   ;;  %v14485_v46 = vld [vmem:[%s20336_s3 + $0x860] ss:$16 sps:$4 sm:$0xff]  }
 0x2f4   : > { %3816 = vmatprep.subr.bf16.mxu0 %v14409_v7  ;;  %3898 = vmatprep.subr.bf16.mxu1 %v14412_v8  ;;  %v14488_v7 = vld [vmem:[%s20336_s3 + $0x868] ss:$16 sps:$4 sm:$0xff]   ;;  %v14493_v8 = vld [vmem:[%s20336_s3 + $0x884] ss:$16 sps:$4 sm:$0xff]  }
 0x2f7   : > { %3817 = vmatpush1.bf16.msra.mxu0 %v14407_v9  ;;  %3899 = vmatpush1.bf16.msra.mxu1 %v14410_v10  ;;  %v14496_v9 = vld [vmem:[%s20336_s3 + $0x88c] ss:$16 sps:$4 sm:$0xff]   ;;  %v14491_v10 = vld [vmem:[%s20336_s3 + $0x880] ss:$16 sps:$4 sm:$0xff]  }
 0x2f8   : > { %3818 = vmatprep.subr.bf16.mxu0 %v14415_v48  ;;  %3900 = vmatprep.subr.bf16.mxu1 %v14418_v12  ;;  %v14494_v48 = vld [vmem:[%s20336_s3 + $0x888] ss:$16 sps:$4 sm:$0xff]   ;;  %v14499_v12 = vld [vmem:[%s20336_s3 + $0x8a4] ss:$16 sps:$4 sm:$0xff]  }
 0x2fb   : > { %3819 = vmatpush1.bf16.msra.mxu0 %v14413_v13  ;;  %3901 = vmatpush1.bf16.msra.mxu1 %v14416_v14  ;;  %v14502_v13 = vld [vmem:[%s20336_s3 + $0x8ac] ss:$16 sps:$4 sm:$0xff]   ;;  %v14497_v14 = vld [vmem:[%s20336_s3 + $0x8a0] ss:$16 sps:$4 sm:$0xff]  }
 0x2fc   : > { %3820 = vmatprep.subr.bf16.mxu0 %v14421_v15  ;;  %3902 = vmatprep.subr.bf16.mxu1 %v14424_v55  ;;  %v14500_v15 = vld [vmem:[%s20336_s3 + $0x8a8] ss:$16 sps:$4 sm:$0xff]   ;;  %v14505_v55 = vld [vmem:[%s20336_s3 + $0x8c4] ss:$16 sps:$4 sm:$0xff]  }
 0x2ff   : > { %3821 = vmatpush1.bf16.msra.mxu0 %v14419_v16  ;;  %3903 = vmatpush1.bf16.msra.mxu1 %v14422_v11  ;;  %v14508_v16 = vld [vmem:[%s20336_s3 + $0x8cc] ss:$16 sps:$4 sm:$0xff]   ;;  %v14503_v11 = vld [vmem:[%s20336_s3 + $0x8c0] ss:$16 sps:$4 sm:$0xff]  }
 0x300   : > { %3822 = vmatprep.subr.bf16.mxu0 %v14427_v17  ;;  %3904 = vmatprep.subr.bf16.mxu1 %v14430_v18  ;;  %v14506_v17 = vld [vmem:[%s20336_s3 + $0x8c8] ss:$16 sps:$4 sm:$0xff]   ;;  %v14511_v18 = vld [vmem:[%s20336_s3 + $0x8e4] ss:$16 sps:$4 sm:$0xff]  }
 0x303   : > { %3823 = vmatpush1.bf16.msra.mxu0 %v14425_v19  ;;  %3905 = vmatpush1.bf16.msra.mxu1 %v14428_v20  ;;  %v14514_v19 = vld [vmem:[%s20336_s3 + $0x8ec] ss:$16 sps:$4 sm:$0xff]   ;;  %v14509_v20 = vld [vmem:[%s20336_s3 + $0x8e0] ss:$16 sps:$4 sm:$0xff]  }
 0x304   : > { %3824 = vmatprep.subr.bf16.mxu0 %v14433_v22  ;;  %3906 = vmatprep.subr.bf16.mxu1 %v14436_v23  ;;  %v14512_v22 = vld [vmem:[%s20336_s3 + $0x8e8] ss:$16 sps:$4 sm:$0xff]   ;;  %v14517_v23 = vld [vmem:[%s20336_s3 + $0x904] ss:$16 sps:$4 sm:$0xff]  }
 0x307   : > { %3825 = vmatpush1.bf16.msra.mxu0 %v14431_v24  ;;  %3907 = vmatpush1.bf16.msra.mxu1 %v14434_v25  ;;  %v14520_v24 = vld [vmem:[%s20336_s3 + $0x90c] ss:$16 sps:$4 sm:$0xff]   ;;  %v14515_v25 = vld [vmem:[%s20336_s3 + $0x900] ss:$16 sps:$4 sm:$0xff]  }
 0x308   : > { %3826 = vmatprep.subr.bf16.mxu0 %v14439_v27  ;;  %3908 = vmatprep.subr.bf16.mxu1 %v14442_v28  ;;  %v14518_v27 = vld [vmem:[%s20336_s3 + $0x908] ss:$16 sps:$4 sm:$0xff]   ;;  %v14523_v28 = vld [vmem:[%s20336_s3 + $0x924] ss:$16 sps:$4 sm:$0xff]  }
 0x30b   : > { %3827 = vmatpush1.bf16.msra.mxu0 %v14437_v29  ;;  %3909 = vmatpush1.bf16.msra.mxu1 %v14440_v30  ;;  %v14526_v29 = vld [vmem:[%s20336_s3 + $0x92c] ss:$16 sps:$4 sm:$0xff]   ;;  %v14521_v30 = vld [vmem:[%s20336_s3 + $0x920] ss:$16 sps:$4 sm:$0xff]  }
 0x30c   : > { %3828 = vmatprep.subr.bf16.mxu0 %v14445_v31  ;;  %3910 = vmatprep.subr.bf16.mxu1 %v14448_v32  ;;  %v14524_v31 = vld [vmem:[%s20336_s3 + $0x928] ss:$16 sps:$4 sm:$0xff]   ;;  %v14529_v32 = vld [vmem:[%s20336_s3 + $0x944] ss:$16 sps:$4 sm:$0xff]  }
 0x30f   : > { %3829 = vmatpush1.bf16.msra.mxu0 %v14443_v33  ;;  %3911 = vmatpush1.bf16.msra.mxu1 %v14446_v34  ;;  %v14532_v33 = vld [vmem:[%s20336_s3 + $0x94c] ss:$16 sps:$4 sm:$0xff]   ;;  %v14527_v34 = vld [vmem:[%s20336_s3 + $0x940] ss:$16 sps:$4 sm:$0xff]  }
 0x310   : > { %3830 = vmatprep.subr.bf16.mxu0 %v14451_v35  ;;  %3912 = vmatprep.subr.bf16.mxu1 %v14454_v36  ;;  %v14530_v35 = vld [vmem:[%s20336_s3 + $0x948] ss:$16 sps:$4 sm:$0xff]   ;;  %v14535_v36 = vld [vmem:[%s20336_s3 + $0x964] ss:$16 sps:$4 sm:$0xff]  }
 0x313   : > { %3831 = vmatpush1.bf16.msra.mxu0 %v14449_v37  ;;  %3913 = vmatpush1.bf16.msra.mxu1 %v14452_v38  ;;  %v14538_v37 = vld [vmem:[%s20336_s3 + $0x96c] ss:$16 sps:$4 sm:$0xff]   ;;  %v14533_v38 = vld [vmem:[%s20336_s3 + $0x960] ss:$16 sps:$4 sm:$0xff]  }
 0x314   : > { %3832 = vmatprep.subr.bf16.mxu0 %v14457_v40  ;;  %3914 = vmatprep.subr.bf16.mxu1 %v14460_v41  ;;  %v14541_v40 = vld [vmem:[%s20336_s3 + $0x984] ss:$16 sps:$4 sm:$0xff]   ;;  %v14544_v41 = vld [vmem:[%s20336_s3 + $0x98c] ss:$16 sps:$4 sm:$0xff]  }
 0x317   : > { %3833 = vmatpush1.bf16.msra.mxu0 %v14455_v42  ;;  %3915 = vmatpush1.bf16.msra.mxu1 %v14458_v21  ;;  %v14539_v42 = vld [vmem:[%s20336_s3 + $0x980] ss:$16 sps:$4 sm:$0xff]   ;;  %v14542_v21 = vld [vmem:[%s20336_s3 + $0x988] ss:$16 sps:$4 sm:$0xff]  }
 0x318   : > { %3834 = vmatprep.subr.bf16.mxu0 %v14463_v44  ;;  %3916 = vmatprep.subr.bf16.mxu1 %v14466_v51  ;;  %v14550_v44 = vld [vmem:[%s20336_s3 + $0x9ac] ss:$16 sps:$4 sm:$0xff]   ;;  %v14545_v51 = vld [vmem:[%s20336_s3 + $0x9a0] ss:$16 sps:$4 sm:$0xff]  }
 0x31b   : > { %3835 = vmatpush1.bf16.msra.mxu0 %v14461_v52  ;;  %3917 = vmatpush1.bf16.msra.mxu1 %v14464_v26  ;;  %v14548_v52 = vld [vmem:[%s20336_s3 + $0x9a8] ss:$16 sps:$4 sm:$0xff]   ;;  %v14553_v26 = vld [vmem:[%s20336_s3 + $0x9c4] ss:$16 sps:$4 sm:$0xff]  }
 0x31c   : > { %4727 = vmatprep.subr.bf16.mxu0 %v14469_v54  ;;  %4809 = vmatprep.subr.bf16.mxu1 %v14472_v56  ;;  %v14551_v54 = vld [vmem:[%s20336_s3 + $0x9c0] ss:$16 sps:$4 sm:$0xff]   ;;  %v14554_v56 = vld [vmem:[%s20336_s3 + $0x9c8] ss:$16 sps:$4 sm:$0xff]  }
 0x31e   : > { %3837 = vmatmul.mubr.bf16.vlgmr.msra.gmra.mrb[8].mxu0 %v2969_v59  ;;  %3919 = vmatmul.mubr.bf16.vlgmr.msra.gmra.mrb[8].mxu1 %v2969_v59  ;;  %v14557_v59 = vld [vmem:[%s20336_s3 + $0x9e0] ss:$16 sps:$4 sm:$0xff]  }
 0x31f   : > { %4728 = vmatpush1.bf16.msra.mxu0 %v14467_v57  ;;  %4810 = vmatpush1.bf16.msra.mxu1 %v14470_v58  ;;  %v14559_v57 = vld [vmem:[%s20336_s3 + $0x9e4] ss:$16 sps:$4 sm:$0xff]   ;;  %v14562_v58 = vld [vmem:[%s20336_s3 + $0x9ec] ss:$16 sps:$4 sm:$0xff]  }
 0x320   : > { %4729 = vmatprep.subr.bf16.mxu0 %v14475_v60  ;;  %4811 = vmatprep.subr.bf16.mxu1 %v14478_v61  ;;  %v14560_v60 = vld [vmem:[%s20336_s3 + $0x9e8] ss:$16 sps:$4 sm:$0xff]   ;;  %v14565_v61 = vld [vmem:[%s20336_s3 + $0xa04] ss:$16 sps:$4 sm:$0xff]  }
 0x323   : > { %4730 = vmatpush1.bf16.msra.mxu0 %v14473_v62  ;;  %4812 = vmatpush1.bf16.msra.mxu1 %v14476_v63  ;;  %v14568_v62 = vld [vmem:[%s20336_s3 + $0xa0c] ss:$16 sps:$4 sm:$0xff]   ;;  %v17620_v63 = vld [vmem:[%s20337_s4 + $0x4] sm:$0xf] }
 0x324   : > { %4731 = vmatprep.subr.bf16.mxu0 %v14481_v0  ;;  %4813 = vmatprep.subr.bf16.mxu1 %v14484_v1  ;;  %v3106_v0 = vrot.slane %v17620_v63, %v16806_v47  ;;  %v3110_v1 = vrot.slane %v17620_v63, %v16814_v49 }
 0x327   : > { %4732 = vmatpush1.bf16.msra.mxu0 %v14479_v3  ;;  %4814 = vmatpush1.bf16.msra.mxu1 %v14482_v4  ;;  %v3118_v3 = vrot.slane %v17620_v63, %v16817_v50 }
 0x328   : > { %4733 = vmatprep.subr.bf16.mxu0 %v14487_v5  ;;  %4815 = vmatprep.subr.bf16.mxu1 %v14490_v6 }
 0x32b   : > { %4734 = vmatpush1.bf16.msra.mxu0 %v14485_v46  ;;  %4816 = vmatpush1.bf16.msra.mxu1 %v14488_v7 }
 0x32c   : > { %4735 = vmatprep.subr.bf16.mxu0 %v14493_v8  ;;  %4817 = vmatprep.subr.bf16.mxu1 %v14496_v9 }
 0x32f   : > { %4736 = vmatpush1.bf16.msra.mxu0 %v14491_v10  ;;  %4818 = vmatpush1.bf16.msra.mxu1 %v14494_v48 }
 0x330   : > { %4737 = vmatprep.subr.bf16.mxu0 %v14499_v12  ;;  %4819 = vmatprep.subr.bf16.mxu1 %v14502_v13 }
 0x333   : > { %4738 = vmatpush1.bf16.msra.mxu0 %v14497_v14  ;;  %4820 = vmatpush1.bf16.msra.mxu1 %v14500_v15 }
 0x334   : > { %4739 = vmatprep.subr.bf16.mxu0 %v14505_v55  ;;  %4821 = vmatprep.subr.bf16.mxu1 %v14508_v16 }
 0x337   : > { %4740 = vmatpush1.bf16.msra.mxu0 %v14503_v11  ;;  %4822 = vmatpush1.bf16.msra.mxu1 %v14506_v17  ;;  %v14563_v11 = vld [vmem:[%s20336_s3 + $0xa00] ss:$16 sps:$4 sm:$0xff]   ;;  %v14566_v17 = vld [vmem:[%s20336_s3 + $0xa08] ss:$16 sps:$4 sm:$0xff]  }
 0x338   : > { %4741 = vmatprep.subr.bf16.mxu0 %v14511_v18  ;;  %4823 = vmatprep.subr.bf16.mxu1 %v14514_v19  ;;  %v14571_v19 = vld [vmem:[%s20336_s3 + $0xa24] ss:$16 sps:$4 sm:$0xff]  }
 0x33b   : > { %4742 = vmatpush1.bf16.msra.mxu0 %v14509_v20  ;;  %4824 = vmatpush1.bf16.msra.mxu1 %v14512_v22  ;;  %v14574_v20 = vld [vmem:[%s20336_s3 + $0xa2c] ss:$16 sps:$4 sm:$0xff]  }
 0x33c   : > { %4743 = vmatprep.subr.bf16.mxu0 %v14517_v23  ;;  %4825 = vmatprep.subr.bf16.mxu1 %v14520_v24  ;;  %v14569_v23 = vld [vmem:[%s20336_s3 + $0xa20] ss:$16 sps:$4 sm:$0xff]   ;;  %v14572_v24 = vld [vmem:[%s20336_s3 + $0xa28] ss:$16 sps:$4 sm:$0xff]  }
 0x33f   : > { %4744 = vmatpush1.bf16.msra.mxu0 %v14515_v25  ;;  %4826 = vmatpush1.bf16.msra.mxu1 %v14518_v27  ;;  %v14577_v25 = vld [vmem:[%s20336_s3 + $0xa44] ss:$16 sps:$4 sm:$0xff]   ;;  %v14580_v27 = vld [vmem:[%s20336_s3 + $0xa4c] ss:$16 sps:$4 sm:$0xff]  }
 0x340   : > { %4745 = vmatprep.subr.bf16.mxu0 %v14523_v28  ;;  %4827 = vmatprep.subr.bf16.mxu1 %v14526_v29  ;;  %v14575_v28 = vld [vmem:[%s20336_s3 + $0xa40] ss:$16 sps:$4 sm:$0xff]   ;;  %v14578_v29 = vld [vmem:[%s20336_s3 + $0xa48] ss:$16 sps:$4 sm:$0xff]  }
 0x343   : > { %4746 = vmatpush1.bf16.msra.mxu0 %v14521_v30  ;;  %4828 = vmatpush1.bf16.msra.mxu1 %v14524_v31  ;;  %v14583_v30 = vld [vmem:[%s20336_s3 + $0xa64] ss:$16 sps:$4 sm:$0xff]   ;;  %v14586_v31 = vld [vmem:[%s20336_s3 + $0xa6c] ss:$16 sps:$4 sm:$0xff]  }
 0x344   : > { %4747 = vmatprep.subr.bf16.mxu0 %v14529_v32  ;;  %4829 = vmatprep.subr.bf16.mxu1 %v14532_v33  ;;  %v14581_v32 = vld [vmem:[%s20336_s3 + $0xa60] ss:$16 sps:$4 sm:$0xff]   ;;  %v14584_v33 = vld [vmem:[%s20336_s3 + $0xa68] ss:$16 sps:$4 sm:$0xff]  }
 0x347   : > { %4748 = vmatpush1.bf16.msra.mxu0 %v14527_v34  ;;  %4830 = vmatpush1.bf16.msra.mxu1 %v14530_v35  ;;  %v14589_v34 = vld [vmem:[%s20336_s3 + $0xa84] ss:$16 sps:$4 sm:$0xff]   ;;  %v14592_v35 = vld [vmem:[%s20336_s3 + $0xa8c] ss:$16 sps:$4 sm:$0xff]  }
 0x348   : > { %4749 = vmatprep.subr.bf16.mxu0 %v14535_v36  ;;  %4831 = vmatprep.subr.bf16.mxu1 %v14538_v37  ;;  %v14587_v36 = vld [vmem:[%s20336_s3 + $0xa80] ss:$16 sps:$4 sm:$0xff]   ;;  %v14590_v37 = vld [vmem:[%s20336_s3 + $0xa88] ss:$16 sps:$4 sm:$0xff]  }
 0x34b   : > { %4750 = vmatpush1.bf16.msra.mxu0 %v14533_v38  ;;  %4832 = vmatpush1.bf16.msra.mxu1 %v14536_v39  ;;  %v14595_v38 = vld [vmem:[%s20336_s3 + $0xaa4] ss:$16 sps:$4 sm:$0xff]   ;;  %v14598_v39 = vld [vmem:[%s20336_s3 + $0xaac] ss:$16 sps:$4 sm:$0xff]  }
 0x34c   : > { %4751 = vmatprep.subr.bf16.mxu0 %v14541_v40  ;;  %4833 = vmatprep.subr.bf16.mxu1 %v14544_v41  ;;  %v14593_v40 = vld [vmem:[%s20336_s3 + $0xaa0] ss:$16 sps:$4 sm:$0xff]   ;;  %v14596_v41 = vld [vmem:[%s20336_s3 + $0xaa8] ss:$16 sps:$4 sm:$0xff]  }
 0x34f   : > { %4752 = vmatpush1.bf16.msra.mxu0 %v14539_v42  ;;  %4834 = vmatpush1.bf16.msra.mxu1 %v14542_v21  ;;  %v14601_v42 = vld [vmem:[%s20336_s3 + $0xac4] ss:$16 sps:$4 sm:$0xff]   ;;  %v14604_v21 = vld [vmem:[%s20336_s3 + $0xacc] ss:$16 sps:$4 sm:$0xff]  }
 0x350   : > { %4753 = vmatprep.subr.bf16.mxu0 %v14547_v43  ;;  %4835 = vmatprep.subr.bf16.mxu1 %v14550_v44  ;;  %v14599_v43 = vld [vmem:[%s20336_s3 + $0xac0] ss:$16 sps:$4 sm:$0xff]   ;;  %v14602_v44 = vld [vmem:[%s20336_s3 + $0xac8] ss:$16 sps:$4 sm:$0xff]  }
 0x353   : > { %4754 = vmatpush1.bf16.msra.mxu0 %v14545_v51  ;;  %4836 = vmatpush1.bf16.msra.mxu1 %v14548_v52  ;;  %v14607_v51 = vld [vmem:[%s20336_s3 + $0xae4] ss:$16 sps:$4 sm:$0xff]   ;;  %v14610_v52 = vld [vmem:[%s20336_s3 + $0xaec] ss:$16 sps:$4 sm:$0xff]  }
 0x354   : > { %4755 = vmatprep.subr.bf16.mxu0 %v14553_v26  ;;  %4837 = vmatprep.subr.bf16.mxu1 %v14556_v53  ;;  %v14605_v26 = vld [vmem:[%s20336_s3 + $0xae0] ss:$16 sps:$4 sm:$0xff]   ;;  %v14608_v53 = vld [vmem:[%s20336_s3 + $0xae8] ss:$16 sps:$4 sm:$0xff]  }
 0x357   : > { %4756 = vmatpush1.bf16.msra.mxu0 %v14551_v54  ;;  %4838 = vmatpush1.bf16.msra.mxu1 %v14554_v56  ;;  %v14613_v54 = vld [vmem:[%s20336_s3 + $0xb04] ss:$16 sps:$4 sm:$0xff]   ;;  %v14616_v56 = vld [vmem:[%s20336_s3 + $0xb0c] ss:$16 sps:$4 sm:$0xff]  }
 0x358   : > { %4757 = vmatprep.subr.bf16.mxu0 %v14559_v57  ;;  %4839 = vmatprep.subr.bf16.mxu1 %v14562_v58  ;;  %v14611_v57 = vld [vmem:[%s20336_s3 + $0xb00] ss:$16 sps:$4 sm:$0xff]   ;;  %v14614_v58 = vld [vmem:[%s20336_s3 + $0xb08] ss:$16 sps:$4 sm:$0xff]  }
 0x35b   : > { %4758 = vmatpush1.bf16.msra.mxu0 %v14557_v59  ;;  %4840 = vmatpush1.bf16.msra.mxu1 %v14560_v60  ;;  %v14619_v59 = vld [vmem:[%s20336_s3 + $0xb24] ss:$16 sps:$4 sm:$0xff]   ;;  %v14622_v60 = vld [vmem:[%s20336_s3 + $0xb2c] ss:$16 sps:$4 sm:$0xff]  }
 0x35c   : > { %4768 = vmatprep.subr.bf16.mxu0 %v14565_v61  ;;  %4850 = vmatprep.subr.bf16.mxu1 %v14568_v62  ;;  %v14617_v61 = vld [vmem:[%s20336_s3 + $0xb20] ss:$16 sps:$4 sm:$0xff]   ;;  %v14620_v62 = vld [vmem:[%s20336_s3 + $0xb28] ss:$16 sps:$4 sm:$0xff]  }
 0x3f1   : > { %v3838_v4 = vpop.f32.mrb[8].mxu0  ;;  %v17628_v5 = vpop.f32.mrb[8].mxu1 }
 0x3f2   : > { %v13602_v6 = vadd.f32 %v3838_v4, %v3106_v0  ;;  %v3840_v46 = vpop.f32.mrb[9].mxu0  ;;  %v3922_v7 = vpop.f32.mrb[9].mxu1  ;;  %v14625_v0 = vld [vmem:[%s20336_s3 + $0xb44] ss:$16 sps:$4 sm:$0xff]   ;;  %v14626_v4 = vld [vmem:[%s20336_s3 + $0xb48] ss:$16 sps:$4 sm:$0xff]  }
 0x3f3   : > { %v13603_v8 = vadd.f32 %v3840_v46, %v3110_v1  ;;  %v13605_v9 = vadd.f32 %v3922_v7, %v3118_v3  ;;  %v3842_v10 = vpop.f32.mrb[10].mxu0  ;;  %v3924_v48 = vpop.f32.mrb[10].mxu1  ;;  %v14628_v1 = vld [vmem:[%s20336_s3 + $0xb4c] ss:$16 sps:$4 sm:$0xff]   ;;  %v14623_v3 = vld [vmem:[%s20336_s3 + $0xb40] ss:$16 sps:$4 sm:$0xff]  }
 0x3f4   : > { %v3927_v12 = vmax.f32 %v13602_v6, 0.0  ;;  %v3843_v13 = vpop.f32.mrb[11].mxu0  ;;  %v3925_v14 = vpop.f32.mrb[11].mxu1  ;;  %v14631_v6 = vld [vmem:[%s20336_s3 + $0xb64] ss:$16 sps:$4 sm:$0xff]  }
 0x3f5   : > { %v3928_v15 = vmax.f32 %v13603_v8, 0.0  ;;  %v3930_v55 = vmax.f32 %v13605_v9, 0.0  ;;  %v14634_v46 = vld [vmem:[%s20336_s3 + $0xb6c] ss:$16 sps:$4 sm:$0xff]   ;;  %v14629_v7 = vld [vmem:[%s20336_s3 + $0xb60] ss:$16 sps:$4 sm:$0xff]  }
 0x3f6   : > { %v3931_v18 = vpack.c.bf16 %v3927_v12, %v3927_v12  ;;  %v14632_v8 = vld [vmem:[%s20336_s3 + $0xb68] ss:$16 sps:$4 sm:$0xff]   ;;  %v14637_v9 = vld [vmem:[%s20336_s3 + $0xb84] ss:$16 sps:$4 sm:$0xff]   ;;  %v14640_v10 = vld [vmem:[%s20336_s3 + $0xb8c] ss:$16 sps:$4 sm:$0xff]  }
 0x3f7   : > { %v3932_v16 = vpack.c.bf16 %v3928_v15, %v3928_v15  ;;  %v3934_v22 = vpack.c.bf16 %v3930_v55, %v3930_v55  ;;  %v14635_v48 = vld [vmem:[%s20336_s3 + $0xb80] ss:$16 sps:$4 sm:$0xff]   ;;  %v14638_v12 = vld [vmem:[%s20336_s3 + $0xb88] ss:$16 sps:$4 sm:$0xff]   ;;  %v14643_v13 = vld [vmem:[%s20336_s3 + $0xba4] ss:$16 sps:$4 sm:$0xff]  }
 0x3f8   : > { %v14646_v14 = vld [vmem:[%s20336_s3 + $0xbac] ss:$16 sps:$4 sm:$0xff]   ;;  %v14641_v15 = vld [vmem:[%s20336_s3 + $0xba0] ss:$16 sps:$4 sm:$0xff]   ;;  %v14644_v55 = vld [vmem:[%s20336_s3 + $0xba8] ss:$16 sps:$4 sm:$0xff]  }
 0x3f9   : > { %4759 = vmatprep.mubr.bf16.mxu0 %v3932_v16  ;;  %4841 = vmatprep.mubr.bf16.mxu1 %v3932_v16  ;;  %v3114_v16 = vrot.slane %v17620_v63, %v16984_v2  ;;  %v14650_v63 = vld [vmem:[%s20336_s3 + $0xbc8] ss:$16 sps:$4 sm:$0xff]  }
 0x3fa   : > { %4760 = vmatmul.mubr.bf16.vlgmr.msra.gmra.mrb[12].mxu0 %v3931_v18  ;;  %4842 = vmatmul.mubr.bf16.vlgmr.msra.gmra.mrb[12].mxu1 %v3931_v18  ;;  %v14647_v18 = vld [vmem:[%s20336_s3 + $0xbc0] ss:$16 sps:$4 sm:$0xff]  }
 0x3fb   : > { %4769 = vmatpush1.bf16.msra.mxu0 %v14563_v11  ;;  %4851 = vmatpush1.bf16.msra.mxu1 %v14566_v17  ;;  %v14649_v11 = vld [vmem:[%s20336_s3 + $0xbc4] ss:$16 sps:$4 sm:$0xff]   ;;  %v14652_v17 = vld [vmem:[%s20336_s3 + $0xbcc] ss:$16 sps:$4 sm:$0xff]  }
 0x3fc   : > { %4800 = vmatprep.mubr.bf16.mxu0 %v3934_v22  ;;  %4882 = vmatprep.mubr.bf16.mxu1 %v3934_v22  ;;  %v14658_v22 = vld [vmem:[%s20336_s3 + $0xbec] ss:$16 sps:$4 sm:$0xff]  }
 0x3fd   : > { %4770 = vmatprep.subr.bf16.mxu0 %v14571_v19  ;;  %4852 = vmatprep.subr.bf16.mxu1 %v14574_v20  ;;  %v13604_v19 = vadd.f32 %v17628_v5, %v3114_v16  ;;  %v14655_v20 = vld [vmem:[%s20336_s3 + $0xbe4] ss:$16 sps:$4 sm:$0xff]   ;;  %v14656_v5 = vld [vmem:[%s20336_s3 + $0xbe8] ss:$16 sps:$4 sm:$0xff]  }
 0x3fe   : > { %v14728_v16 = vld [vmem:[%s20336_s3 + $0xd68] ss:$16 sps:$4 sm:$0xff]  }
 0x3ff   : > { %4771 = vmatpush1.bf16.msra.mxu0 %v14569_v23  ;;  %4853 = vmatpush1.bf16.msra.mxu1 %v14572_v24  ;;  %v14653_v23 = vld [vmem:[%s20336_s3 + $0xbe0] ss:$16 sps:$4 sm:$0xff]   ;;  %v3929_v24 = vmax.f32 %v13604_v19, 0.0  ;;  %v14739_v19 = vld [vmem:[%s20336_s3 + $0xda4] ss:$16 sps:$4 sm:$0xff]  }
 0x400   : > { %4772 = vmatprep.subr.bf16.mxu0 %v14577_v25  ;;  %4854 = vmatprep.subr.bf16.mxu1 %v14580_v27  ;;  %v14661_v25 = vld [vmem:[%s20336_s3 + $0xc04] ss:$16 sps:$4 sm:$0xff]   ;;  %v14664_v27 = vld [vmem:[%s20336_s3 + $0xc0c] ss:$16 sps:$4 sm:$0xff]  }
 0x403   : > { %4773 = vmatpush1.bf16.msra.mxu0 %v14575_v28  ;;  %4855 = vmatpush1.bf16.msra.mxu1 %v14578_v29  ;;  %v14659_v28 = vld [vmem:[%s20336_s3 + $0xc00] ss:$16 sps:$4 sm:$0xff]   ;;  %v14662_v29 = vld [vmem:[%s20336_s3 + $0xc08] ss:$16 sps:$4 sm:$0xff]  }
 0x404   : > { %4774 = vmatprep.subr.bf16.mxu0 %v14583_v30  ;;  %4856 = vmatprep.subr.bf16.mxu1 %v14586_v31  ;;  %v3933_v30 = vpack.c.bf16 %v3929_v24, %v3929_v24  ;;  %v14667_v31 = vld [vmem:[%s20336_s3 + $0xc24] ss:$16 sps:$4 sm:$0xff]   ;;  %v14748_v24 = vld [vmem:[%s20336_s3 + $0xdcc] ss:$16 sps:$4 sm:$0xff]  }
 0x407   : > { %4775 = vmatpush1.bf16.msra.mxu0 %v14581_v32  ;;  %4857 = vmatpush1.bf16.msra.mxu1 %v14584_v33  ;;  %v14670_v32 = vld [vmem:[%s20336_s3 + $0xc2c] ss:$16 sps:$4 sm:$0xff]   ;;  %v14665_v33 = vld [vmem:[%s20336_s3 + $0xc20] ss:$16 sps:$4 sm:$0xff]  }
 0x408   : > { %4776 = vmatprep.subr.bf16.mxu0 %v14589_v34  ;;  %4858 = vmatprep.subr.bf16.mxu1 %v14592_v35  ;;  %v14668_v34 = vld [vmem:[%s20336_s3 + $0xc28] ss:$16 sps:$4 sm:$0xff]   ;;  %v14673_v35 = vld [vmem:[%s20336_s3 + $0xc44] ss:$16 sps:$4 sm:$0xff]  }
 0x40b   : > { %4777 = vmatpush1.bf16.msra.mxu0 %v14587_v36  ;;  %4859 = vmatpush1.bf16.msra.mxu1 %v14590_v37  ;;  %v14676_v36 = vld [vmem:[%s20336_s3 + $0xc4c] ss:$16 sps:$4 sm:$0xff]   ;;  %v14671_v37 = vld [vmem:[%s20336_s3 + $0xc40] ss:$16 sps:$4 sm:$0xff]  }
 0x40c   : > { %4778 = vmatprep.subr.bf16.mxu0 %v14595_v38  ;;  %4860 = vmatprep.subr.bf16.mxu1 %v14598_v39  ;;  %v14674_v38 = vld [vmem:[%s20336_s3 + $0xc48] ss:$16 sps:$4 sm:$0xff]   ;;  %v14679_v39 = vld [vmem:[%s20336_s3 + $0xc64] ss:$16 sps:$4 sm:$0xff]  }
 0x40f   : > { %4779 = vmatpush1.bf16.msra.mxu0 %v14593_v40  ;;  %4861 = vmatpush1.bf16.msra.mxu1 %v14596_v41  ;;  %v14682_v40 = vld [vmem:[%s20336_s3 + $0xc6c] ss:$16 sps:$4 sm:$0xff]   ;;  %v14677_v41 = vld [vmem:[%s20336_s3 + $0xc60] ss:$16 sps:$4 sm:$0xff]  }
 0x410   : > { %4780 = vmatprep.subr.bf16.mxu0 %v14601_v42  ;;  %4862 = vmatprep.subr.bf16.mxu1 %v14604_v21  ;;  %v14680_v42 = vld [vmem:[%s20336_s3 + $0xc68] ss:$16 sps:$4 sm:$0xff]   ;;  %v14685_v21 = vld [vmem:[%s20336_s3 + $0xc84] ss:$16 sps:$4 sm:$0xff]  }
 0x413   : > { %4781 = vmatpush1.bf16.msra.mxu0 %v14599_v43  ;;  %4863 = vmatpush1.bf16.msra.mxu1 %v14602_v44  ;;  %v14688_v43 = vld [vmem:[%s20336_s3 + $0xc8c] ss:$16 sps:$4 sm:$0xff]   ;;  %v14683_v44 = vld [vmem:[%s20336_s3 + $0xc80] ss:$16 sps:$4 sm:$0xff]  }
 0x414   : > { %4782 = vmatprep.subr.bf16.mxu0 %v14607_v51  ;;  %4864 = vmatprep.subr.bf16.mxu1 %v14610_v52  ;;  %v14686_v51 = vld [vmem:[%s20336_s3 + $0xc88] ss:$16 sps:$4 sm:$0xff]   ;;  %v14691_v52 = vld [vmem:[%s20336_s3 + $0xca4] ss:$16 sps:$4 sm:$0xff]  }
 0x417   : > { %4783 = vmatpush1.bf16.msra.mxu0 %v14605_v26  ;;  %4865 = vmatpush1.bf16.msra.mxu1 %v14608_v53  ;;  %v14694_v26 = vld [vmem:[%s20336_s3 + $0xcac] ss:$16 sps:$4 sm:$0xff]   ;;  %v14689_v53 = vld [vmem:[%s20336_s3 + $0xca0] ss:$16 sps:$4 sm:$0xff]  }
 0x418   : > { %4784 = vmatprep.subr.bf16.mxu0 %v14613_v54  ;;  %4866 = vmatprep.subr.bf16.mxu1 %v14616_v56  ;;  %v14692_v54 = vld [vmem:[%s20336_s3 + $0xca8] ss:$16 sps:$4 sm:$0xff]   ;;  %v14697_v56 = vld [vmem:[%s20336_s3 + $0xcc4] ss:$16 sps:$4 sm:$0xff]  }
 0x41b   : > { %4785 = vmatpush1.bf16.msra.mxu0 %v14611_v57  ;;  %4867 = vmatpush1.bf16.msra.mxu1 %v14614_v58  ;;  %v14700_v57 = vld [vmem:[%s20336_s3 + $0xccc] ss:$16 sps:$4 sm:$0xff]   ;;  %v14695_v58 = vld [vmem:[%s20336_s3 + $0xcc0] ss:$16 sps:$4 sm:$0xff]  }
 0x41c   : > { %4786 = vmatprep.subr.bf16.mxu0 %v14619_v59  ;;  %4868 = vmatprep.subr.bf16.mxu1 %v14622_v60  ;;  %v14698_v59 = vld [vmem:[%s20336_s3 + $0xcc8] ss:$16 sps:$4 sm:$0xff]   ;;  %v14703_v60 = vld [vmem:[%s20336_s3 + $0xce4] ss:$16 sps:$4 sm:$0xff]  }
 0x41f   : > { %4787 = vmatpush1.bf16.msra.mxu0 %v14617_v61  ;;  %4869 = vmatpush1.bf16.msra.mxu1 %v14620_v62  ;;  %v14706_v61 = vld [vmem:[%s20336_s3 + $0xcec] ss:$16 sps:$4 sm:$0xff]   ;;  %v14701_v62 = vld [vmem:[%s20336_s3 + $0xce0] ss:$16 sps:$4 sm:$0xff]  }
 0x420   : > { %4788 = vmatprep.subr.bf16.mxu0 %v14625_v0  ;;  %4870 = vmatprep.subr.bf16.mxu1 %v14628_v1  ;;  %v14704_v0 = vld [vmem:[%s20336_s3 + $0xce8] ss:$16 sps:$4 sm:$0xff]   ;;  %v14709_v1 = vld [vmem:[%s20336_s3 + $0xd04] ss:$16 sps:$4 sm:$0xff]  }
 0x423   : > { %4789 = vmatpush1.bf16.msra.mxu0 %v14623_v3  ;;  %4871 = vmatpush1.bf16.msra.mxu1 %v14626_v4  ;;  %v14712_v3 = vld [vmem:[%s20336_s3 + $0xd0c] ss:$16 sps:$4 sm:$0xff]   ;;  %v14707_v4 = vld [vmem:[%s20336_s3 + $0xd00] ss:$16 sps:$4 sm:$0xff]  }
 0x424   : > { %4790 = vmatprep.subr.bf16.mxu0 %v14631_v6  ;;  %4872 = vmatprep.subr.bf16.mxu1 %v14634_v46  ;;  %v14710_v6 = vld [vmem:[%s20336_s3 + $0xd08] ss:$16 sps:$4 sm:$0xff]   ;;  %v14715_v46 = vld [vmem:[%s20336_s3 + $0xd24] ss:$16 sps:$4 sm:$0xff]  }
 0x427   : > { %4791 = vmatpush1.bf16.msra.mxu0 %v14629_v7  ;;  %4873 = vmatpush1.bf16.msra.mxu1 %v14632_v8  ;;  %v14718_v7 = vld [vmem:[%s20336_s3 + $0xd2c] ss:$16 sps:$4 sm:$0xff]   ;;  %v14713_v8 = vld [vmem:[%s20336_s3 + $0xd20] ss:$16 sps:$4 sm:$0xff]  }
 0x428   : > { %4792 = vmatprep.subr.bf16.mxu0 %v14637_v9  ;;  %4874 = vmatprep.subr.bf16.mxu1 %v14640_v10  ;;  %v14716_v9 = vld [vmem:[%s20336_s3 + $0xd28] ss:$16 sps:$4 sm:$0xff]   ;;  %v14721_v10 = vld [vmem:[%s20336_s3 + $0xd44] ss:$16 sps:$4 sm:$0xff]  }
 0x42b   : > { %4793 = vmatpush1.bf16.msra.mxu0 %v14635_v48  ;;  %4875 = vmatpush1.bf16.msra.mxu1 %v14638_v12  ;;  %v14724_v48 = vld [vmem:[%s20336_s3 + $0xd4c] ss:$16 sps:$4 sm:$0xff]   ;;  %v14719_v12 = vld [vmem:[%s20336_s3 + $0xd40] ss:$16 sps:$4 sm:$0xff]  }
 0x42c   : > { %4794 = vmatprep.subr.bf16.mxu0 %v14643_v13  ;;  %4876 = vmatprep.subr.bf16.mxu1 %v14646_v14  ;;  %v14722_v13 = vld [vmem:[%s20336_s3 + $0xd48] ss:$16 sps:$4 sm:$0xff]   ;;  %v14727_v14 = vld [vmem:[%s20336_s3 + $0xd64] ss:$16 sps:$4 sm:$0xff]  }
 0x42f   : > { %4795 = vmatpush1.bf16.msra.mxu0 %v14641_v15  ;;  %4877 = vmatpush1.bf16.msra.mxu1 %v14644_v55  ;;  %v14730_v15 = vld [vmem:[%s20336_s3 + $0xd6c] ss:$16 sps:$4 sm:$0xff]   ;;  %v14725_v55 = vld [vmem:[%s20336_s3 + $0xd60] ss:$16 sps:$4 sm:$0xff]  }
 0x430   : > { %4796 = vmatprep.subr.bf16.mxu0 %v14649_v11  ;;  %4878 = vmatprep.subr.bf16.mxu1 %v14652_v17  ;;  %v14733_v11 = vld [vmem:[%s20336_s3 + $0xd84] ss:$16 sps:$4 sm:$0xff]   ;;  %v14736_v17 = vld [vmem:[%s20336_s3 + $0xd8c] ss:$16 sps:$4 sm:$0xff]  }
 0x433   : > { %4797 = vmatpush1.bf16.msra.mxu0 %v14647_v18  ;;  %4879 = vmatpush1.bf16.msra.mxu1 %v14650_v63  ;;  %v14731_v18 = vld [vmem:[%s20336_s3 + $0xd80] ss:$16 sps:$4 sm:$0xff]   ;;  %v14734_v63 = vld [vmem:[%s20336_s3 + $0xd88] ss:$16 sps:$4 sm:$0xff]  }
 0x434   : > { %4798 = vmatprep.subr.bf16.mxu0 %v14655_v20  ;;  %4880 = vmatprep.subr.bf16.mxu1 %v14658_v22  ;;  %v14742_v20 = vld [vmem:[%s20336_s3 + $0xdac] ss:$16 sps:$4 sm:$0xff]   ;;  %v14737_v22 = vld [vmem:[%s20336_s3 + $0xda0] ss:$16 sps:$4 sm:$0xff]  }
 0x437   : > { %4799 = vmatpush1.bf16.msra.mxu0 %v14653_v23  ;;  %4881 = vmatpush1.bf16.msra.mxu1 %v14656_v5  ;;  %v14740_v23 = vld [vmem:[%s20336_s3 + $0xda8] ss:$16 sps:$4 sm:$0xff]   ;;  %v14745_v5 = vld [vmem:[%s20336_s3 + $0xdc4] ss:$16 sps:$4 sm:$0xff]  }
 0x438   : > { %5691 = vmatprep.subr.bf16.mxu0 %v14661_v25  ;;  %5773 = vmatprep.subr.bf16.mxu1 %v14664_v27  ;;  %v14743_v25 = vld [vmem:[%s20336_s3 + $0xdc0] ss:$16 sps:$4 sm:$0xff]   ;;  %v14746_v27 = vld [vmem:[%s20336_s3 + $0xdc8] ss:$16 sps:$4 sm:$0xff]  }
 0x43a   : > { %4801 = vmatmul.mubr.bf16.vlgmr.msra.gmra.mrb[12].mxu0 %v3933_v30  ;;  %4883 = vmatmul.mubr.bf16.vlgmr.msra.gmra.mrb[12].mxu1 %v3933_v30  ;;  %v14749_v30 = vld [vmem:[%s20336_s3 + $0xde0] ss:$16 sps:$4 sm:$0xff]  }
 0x43b   : > { %5692 = vmatpush1.bf16.msra.mxu0 %v14659_v28  ;;  %5774 = vmatpush1.bf16.msra.mxu1 %v14662_v29  ;;  %v14751_v28 = vld [vmem:[%s20336_s3 + $0xde4] ss:$16 sps:$4 sm:$0xff]   ;;  %v14754_v29 = vld [vmem:[%s20336_s3 + $0xdec] ss:$16 sps:$4 sm:$0xff]  }
 0x43c   : > { %5693 = vmatprep.subr.bf16.mxu0 %v14667_v31  ;;  %5775 = vmatprep.subr.bf16.mxu1 %v14670_v32  ;;  %v14752_v31 = vld [vmem:[%s20336_s3 + $0xde8] ss:$16 sps:$4 sm:$0xff]   ;;  %v14757_v32 = vld [vmem:[%s20336_s3 + $0xe04] ss:$16 sps:$4 sm:$0xff]  }
 0x43f   : > { %5694 = vmatpush1.bf16.msra.mxu0 %v14665_v33  ;;  %5776 = vmatpush1.bf16.msra.mxu1 %v14668_v34  ;;  %v14760_v33 = vld [vmem:[%s20336_s3 + $0xe0c] ss:$16 sps:$4 sm:$0xff]   ;;  %v18020_v34 = vld [vmem:[%s20337_s4 + $0x8] sm:$0xf] }
 0x440   : > { %5695 = vmatprep.subr.bf16.mxu0 %v14673_v35  ;;  %5777 = vmatprep.subr.bf16.mxu1 %v14676_v36  ;;  %v4070_v35 = vrot.slane %v18020_v34, %v16806_v47  ;;  %v4074_v36 = vrot.slane %v18020_v34, %v16814_v49 }
 0x443   : > { %5696 = vmatpush1.bf16.msra.mxu0 %v14671_v37  ;;  %5778 = vmatpush1.bf16.msra.mxu1 %v14674_v38  ;;  %v4082_v37 = vrot.slane %v18020_v34, %v16817_v50 }
 0x444   : > { %5697 = vmatprep.subr.bf16.mxu0 %v14679_v39  ;;  %5779 = vmatprep.subr.bf16.mxu1 %v14682_v40 }
 0x447   : > { %5698 = vmatpush1.bf16.msra.mxu0 %v14677_v41  ;;  %5780 = vmatpush1.bf16.msra.mxu1 %v14680_v42 }
 0x448   : > { %5699 = vmatprep.subr.bf16.mxu0 %v14685_v21  ;;  %5781 = vmatprep.subr.bf16.mxu1 %v14688_v43 }
 0x44b   : > { %5700 = vmatpush1.bf16.msra.mxu0 %v14683_v44  ;;  %5782 = vmatpush1.bf16.msra.mxu1 %v14686_v51 }
 0x44c   : > { %5701 = vmatprep.subr.bf16.mxu0 %v14691_v52  ;;  %5783 = vmatprep.subr.bf16.mxu1 %v14694_v26 }
 0x44f   : > { %5702 = vmatpush1.bf16.msra.mxu0 %v14689_v53  ;;  %5784 = vmatpush1.bf16.msra.mxu1 %v14692_v54 }
 0x450   : > { %5703 = vmatprep.subr.bf16.mxu0 %v14697_v56  ;;  %5785 = vmatprep.subr.bf16.mxu1 %v14700_v57 }
 0x453   : > { %5704 = vmatpush1.bf16.msra.mxu0 %v14695_v58  ;;  %5786 = vmatpush1.bf16.msra.mxu1 %v14698_v59  ;;  %v14755_v58 = vld [vmem:[%s20336_s3 + $0xe00] ss:$16 sps:$4 sm:$0xff]   ;;  %v14758_v59 = vld [vmem:[%s20336_s3 + $0xe08] ss:$16 sps:$4 sm:$0xff]  }
 0x454   : > { %5705 = vmatprep.subr.bf16.mxu0 %v14703_v60  ;;  %5787 = vmatprep.subr.bf16.mxu1 %v14706_v61  ;;  %v14763_v61 = vld [vmem:[%s20336_s3 + $0xe24] ss:$16 sps:$4 sm:$0xff]  }
 0x457   : > { %5706 = vmatpush1.bf16.msra.mxu0 %v14701_v62  ;;  %5788 = vmatpush1.bf16.msra.mxu1 %v14704_v0  ;;  %v14766_v62 = vld [vmem:[%s20336_s3 + $0xe2c] ss:$16 sps:$4 sm:$0xff]  }
 0x458   : > { %5707 = vmatprep.subr.bf16.mxu0 %v14709_v1  ;;  %5789 = vmatprep.subr.bf16.mxu1 %v14712_v3  ;;  %v14761_v1 = vld [vmem:[%s20336_s3 + $0xe20] ss:$16 sps:$4 sm:$0xff]   ;;  %v14764_v3 = vld [vmem:[%s20336_s3 + $0xe28] ss:$16 sps:$4 sm:$0xff]  }
 0x45b   : > { %5708 = vmatpush1.bf16.msra.mxu0 %v14707_v4  ;;  %5790 = vmatpush1.bf16.msra.mxu1 %v14710_v6  ;;  %v14769_v4 = vld [vmem:[%s20336_s3 + $0xe44] ss:$16 sps:$4 sm:$0xff]   ;;  %v14772_v6 = vld [vmem:[%s20336_s3 + $0xe4c] ss:$16 sps:$4 sm:$0xff]  }
 0x45c   : > { %5709 = vmatprep.subr.bf16.mxu0 %v14715_v46  ;;  %5791 = vmatprep.subr.bf16.mxu1 %v14718_v7  ;;  %v14767_v46 = vld [vmem:[%s20336_s3 + $0xe40] ss:$16 sps:$4 sm:$0xff]   ;;  %v14770_v7 = vld [vmem:[%s20336_s3 + $0xe48] ss:$16 sps:$4 sm:$0xff]  }
 0x45f   : > { %5710 = vmatpush1.bf16.msra.mxu0 %v14713_v8  ;;  %5792 = vmatpush1.bf16.msra.mxu1 %v14716_v9  ;;  %v14775_v8 = vld [vmem:[%s20336_s3 + $0xe64] ss:$16 sps:$4 sm:$0xff]   ;;  %v14778_v9 = vld [vmem:[%s20336_s3 + $0xe6c] ss:$16 sps:$4 sm:$0xff]  }
 0x460   : > { %5711 = vmatprep.subr.bf16.mxu0 %v14721_v10  ;;  %5793 = vmatprep.subr.bf16.mxu1 %v14724_v48  ;;  %v14773_v10 = vld [vmem:[%s20336_s3 + $0xe60] ss:$16 sps:$4 sm:$0xff]   ;;  %v14776_v48 = vld [vmem:[%s20336_s3 + $0xe68] ss:$16 sps:$4 sm:$0xff]  }
 0x463   : > { %5712 = vmatpush1.bf16.msra.mxu0 %v14719_v12  ;;  %5794 = vmatpush1.bf16.msra.mxu1 %v14722_v13  ;;  %v14781_v12 = vld [vmem:[%s20336_s3 + $0xe84] ss:$16 sps:$4 sm:$0xff]   ;;  %v14784_v13 = vld [vmem:[%s20336_s3 + $0xe8c] ss:$16 sps:$4 sm:$0xff]  }
 0x464   : > { %5713 = vmatprep.subr.bf16.mxu0 %v14727_v14  ;;  %5795 = vmatprep.subr.bf16.mxu1 %v14730_v15  ;;  %v14779_v14 = vld [vmem:[%s20336_s3 + $0xe80] ss:$16 sps:$4 sm:$0xff]   ;;  %v14782_v15 = vld [vmem:[%s20336_s3 + $0xe88] ss:$16 sps:$4 sm:$0xff]  }
 0x467   : > { %5714 = vmatpush1.bf16.msra.mxu0 %v14725_v55  ;;  %5796 = vmatpush1.bf16.msra.mxu1 %v14728_v16  ;;  %v14787_v55 = vld [vmem:[%s20336_s3 + $0xea4] ss:$16 sps:$4 sm:$0xff]   ;;  %v14790_v16 = vld [vmem:[%s20336_s3 + $0xeac] ss:$16 sps:$4 sm:$0xff]  }
 0x468   : > { %5715 = vmatprep.subr.bf16.mxu0 %v14733_v11  ;;  %5797 = vmatprep.subr.bf16.mxu1 %v14736_v17  ;;  %v14785_v11 = vld [vmem:[%s20336_s3 + $0xea0] ss:$16 sps:$4 sm:$0xff]   ;;  %v14788_v17 = vld [vmem:[%s20336_s3 + $0xea8] ss:$16 sps:$4 sm:$0xff]  }
 0x46b   : > { %5716 = vmatpush1.bf16.msra.mxu0 %v14731_v18  ;;  %5798 = vmatpush1.bf16.msra.mxu1 %v14734_v63  ;;  %v14793_v18 = vld [vmem:[%s20336_s3 + $0xec4] ss:$16 sps:$4 sm:$0xff]   ;;  %v14796_v63 = vld [vmem:[%s20336_s3 + $0xecc] ss:$16 sps:$4 sm:$0xff]  }
 0x46c   : > { %5717 = vmatprep.subr.bf16.mxu0 %v14739_v19  ;;  %5799 = vmatprep.subr.bf16.mxu1 %v14742_v20  ;;  %v14791_v19 = vld [vmem:[%s20336_s3 + $0xec0] ss:$16 sps:$4 sm:$0xff]   ;;  %v14794_v20 = vld [vmem:[%s20336_s3 + $0xec8] ss:$16 sps:$4 sm:$0xff]  }
 0x46f   : > { %5718 = vmatpush1.bf16.msra.mxu0 %v14737_v22  ;;  %5800 = vmatpush1.bf16.msra.mxu1 %v14740_v23  ;;  %v14799_v22 = vld [vmem:[%s20336_s3 + $0xee4] ss:$16 sps:$4 sm:$0xff]   ;;  %v14802_v23 = vld [vmem:[%s20336_s3 + $0xeec] ss:$16 sps:$4 sm:$0xff]  }
 0x470   : > { %5719 = vmatprep.subr.bf16.mxu0 %v14745_v5  ;;  %5801 = vmatprep.subr.bf16.mxu1 %v14748_v24  ;;  %v14797_v5 = vld [vmem:[%s20336_s3 + $0xee0] ss:$16 sps:$4 sm:$0xff]   ;;  %v14800_v24 = vld [vmem:[%s20336_s3 + $0xee8] ss:$16 sps:$4 sm:$0xff]  }
 0x473   : > { %5720 = vmatpush1.bf16.msra.mxu0 %v14743_v25  ;;  %5802 = vmatpush1.bf16.msra.mxu1 %v14746_v27  ;;  %v14805_v25 = vld [vmem:[%s20336_s3 + $0xf04] ss:$16 sps:$4 sm:$0xff]   ;;  %v14808_v27 = vld [vmem:[%s20336_s3 + $0xf0c] ss:$16 sps:$4 sm:$0xff]  }
 0x474   : > { %5721 = vmatprep.subr.bf16.mxu0 %v14751_v28  ;;  %5803 = vmatprep.subr.bf16.mxu1 %v14754_v29  ;;  %v14803_v28 = vld [vmem:[%s20336_s3 + $0xf00] ss:$16 sps:$4 sm:$0xff]   ;;  %v14806_v29 = vld [vmem:[%s20336_s3 + $0xf08] ss:$16 sps:$4 sm:$0xff]  }
 0x477   : > { %5722 = vmatpush1.bf16.msra.mxu0 %v14749_v30  ;;  %5804 = vmatpush1.bf16.msra.mxu1 %v14752_v31  ;;  %v14811_v30 = vld [vmem:[%s20336_s3 + $0xf24] ss:$16 sps:$4 sm:$0xff]   ;;  %v14814_v31 = vld [vmem:[%s20336_s3 + $0xf2c] ss:$16 sps:$4 sm:$0xff]  }
 0x478   : > { %5732 = vmatprep.subr.bf16.mxu0 %v14757_v32  ;;  %5814 = vmatprep.subr.bf16.mxu1 %v14760_v33  ;;  %v14809_v32 = vld [vmem:[%s20336_s3 + $0xf20] ss:$16 sps:$4 sm:$0xff]   ;;  %v14812_v33 = vld [vmem:[%s20336_s3 + $0xf28] ss:$16 sps:$4 sm:$0xff]  }
 0x50d   : > { %v4802_v38 = vpop.f32.mrb[12].mxu0  ;;  %v18028_v39 = vpop.f32.mrb[12].mxu1 }
 0x50e   : > { %v13606_v40 = vadd.f32 %v4802_v38, %v4070_v35  ;;  %v4804_v41 = vpop.f32.mrb[13].mxu0  ;;  %v4886_v42 = vpop.f32.mrb[13].mxu1  ;;  %v14817_v35 = vld [vmem:[%s20336_s3 + $0xf44] ss:$16 sps:$4 sm:$0xff]   ;;  %v14818_v38 = vld [vmem:[%s20336_s3 + $0xf48] ss:$16 sps:$4 sm:$0xff]  }
 0x50f   : > { %v13607_v21 = vadd.f32 %v4804_v41, %v4074_v36  ;;  %v13609_v43 = vadd.f32 %v4886_v42, %v4082_v37  ;;  %v4806_v44 = vpop.f32.mrb[14].mxu0  ;;  %v4888_v51 = vpop.f32.mrb[14].mxu1  ;;  %v14820_v36 = vld [vmem:[%s20336_s3 + $0xf4c] ss:$16 sps:$4 sm:$0xff]   ;;  %v14815_v37 = vld [vmem:[%s20336_s3 + $0xf40] ss:$16 sps:$4 sm:$0xff]  }
 0x510   : > { %v4891_v52 = vmax.f32 %v13606_v40, 0.0  ;;  %v4807_v26 = vpop.f32.mrb[15].mxu0  ;;  %v4889_v53 = vpop.f32.mrb[15].mxu1  ;;  %v14823_v40 = vld [vmem:[%s20336_s3 + $0xf64] ss:$16 sps:$4 sm:$0xff]  }
 0x511   : > { %v4892_v54 = vmax.f32 %v13607_v21, 0.0  ;;  %v4894_v56 = vmax.f32 %v13609_v43, 0.0  ;;  %v14826_v41 = vld [vmem:[%s20336_s3 + $0xf6c] ss:$16 sps:$4 sm:$0xff]   ;;  %v14821_v42 = vld [vmem:[%s20336_s3 + $0xf60] ss:$16 sps:$4 sm:$0xff]  }
 0x512   : > { %v4895_v60 = vpack.c.bf16 %v4891_v52, %v4891_v52  ;;  %v14824_v21 = vld [vmem:[%s20336_s3 + $0xf68] ss:$16 sps:$4 sm:$0xff]   ;;  %v14829_v43 = vld [vmem:[%s20336_s3 + $0xf84] ss:$16 sps:$4 sm:$0xff]   ;;  %v14832_v44 = vld [vmem:[%s20336_s3 + $0xf8c] ss:$16 sps:$4 sm:$0xff]  }
 0x513   : > { %v4896_v57 = vpack.c.bf16 %v4892_v54, %v4892_v54  ;;  %v4898_v0 = vpack.c.bf16 %v4894_v56, %v4894_v56  ;;  %v14827_v51 = vld [vmem:[%s20336_s3 + $0xf80] ss:$16 sps:$4 sm:$0xff]   ;;  %v14830_v52 = vld [vmem:[%s20336_s3 + $0xf88] ss:$16 sps:$4 sm:$0xff]   ;;  %v14835_v26 = vld [vmem:[%s20336_s3 + $0xfa4] ss:$16 sps:$4 sm:$0xff]  }
 0x514   : > { %v14838_v53 = vld [vmem:[%s20336_s3 + $0xfac] ss:$16 sps:$4 sm:$0xff]   ;;  %v14833_v54 = vld [vmem:[%s20336_s3 + $0xfa0] ss:$16 sps:$4 sm:$0xff]   ;;  %v14836_v56 = vld [vmem:[%s20336_s3 + $0xfa8] ss:$16 sps:$4 sm:$0xff]  }
 0x515   : > { %5723 = vmatprep.mubr.bf16.mxu0 %v4896_v57  ;;  %5805 = vmatprep.mubr.bf16.mxu1 %v4896_v57  ;;  %v4078_v57 = vrot.slane %v18020_v34, %v16984_v2  ;;  %v14842_v34 = vld [vmem:[%s20336_s3 + $0xfc8] ss:$16 sps:$4 sm:$0xff]  }
 0x516   : > { %5724 = vmatmul.mubr.bf16.vlgmr.msra.gmra.mrb[16].mxu0 %v4895_v60  ;;  %5806 = vmatmul.mubr.bf16.vlgmr.msra.gmra.mrb[16].mxu1 %v4895_v60  ;;  %v14839_v60 = vld [vmem:[%s20336_s3 + $0xfc0] ss:$16 sps:$4 sm:$0xff]  }
 0x517   : > { %5733 = vmatpush1.bf16.msra.mxu0 %v14755_v58  ;;  %5815 = vmatpush1.bf16.msra.mxu1 %v14758_v59  ;;  %v14841_v58 = vld [vmem:[%s20336_s3 + $0xfc4] ss:$16 sps:$4 sm:$0xff]   ;;  %v14844_v59 = vld [vmem:[%s20336_s3 + $0xfcc] ss:$16 sps:$4 sm:$0xff]  }
 0x518   : > { %5764 = vmatprep.mubr.bf16.mxu0 %v4898_v0  ;;  %5846 = vmatprep.mubr.bf16.mxu1 %v4898_v0  ;;  %v14850_v0 = vld [vmem:[%s20336_s3 + $0xfec] ss:$16 sps:$4 sm:$0xff]  }
 0x519   : > { %5734 = vmatprep.subr.bf16.mxu0 %v14763_v61  ;;  %5816 = vmatprep.subr.bf16.mxu1 %v14766_v62  ;;  %v13608_v61 = vadd.f32 %v18028_v39, %v4078_v57  ;;  %v14847_v62 = vld [vmem:[%s20336_s3 + $0xfe4] ss:$16 sps:$4 sm:$0xff]   ;;  %v14848_v39 = vld [vmem:[%s20336_s3 + $0xfe8] ss:$16 sps:$4 sm:$0xff]  }
 0x51a   : > { %v14920_v57 = vld [vmem:[%s20336_s3 + $0x1168] ss:$16 sps:$4 sm:$0xff]  }
 0x51b   : > { %5735 = vmatpush1.bf16.msra.mxu0 %v14761_v1  ;;  %5817 = vmatpush1.bf16.msra.mxu1 %v14764_v3  ;;  %v14845_v1 = vld [vmem:[%s20336_s3 + $0xfe0] ss:$16 sps:$4 sm:$0xff]   ;;  %v4893_v3 = vmax.f32 %v13608_v61, 0.0  ;;  %v14931_v61 = vld [vmem:[%s20336_s3 + $0x11a4] ss:$16 sps:$4 sm:$0xff]  }
 0x51c   : > { %5736 = vmatprep.subr.bf16.mxu0 %v14769_v4  ;;  %5818 = vmatprep.subr.bf16.mxu1 %v14772_v6  ;;  %v14853_v4 = vld [vmem:[%s20336_s3 + $0x1004] ss:$16 sps:$4 sm:$0xff]   ;;  %v14856_v6 = vld [vmem:[%s20336_s3 + $0x100c] ss:$16 sps:$4 sm:$0xff]  }
 0x51f   : > { %5737 = vmatpush1.bf16.msra.mxu0 %v14767_v46  ;;  %5819 = vmatpush1.bf16.msra.mxu1 %v14770_v7  ;;  %v14851_v46 = vld [vmem:[%s20336_s3 + $0x1000] ss:$16 sps:$4 sm:$0xff]   ;;  %v14854_v7 = vld [vmem:[%s20336_s3 + $0x1008] ss:$16 sps:$4 sm:$0xff]  }
 0x520   : > { %5738 = vmatprep.subr.bf16.mxu0 %v14775_v8  ;;  %5820 = vmatprep.subr.bf16.mxu1 %v14778_v9  ;;  %v4897_v8 = vpack.c.bf16 %v4893_v3, %v4893_v3  ;;  %v14859_v9 = vld [vmem:[%s20336_s3 + $0x1024] ss:$16 sps:$4 sm:$0xff]   ;;  %v14940_v3 = vld [vmem:[%s20336_s3 + $0x11cc] ss:$16 sps:$4 sm:$0xff]  }
 0x523   : > { %5739 = vmatpush1.bf16.msra.mxu0 %v14773_v10  ;;  %5821 = vmatpush1.bf16.msra.mxu1 %v14776_v48  ;;  %v14862_v10 = vld [vmem:[%s20336_s3 + $0x102c] ss:$16 sps:$4 sm:$0xff]   ;;  %v14857_v48 = vld [vmem:[%s20336_s3 + $0x1020] ss:$16 sps:$4 sm:$0xff]  }
 0x524   : > { %5740 = vmatprep.subr.bf16.mxu0 %v14781_v12  ;;  %5822 = vmatprep.subr.bf16.mxu1 %v14784_v13  ;;  %v14860_v12 = vld [vmem:[%s20336_s3 + $0x1028] ss:$16 sps:$4 sm:$0xff]   ;;  %v14865_v13 = vld [vmem:[%s20336_s3 + $0x1044] ss:$16 sps:$4 sm:$0xff]  }
 0x527   : > { %5741 = vmatpush1.bf16.msra.mxu0 %v14779_v14  ;;  %5823 = vmatpush1.bf16.msra.mxu1 %v14782_v15  ;;  %v14868_v14 = vld [vmem:[%s20336_s3 + $0x104c] ss:$16 sps:$4 sm:$0xff]   ;;  %v14863_v15 = vld [vmem:[%s20336_s3 + $0x1040] ss:$16 sps:$4 sm:$0xff]  }
 0x528   : > { %5742 = vmatprep.subr.bf16.mxu0 %v14787_v55  ;;  %5824 = vmatprep.subr.bf16.mxu1 %v14790_v16  ;;  %v14866_v55 = vld [vmem:[%s20336_s3 + $0x1048] ss:$16 sps:$4 sm:$0xff]   ;;  %v14871_v16 = vld [vmem:[%s20336_s3 + $0x1064] ss:$16 sps:$4 sm:$0xff]  }
 0x52b   : > { %5743 = vmatpush1.bf16.msra.mxu0 %v14785_v11  ;;  %5825 = vmatpush1.bf16.msra.mxu1 %v14788_v17  ;;  %v14874_v11 = vld [vmem:[%s20336_s3 + $0x106c] ss:$16 sps:$4 sm:$0xff]   ;;  %v14869_v17 = vld [vmem:[%s20336_s3 + $0x1060] ss:$16 sps:$4 sm:$0xff]  }
 0x52c   : > { %5744 = vmatprep.subr.bf16.mxu0 %v14793_v18  ;;  %5826 = vmatprep.subr.bf16.mxu1 %v14796_v63  ;;  %v14872_v18 = vld [vmem:[%s20336_s3 + $0x1068] ss:$16 sps:$4 sm:$0xff]   ;;  %v14877_v63 = vld [vmem:[%s20336_s3 + $0x1084] ss:$16 sps:$4 sm:$0xff]  }
 0x52f   : > { %5745 = vmatpush1.bf16.msra.mxu0 %v14791_v19  ;;  %5827 = vmatpush1.bf16.msra.mxu1 %v14794_v20  ;;  %v14880_v19 = vld [vmem:[%s20336_s3 + $0x108c] ss:$16 sps:$4 sm:$0xff]   ;;  %v14875_v20 = vld [vmem:[%s20336_s3 + $0x1080] ss:$16 sps:$4 sm:$0xff]  }
 0x530   : > { %5746 = vmatprep.subr.bf16.mxu0 %v14799_v22  ;;  %5828 = vmatprep.subr.bf16.mxu1 %v14802_v23  ;;  %v14878_v22 = vld [vmem:[%s20336_s3 + $0x1088] ss:$16 sps:$4 sm:$0xff]   ;;  %v14883_v23 = vld [vmem:[%s20336_s3 + $0x10a4] ss:$16 sps:$4 sm:$0xff]  }
 0x533   : > { %5747 = vmatpush1.bf16.msra.mxu0 %v14797_v5  ;;  %5829 = vmatpush1.bf16.msra.mxu1 %v14800_v24  ;;  %v14886_v5 = vld [vmem:[%s20336_s3 + $0x10ac] ss:$16 sps:$4 sm:$0xff]   ;;  %v14881_v24 = vld [vmem:[%s20336_s3 + $0x10a0] ss:$16 sps:$4 sm:$0xff]  }
 0x534   : > { %5748 = vmatprep.subr.bf16.mxu0 %v14805_v25  ;;  %5830 = vmatprep.subr.bf16.mxu1 %v14808_v27  ;;  %v14884_v25 = vld [vmem:[%s20336_s3 + $0x10a8] ss:$16 sps:$4 sm:$0xff]   ;;  %v14889_v27 = vld [vmem:[%s20336_s3 + $0x10c4] ss:$16 sps:$4 sm:$0xff]  }
 0x537   : > { %5749 = vmatpush1.bf16.msra.mxu0 %v14803_v28  ;;  %5831 = vmatpush1.bf16.msra.mxu1 %v14806_v29  ;;  %v14892_v28 = vld [vmem:[%s20336_s3 + $0x10cc] ss:$16 sps:$4 sm:$0xff]   ;;  %v14887_v29 = vld [vmem:[%s20336_s3 + $0x10c0] ss:$16 sps:$4 sm:$0xff]  }
 0x538   : > { %5750 = vmatprep.subr.bf16.mxu0 %v14811_v30  ;;  %5832 = vmatprep.subr.bf16.mxu1 %v14814_v31  ;;  %v14890_v30 = vld [vmem:[%s20336_s3 + $0x10c8] ss:$16 sps:$4 sm:$0xff]   ;;  %v14895_v31 = vld [vmem:[%s20336_s3 + $0x10e4] ss:$16 sps:$4 sm:$0xff]  }
 0x53b   : > { %5751 = vmatpush1.bf16.msra.mxu0 %v14809_v32  ;;  %5833 = vmatpush1.bf16.msra.mxu1 %v14812_v33  ;;  %v14898_v32 = vld [vmem:[%s20336_s3 + $0x10ec] ss:$16 sps:$4 sm:$0xff]   ;;  %v14893_v33 = vld [vmem:[%s20336_s3 + $0x10e0] ss:$16 sps:$4 sm:$0xff]  }
 0x53c   : > { %5752 = vmatprep.subr.bf16.mxu0 %v14817_v35  ;;  %5834 = vmatprep.subr.bf16.mxu1 %v14820_v36  ;;  %v14896_v35 = vld [vmem:[%s20336_s3 + $0x10e8] ss:$16 sps:$4 sm:$0xff]   ;;  %v14901_v36 = vld [vmem:[%s20336_s3 + $0x1104] ss:$16 sps:$4 sm:$0xff]  }
 0x53f   : > { %5753 = vmatpush1.bf16.msra.mxu0 %v14815_v37  ;;  %5835 = vmatpush1.bf16.msra.mxu1 %v14818_v38  ;;  %v14904_v37 = vld [vmem:[%s20336_s3 + $0x110c] ss:$16 sps:$4 sm:$0xff]   ;;  %v14899_v38 = vld [vmem:[%s20336_s3 + $0x1100] ss:$16 sps:$4 sm:$0xff]  }
 0x540   : > { %5754 = vmatprep.subr.bf16.mxu0 %v14823_v40  ;;  %5836 = vmatprep.subr.bf16.mxu1 %v14826_v41  ;;  %v14902_v40 = vld [vmem:[%s20336_s3 + $0x1108] ss:$16 sps:$4 sm:$0xff]   ;;  %v14907_v41 = vld [vmem:[%s20336_s3 + $0x1124] ss:$16 sps:$4 sm:$0xff]  }
 0x543   : > { %5755 = vmatpush1.bf16.msra.mxu0 %v14821_v42  ;;  %5837 = vmatpush1.bf16.msra.mxu1 %v14824_v21  ;;  %v14910_v42 = vld [vmem:[%s20336_s3 + $0x112c] ss:$16 sps:$4 sm:$0xff]   ;;  %v14905_v21 = vld [vmem:[%s20336_s3 + $0x1120] ss:$16 sps:$4 sm:$0xff]  }
 0x544   : > { %5756 = vmatprep.subr.bf16.mxu0 %v14829_v43  ;;  %5838 = vmatprep.subr.bf16.mxu1 %v14832_v44  ;;  %v14908_v43 = vld [vmem:[%s20336_s3 + $0x1128] ss:$16 sps:$4 sm:$0xff]   ;;  %v14913_v44 = vld [vmem:[%s20336_s3 + $0x1144] ss:$16 sps:$4 sm:$0xff]  }
 0x547   : > { %5757 = vmatpush1.bf16.msra.mxu0 %v14827_v51  ;;  %5839 = vmatpush1.bf16.msra.mxu1 %v14830_v52  ;;  %v14916_v51 = vld [vmem:[%s20336_s3 + $0x114c] ss:$16 sps:$4 sm:$0xff]   ;;  %v14911_v52 = vld [vmem:[%s20336_s3 + $0x1140] ss:$16 sps:$4 sm:$0xff]  }
 0x548   : > { %5758 = vmatprep.subr.bf16.mxu0 %v14835_v26  ;;  %5840 = vmatprep.subr.bf16.mxu1 %v14838_v53  ;;  %v14914_v26 = vld [vmem:[%s20336_s3 + $0x1148] ss:$16 sps:$4 sm:$0xff]   ;;  %v14919_v53 = vld [vmem:[%s20336_s3 + $0x1164] ss:$16 sps:$4 sm:$0xff]  }
 0x54b   : > { %5759 = vmatpush1.bf16.msra.mxu0 %v14833_v54  ;;  %5841 = vmatpush1.bf16.msra.mxu1 %v14836_v56  ;;  %v14922_v54 = vld [vmem:[%s20336_s3 + $0x116c] ss:$16 sps:$4 sm:$0xff]   ;;  %v14917_v56 = vld [vmem:[%s20336_s3 + $0x1160] ss:$16 sps:$4 sm:$0xff]  }
 0x54c   : > { %5760 = vmatprep.subr.bf16.mxu0 %v14841_v58  ;;  %5842 = vmatprep.subr.bf16.mxu1 %v14844_v59  ;;  %v14925_v58 = vld [vmem:[%s20336_s3 + $0x1184] ss:$16 sps:$4 sm:$0xff]   ;;  %v14928_v59 = vld [vmem:[%s20336_s3 + $0x118c] ss:$16 sps:$4 sm:$0xff]  }
 0x54f   : > { %5761 = vmatpush1.bf16.msra.mxu0 %v14839_v60  ;;  %5843 = vmatpush1.bf16.msra.mxu1 %v14842_v34  ;;  %v14923_v60 = vld [vmem:[%s20336_s3 + $0x1180] ss:$16 sps:$4 sm:$0xff]   ;;  %v14926_v34 = vld [vmem:[%s20336_s3 + $0x1188] ss:$16 sps:$4 sm:$0xff]  }
 0x550   : > { %5762 = vmatprep.subr.bf16.mxu0 %v14847_v62  ;;  %5844 = vmatprep.subr.bf16.mxu1 %v14850_v0  ;;  %v14934_v62 = vld [vmem:[%s20336_s3 + $0x11ac] ss:$16 sps:$4 sm:$0xff]   ;;  %v14929_v0 = vld [vmem:[%s20336_s3 + $0x11a0] ss:$16 sps:$4 sm:$0xff]  }
 0x553   : > { %5763 = vmatpush1.bf16.msra.mxu0 %v14845_v1  ;;  %5845 = vmatpush1.bf16.msra.mxu1 %v14848_v39  ;;  %v14932_v1 = vld [vmem:[%s20336_s3 + $0x11a8] ss:$16 sps:$4 sm:$0xff]   ;;  %v14937_v39 = vld [vmem:[%s20336_s3 + $0x11c4] ss:$16 sps:$4 sm:$0xff]  }
 0x554   : > { %6655 = vmatprep.subr.bf16.mxu0 %v14853_v4  ;;  %6737 = vmatprep.subr.bf16.mxu1 %v14856_v6  ;;  %v14935_v4 = vld [vmem:[%s20336_s3 + $0x11c0] ss:$16 sps:$4 sm:$0xff]   ;;  %v14938_v6 = vld [vmem:[%s20336_s3 + $0x11c8] ss:$16 sps:$4 sm:$0xff]  }
 0x556   : > { %5765 = vmatmul.mubr.bf16.vlgmr.msra.gmra.mrb[16].mxu0 %v4897_v8  ;;  %5847 = vmatmul.mubr.bf16.vlgmr.msra.gmra.mrb[16].mxu1 %v4897_v8  ;;  %v14941_v8 = vld [vmem:[%s20336_s3 + $0x11e0] ss:$16 sps:$4 sm:$0xff]  }
 0x557   : > { %6656 = vmatpush1.bf16.msra.mxu0 %v14851_v46  ;;  %6738 = vmatpush1.bf16.msra.mxu1 %v14854_v7  ;;  %v14943_v46 = vld [vmem:[%s20336_s3 + $0x11e4] ss:$16 sps:$4 sm:$0xff]   ;;  %v14946_v7 = vld [vmem:[%s20336_s3 + $0x11ec] ss:$16 sps:$4 sm:$0xff]  }
 0x558   : > { %6657 = vmatprep.subr.bf16.mxu0 %v14859_v9  ;;  %6739 = vmatprep.subr.bf16.mxu1 %v14862_v10  ;;  %v14944_v9 = vld [vmem:[%s20336_s3 + $0x11e8] ss:$16 sps:$4 sm:$0xff]   ;;  %v14949_v10 = vld [vmem:[%s20336_s3 + $0x1204] ss:$16 sps:$4 sm:$0xff]  }
 0x55b   : > { %6658 = vmatpush1.bf16.msra.mxu0 %v14857_v48  ;;  %6740 = vmatpush1.bf16.msra.mxu1 %v14860_v12  ;;  %v14952_v48 = vld [vmem:[%s20336_s3 + $0x120c] ss:$16 sps:$4 sm:$0xff]  }
 0x55c   : > { %6659 = vmatprep.subr.bf16.mxu0 %v14865_v13  ;;  %6741 = vmatprep.subr.bf16.mxu1 %v14868_v14  ;;  %v18420_v12 = vld [vmem:[%s20337_s4 + $0xc] sm:$0xf] }
 0x55d   : > { %v5034_v13 = vrot.slane %v18420_v12, %v16806_v47  ;;  %v5038_v14 = vrot.slane %v18420_v12, %v16814_v49 }
 0x55f   : > { %6660 = vmatpush1.bf16.msra.mxu0 %v14863_v15  ;;  %6742 = vmatpush1.bf16.msra.mxu1 %v14866_v55  ;;  %v5046_v15 = vrot.slane %v18420_v12, %v16817_v50 }
 0x560   : > { %6661 = vmatprep.subr.bf16.mxu0 %v14871_v16  ;;  %6743 = vmatprep.subr.bf16.mxu1 %v14874_v11 }
 0x563   : > { %6662 = vmatpush1.bf16.msra.mxu0 %v14869_v17  ;;  %6744 = vmatpush1.bf16.msra.mxu1 %v14872_v18 }
 0x564   : > { %6663 = vmatprep.subr.bf16.mxu0 %v14877_v63  ;;  %6745 = vmatprep.subr.bf16.mxu1 %v14880_v19 }
 0x567   : > { %6664 = vmatpush1.bf16.msra.mxu0 %v14875_v20  ;;  %6746 = vmatpush1.bf16.msra.mxu1 %v14878_v22 }
 0x568   : > { %6665 = vmatprep.subr.bf16.mxu0 %v14883_v23  ;;  %6747 = vmatprep.subr.bf16.mxu1 %v14886_v5 }
 0x56b   : > { %6666 = vmatpush1.bf16.msra.mxu0 %v14881_v24  ;;  %6748 = vmatpush1.bf16.msra.mxu1 %v14884_v25 }
 0x56c   : > { %6667 = vmatprep.subr.bf16.mxu0 %v14889_v27  ;;  %6749 = vmatprep.subr.bf16.mxu1 %v14892_v28 }
 0x56f   : > { %6668 = vmatpush1.bf16.msra.mxu0 %v14887_v29  ;;  %6750 = vmatpush1.bf16.msra.mxu1 %v14890_v30  ;;  %v14947_v29 = vld [vmem:[%s20336_s3 + $0x1200] ss:$16 sps:$4 sm:$0xff]   ;;  %v14950_v30 = vld [vmem:[%s20336_s3 + $0x1208] ss:$16 sps:$4 sm:$0xff]  }
 0x570   : > { %6669 = vmatprep.subr.bf16.mxu0 %v14895_v31  ;;  %6751 = vmatprep.subr.bf16.mxu1 %v14898_v32  ;;  %v14955_v32 = vld [vmem:[%s20336_s3 + $0x1224] ss:$16 sps:$4 sm:$0xff]  }
 0x573   : > { %6670 = vmatpush1.bf16.msra.mxu0 %v14893_v33  ;;  %6752 = vmatpush1.bf16.msra.mxu1 %v14896_v35  ;;  %v14958_v33 = vld [vmem:[%s20336_s3 + $0x122c] ss:$16 sps:$4 sm:$0xff]  }
 0x574   : > { %6671 = vmatprep.subr.bf16.mxu0 %v14901_v36  ;;  %6753 = vmatprep.subr.bf16.mxu1 %v14904_v37  ;;  %v14953_v36 = vld [vmem:[%s20336_s3 + $0x1220] ss:$16 sps:$4 sm:$0xff]   ;;  %v14956_v37 = vld [vmem:[%s20336_s3 + $0x1228] ss:$16 sps:$4 sm:$0xff]  }
 0x577   : > { %6672 = vmatpush1.bf16.msra.mxu0 %v14899_v38  ;;  %6754 = vmatpush1.bf16.msra.mxu1 %v14902_v40  ;;  %v14961_v38 = vld [vmem:[%s20336_s3 + $0x1244] ss:$16 sps:$4 sm:$0xff]   ;;  %v14964_v40 = vld [vmem:[%s20336_s3 + $0x124c] ss:$16 sps:$4 sm:$0xff]  }
 0x578   : > { %6673 = vmatprep.subr.bf16.mxu0 %v14907_v41  ;;  %6755 = vmatprep.subr.bf16.mxu1 %v14910_v42  ;;  %v14959_v41 = vld [vmem:[%s20336_s3 + $0x1240] ss:$16 sps:$4 sm:$0xff]   ;;  %v14962_v42 = vld [vmem:[%s20336_s3 + $0x1248] ss:$16 sps:$4 sm:$0xff]  }
 0x57b   : > { %6674 = vmatpush1.bf16.msra.mxu0 %v14905_v21  ;;  %6756 = vmatpush1.bf16.msra.mxu1 %v14908_v43  ;;  %v14967_v21 = vld [vmem:[%s20336_s3 + $0x1264] ss:$16 sps:$4 sm:$0xff]   ;;  %v14970_v43 = vld [vmem:[%s20336_s3 + $0x126c] ss:$16 sps:$4 sm:$0xff]  }
 0x57c   : > { %6675 = vmatprep.subr.bf16.mxu0 %v14913_v44  ;;  %6757 = vmatprep.subr.bf16.mxu1 %v14916_v51  ;;  %v14965_v44 = vld [vmem:[%s20336_s3 + $0x1260] ss:$16 sps:$4 sm:$0xff]   ;;  %v14968_v51 = vld [vmem:[%s20336_s3 + $0x1268] ss:$16 sps:$4 sm:$0xff]  }
 0x57f   : > { %6676 = vmatpush1.bf16.msra.mxu0 %v14911_v52  ;;  %6758 = vmatpush1.bf16.msra.mxu1 %v14914_v26  ;;  %v14973_v52 = vld [vmem:[%s20336_s3 + $0x1284] ss:$16 sps:$4 sm:$0xff]   ;;  %v14976_v26 = vld [vmem:[%s20336_s3 + $0x128c] ss:$16 sps:$4 sm:$0xff]  }
 0x580   : > { %6677 = vmatprep.subr.bf16.mxu0 %v14919_v53  ;;  %6759 = vmatprep.subr.bf16.mxu1 %v14922_v54  ;;  %v14971_v53 = vld [vmem:[%s20336_s3 + $0x1280] ss:$16 sps:$4 sm:$0xff]   ;;  %v14974_v54 = vld [vmem:[%s20336_s3 + $0x1288] ss:$16 sps:$4 sm:$0xff]  }
 0x583   : > { %6678 = vmatpush1.bf16.msra.mxu0 %v14917_v56  ;;  %6760 = vmatpush1.bf16.msra.mxu1 %v14920_v57  ;;  %v14979_v56 = vld [vmem:[%s20336_s3 + $0x12a4] ss:$16 sps:$4 sm:$0xff]   ;;  %v14982_v57 = vld [vmem:[%s20336_s3 + $0x12ac] ss:$16 sps:$4 sm:$0xff]  }
 0x584   : > { %6679 = vmatprep.subr.bf16.mxu0 %v14925_v58  ;;  %6761 = vmatprep.subr.bf16.mxu1 %v14928_v59  ;;  %v14977_v58 = vld [vmem:[%s20336_s3 + $0x12a0] ss:$16 sps:$4 sm:$0xff]   ;;  %v14980_v59 = vld [vmem:[%s20336_s3 + $0x12a8] ss:$16 sps:$4 sm:$0xff]  }
 0x587   : > { %6680 = vmatpush1.bf16.msra.mxu0 %v14923_v60  ;;  %6762 = vmatpush1.bf16.msra.mxu1 %v14926_v34  ;;  %v14985_v60 = vld [vmem:[%s20336_s3 + $0x12c4] ss:$16 sps:$4 sm:$0xff]   ;;  %v14988_v34 = vld [vmem:[%s20336_s3 + $0x12cc] ss:$16 sps:$4 sm:$0xff]  }
 0x588   : > { %6681 = vmatprep.subr.bf16.mxu0 %v14931_v61  ;;  %6763 = vmatprep.subr.bf16.mxu1 %v14934_v62  ;;  %v14983_v61 = vld [vmem:[%s20336_s3 + $0x12c0] ss:$16 sps:$4 sm:$0xff]   ;;  %v14986_v62 = vld [vmem:[%s20336_s3 + $0x12c8] ss:$16 sps:$4 sm:$0xff]  }
 0x58b   : > { %6682 = vmatpush1.bf16.msra.mxu0 %v14929_v0  ;;  %6764 = vmatpush1.bf16.msra.mxu1 %v14932_v1  ;;  %v14991_v0 = vld [vmem:[%s20336_s3 + $0x12e4] ss:$16 sps:$4 sm:$0xff]   ;;  %v14994_v1 = vld [vmem:[%s20336_s3 + $0x12ec] ss:$16 sps:$4 sm:$0xff]  }
 0x58c   : > { %6683 = vmatprep.subr.bf16.mxu0 %v14937_v39  ;;  %6765 = vmatprep.subr.bf16.mxu1 %v14940_v3  ;;  %v14989_v39 = vld [vmem:[%s20336_s3 + $0x12e0] ss:$16 sps:$4 sm:$0xff]   ;;  %v14992_v3 = vld [vmem:[%s20336_s3 + $0x12e8] ss:$16 sps:$4 sm:$0xff]  }
 0x58f   : > { %6684 = vmatpush1.bf16.msra.mxu0 %v14935_v4  ;;  %6766 = vmatpush1.bf16.msra.mxu1 %v14938_v6  ;;  %v14997_v4 = vld [vmem:[%s20336_s3 + $0x1304] ss:$16 sps:$4 sm:$0xff]   ;;  %v15000_v6 = vld [vmem:[%s20336_s3 + $0x130c] ss:$16 sps:$4 sm:$0xff]  }
 0x590   : > { %6685 = vmatprep.subr.bf16.mxu0 %v14943_v46  ;;  %6767 = vmatprep.subr.bf16.mxu1 %v14946_v7  ;;  %v14995_v46 = vld [vmem:[%s20336_s3 + $0x1300] ss:$16 sps:$4 sm:$0xff]   ;;  %v14998_v7 = vld [vmem:[%s20336_s3 + $0x1308] ss:$16 sps:$4 sm:$0xff]  }
 0x593   : > { %6686 = vmatpush1.bf16.msra.mxu0 %v14941_v8  ;;  %6768 = vmatpush1.bf16.msra.mxu1 %v14944_v9  ;;  %v15003_v8 = vld [vmem:[%s20336_s3 + $0x1324] ss:$16 sps:$4 sm:$0xff]   ;;  %v15006_v9 = vld [vmem:[%s20336_s3 + $0x132c] ss:$16 sps:$4 sm:$0xff]  }
 0x594   : > { %6696 = vmatprep.subr.bf16.mxu0 %v14949_v10  ;;  %6778 = vmatprep.subr.bf16.mxu1 %v14952_v48  ;;  %v15001_v10 = vld [vmem:[%s20336_s3 + $0x1320] ss:$16 sps:$4 sm:$0xff]   ;;  %v15004_v48 = vld [vmem:[%s20336_s3 + $0x1328] ss:$16 sps:$4 sm:$0xff]  }
 0x629   : > { %v5766_v55 = vpop.f32.mrb[16].mxu0  ;;  %v18428_v16 = vpop.f32.mrb[16].mxu1 }
 0x62a   : > { %v13610_v11 = vadd.f32 %v5766_v55, %v5034_v13  ;;  %v5768_v17 = vpop.f32.mrb[17].mxu0  ;;  %v5850_v18 = vpop.f32.mrb[17].mxu1  ;;  %v15009_v13 = vld [vmem:[%s20336_s3 + $0x1344] ss:$16 sps:$4 sm:$0xff]   ;;  %v15010_v55 = vld [vmem:[%s20336_s3 + $0x1348] ss:$16 sps:$4 sm:$0xff]  }
 0x62b   : > { %v13611_v63 = vadd.f32 %v5768_v17, %v5038_v14  ;;  %v13613_v19 = vadd.f32 %v5850_v18, %v5046_v15  ;;  %v5770_v20 = vpop.f32.mrb[18].mxu0  ;;  %v5852_v22 = vpop.f32.mrb[18].mxu1  ;;  %v15012_v14 = vld [vmem:[%s20336_s3 + $0x134c] ss:$16 sps:$4 sm:$0xff]   ;;  %v15007_v15 = vld [vmem:[%s20336_s3 + $0x1340] ss:$16 sps:$4 sm:$0xff]  }
 0x62c   : > { %v5855_v23 = vmax.f32 %v13610_v11, 0.0  ;;  %v5771_v5 = vpop.f32.mrb[19].mxu0  ;;  %v5853_v24 = vpop.f32.mrb[19].mxu1  ;;  %v15015_v11 = vld [vmem:[%s20336_s3 + $0x1364] ss:$16 sps:$4 sm:$0xff]  }
 0x62d   : > { %v5856_v25 = vmax.f32 %v13611_v63, 0.0  ;;  %v5858_v27 = vmax.f32 %v13613_v19, 0.0  ;;  %v15018_v17 = vld [vmem:[%s20336_s3 + $0x136c] ss:$16 sps:$4 sm:$0xff]   ;;  %v15013_v18 = vld [vmem:[%s20336_s3 + $0x1360] ss:$16 sps:$4 sm:$0xff]  }
 0x62e   : > { %v5859_v31 = vpack.c.bf16 %v5855_v23, %v5855_v23  ;;  %v15016_v63 = vld [vmem:[%s20336_s3 + $0x1368] ss:$16 sps:$4 sm:$0xff]   ;;  %v15021_v19 = vld [vmem:[%s20336_s3 + $0x1384] ss:$16 sps:$4 sm:$0xff]   ;;  %v15024_v20 = vld [vmem:[%s20336_s3 + $0x138c] ss:$16 sps:$4 sm:$0xff]  }
 0x62f   : > { %v5860_v28 = vpack.c.bf16 %v5856_v25, %v5856_v25  ;;  %v5862_v35 = vpack.c.bf16 %v5858_v27, %v5858_v27  ;;  %v15019_v22 = vld [vmem:[%s20336_s3 + $0x1380] ss:$16 sps:$4 sm:$0xff]   ;;  %v15022_v23 = vld [vmem:[%s20336_s3 + $0x1388] ss:$16 sps:$4 sm:$0xff]   ;;  %v15027_v5 = vld [vmem:[%s20336_s3 + $0x13a4] ss:$16 sps:$4 sm:$0xff]  }
 0x630   : > { %v15030_v24 = vld [vmem:[%s20336_s3 + $0x13ac] ss:$16 sps:$4 sm:$0xff]   ;;  %v15025_v25 = vld [vmem:[%s20336_s3 + $0x13a0] ss:$16 sps:$4 sm:$0xff]   ;;  %v15028_v27 = vld [vmem:[%s20336_s3 + $0x13a8] ss:$16 sps:$4 sm:$0xff]  }
 0x631   : > { %6687 = vmatprep.mubr.bf16.mxu0 %v5860_v28  ;;  %6769 = vmatprep.mubr.bf16.mxu1 %v5860_v28  ;;  %v5042_v28 = vrot.slane %v18420_v12, %v16984_v2  ;;  %v15034_v12 = vld [vmem:[%s20336_s3 + $0x13c8] ss:$16 sps:$4 sm:$0xff]  }
 0x632   : > { %6688 = vmatmul.mubr.bf16.vlgmr.msra.gmra.mrb[20].mxu0 %v5859_v31  ;;  %6770 = vmatmul.mubr.bf16.vlgmr.msra.gmra.mrb[20].mxu1 %v5859_v31  ;;  %v15031_v31 = vld [vmem:[%s20336_s3 + $0x13c0] ss:$16 sps:$4 sm:$0xff]  }
 0x633   : > { %6697 = vmatpush1.bf16.msra.mxu0 %v14947_v29  ;;  %6779 = vmatpush1.bf16.msra.mxu1 %v14950_v30  ;;  %v15033_v29 = vld [vmem:[%s20336_s3 + $0x13c4] ss:$16 sps:$4 sm:$0xff]   ;;  %v15036_v30 = vld [vmem:[%s20336_s3 + $0x13cc] ss:$16 sps:$4 sm:$0xff]  }
 0x634   : > { %6728 = vmatprep.mubr.bf16.mxu0 %v5862_v35  ;;  %6810 = vmatprep.mubr.bf16.mxu1 %v5862_v35  ;;  %v15042_v35 = vld [vmem:[%s20336_s3 + $0x13ec] ss:$16 sps:$4 sm:$0xff]  }
 0x635   : > { %6698 = vmatprep.subr.bf16.mxu0 %v14955_v32  ;;  %6780 = vmatprep.subr.bf16.mxu1 %v14958_v33  ;;  %v13612_v32 = vadd.f32 %v18428_v16, %v5042_v28  ;;  %v15039_v33 = vld [vmem:[%s20336_s3 + $0x13e4] ss:$16 sps:$4 sm:$0xff]   ;;  %v15040_v16 = vld [vmem:[%s20336_s3 + $0x13e8] ss:$16 sps:$4 sm:$0xff]  }
 0x636   : > { %v15112_v28 = vld [vmem:[%s20336_s3 + $0x1568] ss:$16 sps:$4 sm:$0xff]  }
 0x637   : > { %6699 = vmatpush1.bf16.msra.mxu0 %v14953_v36  ;;  %6781 = vmatpush1.bf16.msra.mxu1 %v14956_v37  ;;  %v15037_v36 = vld [vmem:[%s20336_s3 + $0x13e0] ss:$16 sps:$4 sm:$0xff]   ;;  %v5857_v37 = vmax.f32 %v13612_v32, 0.0  ;;  %v15123_v32 = vld [vmem:[%s20336_s3 + $0x15a4] ss:$16 sps:$4 sm:$0xff]  }
 0x638   : > { %6700 = vmatprep.subr.bf16.mxu0 %v14961_v38  ;;  %6782 = vmatprep.subr.bf16.mxu1 %v14964_v40  ;;  %v15045_v38 = vld [vmem:[%s20336_s3 + $0x1404] ss:$16 sps:$4 sm:$0xff]   ;;  %v15048_v40 = vld [vmem:[%s20336_s3 + $0x140c] ss:$16 sps:$4 sm:$0xff]  }
 0x63b   : > { %6701 = vmatpush1.bf16.msra.mxu0 %v14959_v41  ;;  %6783 = vmatpush1.bf16.msra.mxu1 %v14962_v42  ;;  %v15043_v41 = vld [vmem:[%s20336_s3 + $0x1400] ss:$16 sps:$4 sm:$0xff]   ;;  %v15046_v42 = vld [vmem:[%s20336_s3 + $0x1408] ss:$16 sps:$4 sm:$0xff]  }
 0x63c   : > { %6702 = vmatprep.subr.bf16.mxu0 %v14967_v21  ;;  %6784 = vmatprep.subr.bf16.mxu1 %v14970_v43  ;;  %v5861_v21 = vpack.c.bf16 %v5857_v37, %v5857_v37  ;;  %v15051_v43 = vld [vmem:[%s20336_s3 + $0x1424] ss:$16 sps:$4 sm:$0xff]   ;;  %v15132_v37 = vld [vmem:[%s20336_s3 + $0x15cc] ss:$16 sps:$4 sm:$0xff]  }
 0x63f   : > { %6703 = vmatpush1.bf16.msra.mxu0 %v14965_v44  ;;  %6785 = vmatpush1.bf16.msra.mxu1 %v14968_v51  ;;  %v15054_v44 = vld [vmem:[%s20336_s3 + $0x142c] ss:$16 sps:$4 sm:$0xff]   ;;  %v15049_v51 = vld [vmem:[%s20336_s3 + $0x1420] ss:$16 sps:$4 sm:$0xff]  }
 0x640   : > { %6704 = vmatprep.subr.bf16.mxu0 %v14973_v52  ;;  %6786 = vmatprep.subr.bf16.mxu1 %v14976_v26  ;;  %v15052_v52 = vld [vmem:[%s20336_s3 + $0x1428] ss:$16 sps:$4 sm:$0xff]   ;;  %v15057_v26 = vld [vmem:[%s20336_s3 + $0x1444] ss:$16 sps:$4 sm:$0xff]  }
 0x643   : > { %6705 = vmatpush1.bf16.msra.mxu0 %v14971_v53  ;;  %6787 = vmatpush1.bf16.msra.mxu1 %v14974_v54  ;;  %v15060_v53 = vld [vmem:[%s20336_s3 + $0x144c] ss:$16 sps:$4 sm:$0xff]   ;;  %v15055_v54 = vld [vmem:[%s20336_s3 + $0x1440] ss:$16 sps:$4 sm:$0xff]  }
 0x644   : > { %6706 = vmatprep.subr.bf16.mxu0 %v14979_v56  ;;  %6788 = vmatprep.subr.bf16.mxu1 %v14982_v57  ;;  %v15058_v56 = vld [vmem:[%s20336_s3 + $0x1448] ss:$16 sps:$4 sm:$0xff]   ;;  %v15063_v57 = vld [vmem:[%s20336_s3 + $0x1464] ss:$16 sps:$4 sm:$0xff]  }
 0x647   : > { %6707 = vmatpush1.bf16.msra.mxu0 %v14977_v58  ;;  %6789 = vmatpush1.bf16.msra.mxu1 %v14980_v59  ;;  %v15066_v58 = vld [vmem:[%s20336_s3 + $0x146c] ss:$16 sps:$4 sm:$0xff]   ;;  %v15061_v59 = vld [vmem:[%s20336_s3 + $0x1460] ss:$16 sps:$4 sm:$0xff]  }
 0x648   : > { %6708 = vmatprep.subr.bf16.mxu0 %v14985_v60  ;;  %6790 = vmatprep.subr.bf16.mxu1 %v14988_v34  ;;  %v15064_v60 = vld [vmem:[%s20336_s3 + $0x1468] ss:$16 sps:$4 sm:$0xff]   ;;  %v15069_v34 = vld [vmem:[%s20336_s3 + $0x1484] ss:$16 sps:$4 sm:$0xff]  }
 0x64b   : > { %6709 = vmatpush1.bf16.msra.mxu0 %v14983_v61  ;;  %6791 = vmatpush1.bf16.msra.mxu1 %v14986_v62  ;;  %v15072_v61 = vld [vmem:[%s20336_s3 + $0x148c] ss:$16 sps:$4 sm:$0xff]   ;;  %v15067_v62 = vld [vmem:[%s20336_s3 + $0x1480] ss:$16 sps:$4 sm:$0xff]  }
 0x64c   : > { %6710 = vmatprep.subr.bf16.mxu0 %v14991_v0  ;;  %6792 = vmatprep.subr.bf16.mxu1 %v14994_v1  ;;  %v15070_v0 = vld [vmem:[%s20336_s3 + $0x1488] ss:$16 sps:$4 sm:$0xff]   ;;  %v15075_v1 = vld [vmem:[%s20336_s3 + $0x14a4] ss:$16 sps:$4 sm:$0xff]  }
 0x64f   : > { %6711 = vmatpush1.bf16.msra.mxu0 %v14989_v39  ;;  %6793 = vmatpush1.bf16.msra.mxu1 %v14992_v3  ;;  %v15078_v39 = vld [vmem:[%s20336_s3 + $0x14ac] ss:$16 sps:$4 sm:$0xff]   ;;  %v15073_v3 = vld [vmem:[%s20336_s3 + $0x14a0] ss:$16 sps:$4 sm:$0xff]  }
 0x650   : > { %6712 = vmatprep.subr.bf16.mxu0 %v14997_v4  ;;  %6794 = vmatprep.subr.bf16.mxu1 %v15000_v6  ;;  %v15076_v4 = vld [vmem:[%s20336_s3 + $0x14a8] ss:$16 sps:$4 sm:$0xff]   ;;  %v15081_v6 = vld [vmem:[%s20336_s3 + $0x14c4] ss:$16 sps:$4 sm:$0xff]  }
 0x653   : > { %6713 = vmatpush1.bf16.msra.mxu0 %v14995_v46  ;;  %6795 = vmatpush1.bf16.msra.mxu1 %v14998_v7  ;;  %v15084_v46 = vld [vmem:[%s20336_s3 + $0x14cc] ss:$16 sps:$4 sm:$0xff]   ;;  %v15079_v7 = vld [vmem:[%s20336_s3 + $0x14c0] ss:$16 sps:$4 sm:$0xff]  }
 0x654   : > { %6714 = vmatprep.subr.bf16.mxu0 %v15003_v8  ;;  %6796 = vmatprep.subr.bf16.mxu1 %v15006_v9  ;;  %v15082_v8 = vld [vmem:[%s20336_s3 + $0x14c8] ss:$16 sps:$4 sm:$0xff]   ;;  %v15087_v9 = vld [vmem:[%s20336_s3 + $0x14e4] ss:$16 sps:$4 sm:$0xff]  }
 0x657   : > { %6715 = vmatpush1.bf16.msra.mxu0 %v15001_v10  ;;  %6797 = vmatpush1.bf16.msra.mxu1 %v15004_v48  ;;  %v15090_v10 = vld [vmem:[%s20336_s3 + $0x14ec] ss:$16 sps:$4 sm:$0xff]   ;;  %v15085_v48 = vld [vmem:[%s20336_s3 + $0x14e0] ss:$16 sps:$4 sm:$0xff]  }
 0x658   : > { %6716 = vmatprep.subr.bf16.mxu0 %v15009_v13  ;;  %6798 = vmatprep.subr.bf16.mxu1 %v15012_v14  ;;  %v15088_v13 = vld [vmem:[%s20336_s3 + $0x14e8] ss:$16 sps:$4 sm:$0xff]   ;;  %v15093_v14 = vld [vmem:[%s20336_s3 + $0x1504] ss:$16 sps:$4 sm:$0xff]  }
 0x65b   : > { %6717 = vmatpush1.bf16.msra.mxu0 %v15007_v15  ;;  %6799 = vmatpush1.bf16.msra.mxu1 %v15010_v55  ;;  %v15096_v15 = vld [vmem:[%s20336_s3 + $0x150c] ss:$16 sps:$4 sm:$0xff]   ;;  %v15091_v55 = vld [vmem:[%s20336_s3 + $0x1500] ss:$16 sps:$4 sm:$0xff]  }
 0x65c   : > { %6718 = vmatprep.subr.bf16.mxu0 %v15015_v11  ;;  %6800 = vmatprep.subr.bf16.mxu1 %v15018_v17  ;;  %v15094_v11 = vld [vmem:[%s20336_s3 + $0x1508] ss:$16 sps:$4 sm:$0xff]   ;;  %v15099_v17 = vld [vmem:[%s20336_s3 + $0x1524] ss:$16 sps:$4 sm:$0xff]  }
 0x65f   : > { %6719 = vmatpush1.bf16.msra.mxu0 %v15013_v18  ;;  %6801 = vmatpush1.bf16.msra.mxu1 %v15016_v63  ;;  %v15102_v18 = vld [vmem:[%s20336_s3 + $0x152c] ss:$16 sps:$4 sm:$0xff]   ;;  %v15097_v63 = vld [vmem:[%s20336_s3 + $0x1520] ss:$16 sps:$4 sm:$0xff]  }
 0x660   : > { %6720 = vmatprep.subr.bf16.mxu0 %v15021_v19  ;;  %6802 = vmatprep.subr.bf16.mxu1 %v15024_v20  ;;  %v15100_v19 = vld [vmem:[%s20336_s3 + $0x1528] ss:$16 sps:$4 sm:$0xff]   ;;  %v15105_v20 = vld [vmem:[%s20336_s3 + $0x1544] ss:$16 sps:$4 sm:$0xff]  }
 0x663   : > { %6721 = vmatpush1.bf16.msra.mxu0 %v15019_v22  ;;  %6803 = vmatpush1.bf16.msra.mxu1 %v15022_v23  ;;  %v15108_v22 = vld [vmem:[%s20336_s3 + $0x154c] ss:$16 sps:$4 sm:$0xff]   ;;  %v15103_v23 = vld [vmem:[%s20336_s3 + $0x1540] ss:$16 sps:$4 sm:$0xff]  }
 0x664   : > { %6722 = vmatprep.subr.bf16.mxu0 %v15027_v5  ;;  %6804 = vmatprep.subr.bf16.mxu1 %v15030_v24  ;;  %v15106_v5 = vld [vmem:[%s20336_s3 + $0x1548] ss:$16 sps:$4 sm:$0xff]   ;;  %v15111_v24 = vld [vmem:[%s20336_s3 + $0x1564] ss:$16 sps:$4 sm:$0xff]  }
 0x667   : > { %6723 = vmatpush1.bf16.msra.mxu0 %v15025_v25  ;;  %6805 = vmatpush1.bf16.msra.mxu1 %v15028_v27  ;;  %v15114_v25 = vld [vmem:[%s20336_s3 + $0x156c] ss:$16 sps:$4 sm:$0xff]   ;;  %v15109_v27 = vld [vmem:[%s20336_s3 + $0x1560] ss:$16 sps:$4 sm:$0xff]  }
 0x668   : > { %6724 = vmatprep.subr.bf16.mxu0 %v15033_v29  ;;  %6806 = vmatprep.subr.bf16.mxu1 %v15036_v30  ;;  %v15117_v29 = vld [vmem:[%s20336_s3 + $0x1584] ss:$16 sps:$4 sm:$0xff]   ;;  %v15120_v30 = vld [vmem:[%s20336_s3 + $0x158c] ss:$16 sps:$4 sm:$0xff]  }
 0x66b   : > { %6725 = vmatpush1.bf16.msra.mxu0 %v15031_v31  ;;  %6807 = vmatpush1.bf16.msra.mxu1 %v15034_v12  ;;  %v15115_v31 = vld [vmem:[%s20336_s3 + $0x1580] ss:$16 sps:$4 sm:$0xff]   ;;  %v15118_v12 = vld [vmem:[%s20336_s3 + $0x1588] ss:$16 sps:$4 sm:$0xff]  }
 0x66c   : > { %6726 = vmatprep.subr.bf16.mxu0 %v15039_v33  ;;  %6808 = vmatprep.subr.bf16.mxu1 %v15042_v35  ;;  %v15126_v33 = vld [vmem:[%s20336_s3 + $0x15ac] ss:$16 sps:$4 sm:$0xff]   ;;  %v15121_v35 = vld [vmem:[%s20336_s3 + $0x15a0] ss:$16 sps:$4 sm:$0xff]  }
 0x66f   : > { %6727 = vmatpush1.bf16.msra.mxu0 %v15037_v36  ;;  %6809 = vmatpush1.bf16.msra.mxu1 %v15040_v16  ;;  %v15124_v36 = vld [vmem:[%s20336_s3 + $0x15a8] ss:$16 sps:$4 sm:$0xff]   ;;  %v15129_v16 = vld [vmem:[%s20336_s3 + $0x15c4] ss:$16 sps:$4 sm:$0xff]  }
 0x670   : > { %7619 = vmatprep.subr.bf16.mxu0 %v15045_v38  ;;  %7701 = vmatprep.subr.bf16.mxu1 %v15048_v40  ;;  %v15127_v38 = vld [vmem:[%s20336_s3 + $0x15c0] ss:$16 sps:$4 sm:$0xff]   ;;  %v15130_v40 = vld [vmem:[%s20336_s3 + $0x15c8] ss:$16 sps:$4 sm:$0xff]  }
 0x672   : > { %6729 = vmatmul.mubr.bf16.vlgmr.msra.gmra.mrb[20].mxu0 %v5861_v21  ;;  %6811 = vmatmul.mubr.bf16.vlgmr.msra.gmra.mrb[20].mxu1 %v5861_v21  ;;  %v15133_v21 = vld [vmem:[%s20336_s3 + $0x15e0] ss:$16 sps:$4 sm:$0xff]  }
 0x673   : > { %7620 = vmatpush1.bf16.msra.mxu0 %v15043_v41  ;;  %7702 = vmatpush1.bf16.msra.mxu1 %v15046_v42  ;;  %v15135_v41 = vld [vmem:[%s20336_s3 + $0x15e4] ss:$16 sps:$4 sm:$0xff]   ;;  %v15138_v42 = vld [vmem:[%s20336_s3 + $0x15ec] ss:$16 sps:$4 sm:$0xff]  }
 0x674   : > { %7621 = vmatprep.subr.bf16.mxu0 %v15051_v43  ;;  %7703 = vmatprep.subr.bf16.mxu1 %v15054_v44  ;;  %v15136_v43 = vld [vmem:[%s20336_s3 + $0x15e8] ss:$16 sps:$4 sm:$0xff]   ;;  %v15141_v44 = vld [vmem:[%s20336_s3 + $0x1604] ss:$16 sps:$4 sm:$0xff]  }
 0x677   : > { %7622 = vmatpush1.bf16.msra.mxu0 %v15049_v51  ;;  %7704 = vmatpush1.bf16.msra.mxu1 %v15052_v52  ;;  %v15144_v51 = vld [vmem:[%s20336_s3 + $0x160c] ss:$16 sps:$4 sm:$0xff]   ;;  %v18820_v52 = vld [vmem:[%s20337_s4 + $0x10] sm:$0xf] }
 0x678   : > { %7623 = vmatprep.subr.bf16.mxu0 %v15057_v26  ;;  %7705 = vmatprep.subr.bf16.mxu1 %v15060_v53  ;;  %v5998_v26 = vrot.slane %v18820_v52, %v16806_v47  ;;  %v6002_v53 = vrot.slane %v18820_v52, %v16814_v49 }
 0x67b   : > { %7624 = vmatpush1.bf16.msra.mxu0 %v15055_v54  ;;  %7706 = vmatpush1.bf16.msra.mxu1 %v15058_v56  ;;  %v6010_v54 = vrot.slane %v18820_v52, %v16817_v50 }
 0x67c   : > { %7625 = vmatprep.subr.bf16.mxu0 %v15063_v57  ;;  %7707 = vmatprep.subr.bf16.mxu1 %v15066_v58 }
 0x67f   : > { %7626 = vmatpush1.bf16.msra.mxu0 %v15061_v59  ;;  %7708 = vmatpush1.bf16.msra.mxu1 %v15064_v60 }
 0x680   : > { %7627 = vmatprep.subr.bf16.mxu0 %v15069_v34  ;;  %7709 = vmatprep.subr.bf16.mxu1 %v15072_v61 }
 0x683   : > { %7628 = vmatpush1.bf16.msra.mxu0 %v15067_v62  ;;  %7710 = vmatpush1.bf16.msra.mxu1 %v15070_v0 }
 0x684   : > { %7629 = vmatprep.subr.bf16.mxu0 %v15075_v1  ;;  %7711 = vmatprep.subr.bf16.mxu1 %v15078_v39 }
 0x687   : > { %7630 = vmatpush1.bf16.msra.mxu0 %v15073_v3  ;;  %7712 = vmatpush1.bf16.msra.mxu1 %v15076_v4 }
 0x688   : > { %7631 = vmatprep.subr.bf16.mxu0 %v15081_v6  ;;  %7713 = vmatprep.subr.bf16.mxu1 %v15084_v46 }
 0x68b   : > { %7632 = vmatpush1.bf16.msra.mxu0 %v15079_v7  ;;  %7714 = vmatpush1.bf16.msra.mxu1 %v15082_v8  ;;  %v15139_v7 = vld [vmem:[%s20336_s3 + $0x1600] ss:$16 sps:$4 sm:$0xff]   ;;  %v15142_v8 = vld [vmem:[%s20336_s3 + $0x1608] ss:$16 sps:$4 sm:$0xff]  }
 0x68c   : > { %7633 = vmatprep.subr.bf16.mxu0 %v15087_v9  ;;  %7715 = vmatprep.subr.bf16.mxu1 %v15090_v10  ;;  %v15147_v10 = vld [vmem:[%s20336_s3 + $0x1624] ss:$16 sps:$4 sm:$0xff]  }
 0x68f   : > { %7634 = vmatpush1.bf16.msra.mxu0 %v15085_v48  ;;  %7716 = vmatpush1.bf16.msra.mxu1 %v15088_v13  ;;  %v15150_v48 = vld [vmem:[%s20336_s3 + $0x162c] ss:$16 sps:$4 sm:$0xff]  }
 0x690   : > { %7635 = vmatprep.subr.bf16.mxu0 %v15093_v14  ;;  %7717 = vmatprep.subr.bf16.mxu1 %v15096_v15  ;;  %v15145_v14 = vld [vmem:[%s20336_s3 + $0x1620] ss:$16 sps:$4 sm:$0xff]   ;;  %v15148_v15 = vld [vmem:[%s20336_s3 + $0x1628] ss:$16 sps:$4 sm:$0xff]  }
 0x693   : > { %7636 = vmatpush1.bf16.msra.mxu0 %v15091_v55  ;;  %7718 = vmatpush1.bf16.msra.mxu1 %v15094_v11  ;;  %v15153_v55 = vld [vmem:[%s20336_s3 + $0x1644] ss:$16 sps:$4 sm:$0xff]   ;;  %v15156_v11 = vld [vmem:[%s20336_s3 + $0x164c] ss:$16 sps:$4 sm:$0xff]  }
 0x694   : > { %7637 = vmatprep.subr.bf16.mxu0 %v15099_v17  ;;  %7719 = vmatprep.subr.bf16.mxu1 %v15102_v18  ;;  %v15151_v17 = vld [vmem:[%s20336_s3 + $0x1640] ss:$16 sps:$4 sm:$0xff]   ;;  %v15154_v18 = vld [vmem:[%s20336_s3 + $0x1648] ss:$16 sps:$4 sm:$0xff]  }
 0x697   : > { %7638 = vmatpush1.bf16.msra.mxu0 %v15097_v63  ;;  %7720 = vmatpush1.bf16.msra.mxu1 %v15100_v19  ;;  %v15159_v63 = vld [vmem:[%s20336_s3 + $0x1664] ss:$16 sps:$4 sm:$0xff]   ;;  %v15162_v19 = vld [vmem:[%s20336_s3 + $0x166c] ss:$16 sps:$4 sm:$0xff]  }
 0x698   : > { %7639 = vmatprep.subr.bf16.mxu0 %v15105_v20  ;;  %7721 = vmatprep.subr.bf16.mxu1 %v15108_v22  ;;  %v15157_v20 = vld [vmem:[%s20336_s3 + $0x1660] ss:$16 sps:$4 sm:$0xff]   ;;  %v15160_v22 = vld [vmem:[%s20336_s3 + $0x1668] ss:$16 sps:$4 sm:$0xff]  }
 0x69b   : > { %7640 = vmatpush1.bf16.msra.mxu0 %v15103_v23  ;;  %7722 = vmatpush1.bf16.msra.mxu1 %v15106_v5  ;;  %v15165_v23 = vld [vmem:[%s20336_s3 + $0x1684] ss:$16 sps:$4 sm:$0xff]   ;;  %v15168_v5 = vld [vmem:[%s20336_s3 + $0x168c] ss:$16 sps:$4 sm:$0xff]  }
 0x69c   : > { %7641 = vmatprep.subr.bf16.mxu0 %v15111_v24  ;;  %7723 = vmatprep.subr.bf16.mxu1 %v15114_v25  ;;  %v15163_v24 = vld [vmem:[%s20336_s3 + $0x1680] ss:$16 sps:$4 sm:$0xff]   ;;  %v15166_v25 = vld [vmem:[%s20336_s3 + $0x1688] ss:$16 sps:$4 sm:$0xff]  }
 0x69f   : > { %7642 = vmatpush1.bf16.msra.mxu0 %v15109_v27  ;;  %7724 = vmatpush1.bf16.msra.mxu1 %v15112_v28  ;;  %v15171_v27 = vld [vmem:[%s20336_s3 + $0x16a4] ss:$16 sps:$4 sm:$0xff]   ;;  %v15174_v28 = vld [vmem:[%s20336_s3 + $0x16ac] ss:$16 sps:$4 sm:$0xff]  }
 0x6a0   : > { %7643 = vmatprep.subr.bf16.mxu0 %v15117_v29  ;;  %7725 = vmatprep.subr.bf16.mxu1 %v15120_v30  ;;  %v15169_v29 = vld [vmem:[%s20336_s3 + $0x16a0] ss:$16 sps:$4 sm:$0xff]   ;;  %v15172_v30 = vld [vmem:[%s20336_s3 + $0x16a8] ss:$16 sps:$4 sm:$0xff]  }
 0x6a3   : > { %7644 = vmatpush1.bf16.msra.mxu0 %v15115_v31  ;;  %7726 = vmatpush1.bf16.msra.mxu1 %v15118_v12  ;;  %v15177_v31 = vld [vmem:[%s20336_s3 + $0x16c4] ss:$16 sps:$4 sm:$0xff]   ;;  %v15180_v12 = vld [vmem:[%s20336_s3 + $0x16cc] ss:$16 sps:$4 sm:$0xff]  }
 0x6a4   : > { %7645 = vmatprep.subr.bf16.mxu0 %v15123_v32  ;;  %7727 = vmatprep.subr.bf16.mxu1 %v15126_v33  ;;  %v15175_v32 = vld [vmem:[%s20336_s3 + $0x16c0] ss:$16 sps:$4 sm:$0xff]   ;;  %v15178_v33 = vld [vmem:[%s20336_s3 + $0x16c8] ss:$16 sps:$4 sm:$0xff]  }
 0x6a7   : > { %7646 = vmatpush1.bf16.msra.mxu0 %v15121_v35  ;;  %7728 = vmatpush1.bf16.msra.mxu1 %v15124_v36  ;;  %v15183_v35 = vld [vmem:[%s20336_s3 + $0x16e4] ss:$16 sps:$4 sm:$0xff]   ;;  %v15186_v36 = vld [vmem:[%s20336_s3 + $0x16ec] ss:$16 sps:$4 sm:$0xff]  }
 0x6a8   : > { %7647 = vmatprep.subr.bf16.mxu0 %v15129_v16  ;;  %7729 = vmatprep.subr.bf16.mxu1 %v15132_v37  ;;  %v15181_v16 = vld [vmem:[%s20336_s3 + $0x16e0] ss:$16 sps:$4 sm:$0xff]   ;;  %v15184_v37 = vld [vmem:[%s20336_s3 + $0x16e8] ss:$16 sps:$4 sm:$0xff]  }
 0x6ab   : > { %7648 = vmatpush1.bf16.msra.mxu0 %v15127_v38  ;;  %7730 = vmatpush1.bf16.msra.mxu1 %v15130_v40  ;;  %v15189_v38 = vld [vmem:[%s20336_s3 + $0x1704] ss:$16 sps:$4 sm:$0xff]   ;;  %v15192_v40 = vld [vmem:[%s20336_s3 + $0x170c] ss:$16 sps:$4 sm:$0xff]  }
 0x6ac   : > { %7649 = vmatprep.subr.bf16.mxu0 %v15135_v41  ;;  %7731 = vmatprep.subr.bf16.mxu1 %v15138_v42  ;;  %v15187_v41 = vld [vmem:[%s20336_s3 + $0x1700] ss:$16 sps:$4 sm:$0xff]   ;;  %v15190_v42 = vld [vmem:[%s20336_s3 + $0x1708] ss:$16 sps:$4 sm:$0xff]  }
 0x6af   : > { %7650 = vmatpush1.bf16.msra.mxu0 %v15133_v21  ;;  %7732 = vmatpush1.bf16.msra.mxu1 %v15136_v43  ;;  %v15195_v21 = vld [vmem:[%s20336_s3 + $0x1724] ss:$16 sps:$4 sm:$0xff]   ;;  %v15198_v43 = vld [vmem:[%s20336_s3 + $0x172c] ss:$16 sps:$4 sm:$0xff]  }
 0x6b0   : > { %7660 = vmatprep.subr.bf16.mxu0 %v15141_v44  ;;  %7742 = vmatprep.subr.bf16.mxu1 %v15144_v51  ;;  %v15193_v44 = vld [vmem:[%s20336_s3 + $0x1720] ss:$16 sps:$4 sm:$0xff]   ;;  %v15196_v51 = vld [vmem:[%s20336_s3 + $0x1728] ss:$16 sps:$4 sm:$0xff]  }
 0x745   : > { %v6730_v56 = vpop.f32.mrb[20].mxu0  ;;  %v18828_v57 = vpop.f32.mrb[20].mxu1 }
 0x746   : > { %v13614_v58 = vadd.f32 %v6730_v56, %v5998_v26  ;;  %v6732_v59 = vpop.f32.mrb[21].mxu0  ;;  %v6814_v60 = vpop.f32.mrb[21].mxu1  ;;  %v15201_v26 = vld [vmem:[%s20336_s3 + $0x1744] ss:$16 sps:$4 sm:$0xff]   ;;  %v15202_v56 = vld [vmem:[%s20336_s3 + $0x1748] ss:$16 sps:$4 sm:$0xff]  }
 0x747   : > { %v13615_v34 = vadd.f32 %v6732_v59, %v6002_v53  ;;  %v13617_v61 = vadd.f32 %v6814_v60, %v6010_v54  ;;  %v6734_v62 = vpop.f32.mrb[22].mxu0  ;;  %v6816_v0 = vpop.f32.mrb[22].mxu1  ;;  %v15204_v53 = vld [vmem:[%s20336_s3 + $0x174c] ss:$16 sps:$4 sm:$0xff]   ;;  %v15199_v54 = vld [vmem:[%s20336_s3 + $0x1740] ss:$16 sps:$4 sm:$0xff]  }
 0x748   : > { %v6819_v1 = vmax.f32 %v13614_v58, 0.0  ;;  %v6735_v39 = vpop.f32.mrb[23].mxu0  ;;  %v6817_v3 = vpop.f32.mrb[23].mxu1  ;;  %v15207_v58 = vld [vmem:[%s20336_s3 + $0x1764] ss:$16 sps:$4 sm:$0xff]  }
 0x749   : > { %v6820_v4 = vmax.f32 %v13615_v34, 0.0  ;;  %v6822_v6 = vmax.f32 %v13617_v61, 0.0  ;;  %v15210_v59 = vld [vmem:[%s20336_s3 + $0x176c] ss:$16 sps:$4 sm:$0xff]   ;;  %v15205_v60 = vld [vmem:[%s20336_s3 + $0x1760] ss:$16 sps:$4 sm:$0xff]  }
 0x74a   : > { %v6823_v9 = vpack.c.bf16 %v6819_v1, %v6819_v1  ;;  %v15208_v34 = vld [vmem:[%s20336_s3 + $0x1768] ss:$16 sps:$4 sm:$0xff]   ;;  %v15213_v61 = vld [vmem:[%s20336_s3 + $0x1784] ss:$16 sps:$4 sm:$0xff]   ;;  %v15216_v62 = vld [vmem:[%s20336_s3 + $0x178c] ss:$16 sps:$4 sm:$0xff]  }
 0x74b   : > { %v6824_v46 = vpack.c.bf16 %v6820_v4, %v6820_v4  ;;  %v6826_v13 = vpack.c.bf16 %v6822_v6, %v6822_v6  ;;  %v15211_v0 = vld [vmem:[%s20336_s3 + $0x1780] ss:$16 sps:$4 sm:$0xff]   ;;  %v15214_v1 = vld [vmem:[%s20336_s3 + $0x1788] ss:$16 sps:$4 sm:$0xff]   ;;  %v15219_v39 = vld [vmem:[%s20336_s3 + $0x17a4] ss:$16 sps:$4 sm:$0xff]  }
 0x74c   : > { %v15222_v3 = vld [vmem:[%s20336_s3 + $0x17ac] ss:$16 sps:$4 sm:$0xff]   ;;  %v15217_v4 = vld [vmem:[%s20336_s3 + $0x17a0] ss:$16 sps:$4 sm:$0xff]   ;;  %v15220_v6 = vld [vmem:[%s20336_s3 + $0x17a8] ss:$16 sps:$4 sm:$0xff]  }
 0x74d   : > { %7651 = vmatprep.mubr.bf16.mxu0 %v6824_v46  ;;  %7733 = vmatprep.mubr.bf16.mxu1 %v6824_v46  ;;  %v6006_v46 = vrot.slane %v18820_v52, %v16984_v2  ;;  %v15226_v52 = vld [vmem:[%s20336_s3 + $0x17c8] ss:$16 sps:$4 sm:$0xff]  }
 0x74e   : > { %7652 = vmatmul.mubr.bf16.vlgmr.msra.gmra.mrb[24].mxu0 %v6823_v9  ;;  %7734 = vmatmul.mubr.bf16.vlgmr.msra.gmra.mrb[24].mxu1 %v6823_v9  ;;  %v15223_v9 = vld [vmem:[%s20336_s3 + $0x17c0] ss:$16 sps:$4 sm:$0xff]  }
 0x74f   : > { %7661 = vmatpush1.bf16.msra.mxu0 %v15139_v7  ;;  %7743 = vmatpush1.bf16.msra.mxu1 %v15142_v8  ;;  %v15225_v7 = vld [vmem:[%s20336_s3 + $0x17c4] ss:$16 sps:$4 sm:$0xff]   ;;  %v15228_v8 = vld [vmem:[%s20336_s3 + $0x17cc] ss:$16 sps:$4 sm:$0xff]  }
 0x750   : > { %7692 = vmatprep.mubr.bf16.mxu0 %v6826_v13  ;;  %7774 = vmatprep.mubr.bf16.mxu1 %v6826_v13  ;;  %v15234_v13 = vld [vmem:[%s20336_s3 + $0x17ec] ss:$16 sps:$4 sm:$0xff]  }
 0x751   : > { %7662 = vmatprep.subr.bf16.mxu0 %v15147_v10  ;;  %7744 = vmatprep.subr.bf16.mxu1 %v15150_v48  ;;  %v13616_v10 = vadd.f32 %v18828_v57, %v6006_v46  ;;  %v15231_v48 = vld [vmem:[%s20336_s3 + $0x17e4] ss:$16 sps:$4 sm:$0xff]   ;;  %v15232_v57 = vld [vmem:[%s20336_s3 + $0x17e8] ss:$16 sps:$4 sm:$0xff]  }
 0x752   : > { %v15304_v46 = vld [vmem:[%s20336_s3 + $0x1968] ss:$16 sps:$4 sm:$0xff]  }
 0x753   : > { %7663 = vmatpush1.bf16.msra.mxu0 %v15145_v14  ;;  %7745 = vmatpush1.bf16.msra.mxu1 %v15148_v15  ;;  %v15229_v14 = vld [vmem:[%s20336_s3 + $0x17e0] ss:$16 sps:$4 sm:$0xff]   ;;  %v6821_v15 = vmax.f32 %v13616_v10, 0.0  ;;  %v15315_v10 = vld [vmem:[%s20336_s3 + $0x19a4] ss:$16 sps:$4 sm:$0xff]  }
 0x754   : > { %7664 = vmatprep.subr.bf16.mxu0 %v15153_v55  ;;  %7746 = vmatprep.subr.bf16.mxu1 %v15156_v11  ;;  %v15237_v55 = vld [vmem:[%s20336_s3 + $0x1804] ss:$16 sps:$4 sm:$0xff]   ;;  %v15240_v11 = vld [vmem:[%s20336_s3 + $0x180c] ss:$16 sps:$4 sm:$0xff]  }
 0x757   : > { %7665 = vmatpush1.bf16.msra.mxu0 %v15151_v17  ;;  %7747 = vmatpush1.bf16.msra.mxu1 %v15154_v18  ;;  %v15235_v17 = vld [vmem:[%s20336_s3 + $0x1800] ss:$16 sps:$4 sm:$0xff]   ;;  %v15238_v18 = vld [vmem:[%s20336_s3 + $0x1808] ss:$16 sps:$4 sm:$0xff]  }
 0x758   : > { %7666 = vmatprep.subr.bf16.mxu0 %v15159_v63  ;;  %7748 = vmatprep.subr.bf16.mxu1 %v15162_v19  ;;  %v6825_v63 = vpack.c.bf16 %v6821_v15, %v6821_v15  ;;  %v15243_v19 = vld [vmem:[%s20336_s3 + $0x1824] ss:$16 sps:$4 sm:$0xff]   ;;  %v15324_v15 = vld [vmem:[%s20336_s3 + $0x19cc] ss:$16 sps:$4 sm:$0xff]  }
 0x75b   : > { %7667 = vmatpush1.bf16.msra.mxu0 %v15157_v20  ;;  %7749 = vmatpush1.bf16.msra.mxu1 %v15160_v22  ;;  %v15246_v20 = vld [vmem:[%s20336_s3 + $0x182c] ss:$16 sps:$4 sm:$0xff]   ;;  %v15241_v22 = vld [vmem:[%s20336_s3 + $0x1820] ss:$16 sps:$4 sm:$0xff]  }
 0x75c   : > { %7668 = vmatprep.subr.bf16.mxu0 %v15165_v23  ;;  %7750 = vmatprep.subr.bf16.mxu1 %v15168_v5  ;;  %v15244_v23 = vld [vmem:[%s20336_s3 + $0x1828] ss:$16 sps:$4 sm:$0xff]   ;;  %v15249_v5 = vld [vmem:[%s20336_s3 + $0x1844] ss:$16 sps:$4 sm:$0xff]  }
 0x75f   : > { %7669 = vmatpush1.bf16.msra.mxu0 %v15163_v24  ;;  %7751 = vmatpush1.bf16.msra.mxu1 %v15166_v25  ;;  %v15252_v24 = vld [vmem:[%s20336_s3 + $0x184c] ss:$16 sps:$4 sm:$0xff]   ;;  %v15247_v25 = vld [vmem:[%s20336_s3 + $0x1840] ss:$16 sps:$4 sm:$0xff]  }
 0x760   : > { %7670 = vmatprep.subr.bf16.mxu0 %v15171_v27  ;;  %7752 = vmatprep.subr.bf16.mxu1 %v15174_v28  ;;  %v15250_v27 = vld [vmem:[%s20336_s3 + $0x1848] ss:$16 sps:$4 sm:$0xff]   ;;  %v15255_v28 = vld [vmem:[%s20336_s3 + $0x1864] ss:$16 sps:$4 sm:$0xff]  }
 0x763   : > { %7671 = vmatpush1.bf16.msra.mxu0 %v15169_v29  ;;  %7753 = vmatpush1.bf16.msra.mxu1 %v15172_v30  ;;  %v15258_v29 = vld [vmem:[%s20336_s3 + $0x186c] ss:$16 sps:$4 sm:$0xff]   ;;  %v15253_v30 = vld [vmem:[%s20336_s3 + $0x1860] ss:$16 sps:$4 sm:$0xff]  }
 0x764   : > { %7672 = vmatprep.subr.bf16.mxu0 %v15177_v31  ;;  %7754 = vmatprep.subr.bf16.mxu1 %v15180_v12  ;;  %v15256_v31 = vld [vmem:[%s20336_s3 + $0x1868] ss:$16 sps:$4 sm:$0xff]   ;;  %v15261_v12 = vld [vmem:[%s20336_s3 + $0x1884] ss:$16 sps:$4 sm:$0xff]  }
 0x767   : > { %7673 = vmatpush1.bf16.msra.mxu0 %v15175_v32  ;;  %7755 = vmatpush1.bf16.msra.mxu1 %v15178_v33  ;;  %v15264_v32 = vld [vmem:[%s20336_s3 + $0x188c] ss:$16 sps:$4 sm:$0xff]   ;;  %v15259_v33 = vld [vmem:[%s20336_s3 + $0x1880] ss:$16 sps:$4 sm:$0xff]  }
 0x768   : > { %7674 = vmatprep.subr.bf16.mxu0 %v15183_v35  ;;  %7756 = vmatprep.subr.bf16.mxu1 %v15186_v36  ;;  %v15262_v35 = vld [vmem:[%s20336_s3 + $0x1888] ss:$16 sps:$4 sm:$0xff]   ;;  %v15267_v36 = vld [vmem:[%s20336_s3 + $0x18a4] ss:$16 sps:$4 sm:$0xff]  }
 0x76b   : > { %7675 = vmatpush1.bf16.msra.mxu0 %v15181_v16  ;;  %7757 = vmatpush1.bf16.msra.mxu1 %v15184_v37  ;;  %v15270_v16 = vld [vmem:[%s20336_s3 + $0x18ac] ss:$16 sps:$4 sm:$0xff]   ;;  %v15265_v37 = vld [vmem:[%s20336_s3 + $0x18a0] ss:$16 sps:$4 sm:$0xff]  }
 0x76c   : > { %7676 = vmatprep.subr.bf16.mxu0 %v15189_v38  ;;  %7758 = vmatprep.subr.bf16.mxu1 %v15192_v40  ;;  %v15268_v38 = vld [vmem:[%s20336_s3 + $0x18a8] ss:$16 sps:$4 sm:$0xff]   ;;  %v15273_v40 = vld [vmem:[%s20336_s3 + $0x18c4] ss:$16 sps:$4 sm:$0xff]  }
 0x76f   : > { %7677 = vmatpush1.bf16.msra.mxu0 %v15187_v41  ;;  %7759 = vmatpush1.bf16.msra.mxu1 %v15190_v42  ;;  %v15276_v41 = vld [vmem:[%s20336_s3 + $0x18cc] ss:$16 sps:$4 sm:$0xff]   ;;  %v15271_v42 = vld [vmem:[%s20336_s3 + $0x18c0] ss:$16 sps:$4 sm:$0xff]  }
 0x770   : > { %7678 = vmatprep.subr.bf16.mxu0 %v15195_v21  ;;  %7760 = vmatprep.subr.bf16.mxu1 %v15198_v43  ;;  %v15274_v21 = vld [vmem:[%s20336_s3 + $0x18c8] ss:$16 sps:$4 sm:$0xff]   ;;  %v15279_v43 = vld [vmem:[%s20336_s3 + $0x18e4] ss:$16 sps:$4 sm:$0xff]  }
 0x773   : > { %7679 = vmatpush1.bf16.msra.mxu0 %v15193_v44  ;;  %7761 = vmatpush1.bf16.msra.mxu1 %v15196_v51  ;;  %v15282_v44 = vld [vmem:[%s20336_s3 + $0x18ec] ss:$16 sps:$4 sm:$0xff]   ;;  %v15277_v51 = vld [vmem:[%s20336_s3 + $0x18e0] ss:$16 sps:$4 sm:$0xff]  }
 0x774   : > { %7680 = vmatprep.subr.bf16.mxu0 %v15201_v26  ;;  %7762 = vmatprep.subr.bf16.mxu1 %v15204_v53  ;;  %v15280_v26 = vld [vmem:[%s20336_s3 + $0x18e8] ss:$16 sps:$4 sm:$0xff]   ;;  %v15285_v53 = vld [vmem:[%s20336_s3 + $0x1904] ss:$16 sps:$4 sm:$0xff]  }
 0x777   : > { %7681 = vmatpush1.bf16.msra.mxu0 %v15199_v54  ;;  %7763 = vmatpush1.bf16.msra.mxu1 %v15202_v56  ;;  %v15288_v54 = vld [vmem:[%s20336_s3 + $0x190c] ss:$16 sps:$4 sm:$0xff]   ;;  %v15283_v56 = vld [vmem:[%s20336_s3 + $0x1900] ss:$16 sps:$4 sm:$0xff]  }
 0x778   : > { %7682 = vmatprep.subr.bf16.mxu0 %v15207_v58  ;;  %7764 = vmatprep.subr.bf16.mxu1 %v15210_v59  ;;  %v15286_v58 = vld [vmem:[%s20336_s3 + $0x1908] ss:$16 sps:$4 sm:$0xff]   ;;  %v15291_v59 = vld [vmem:[%s20336_s3 + $0x1924] ss:$16 sps:$4 sm:$0xff]  }
 0x77b   : > { %7683 = vmatpush1.bf16.msra.mxu0 %v15205_v60  ;;  %7765 = vmatpush1.bf16.msra.mxu1 %v15208_v34  ;;  %v15294_v60 = vld [vmem:[%s20336_s3 + $0x192c] ss:$16 sps:$4 sm:$0xff]   ;;  %v15289_v34 = vld [vmem:[%s20336_s3 + $0x1920] ss:$16 sps:$4 sm:$0xff]  }
 0x77c   : > { %7684 = vmatprep.subr.bf16.mxu0 %v15213_v61  ;;  %7766 = vmatprep.subr.bf16.mxu1 %v15216_v62  ;;  %v15292_v61 = vld [vmem:[%s20336_s3 + $0x1928] ss:$16 sps:$4 sm:$0xff]   ;;  %v15297_v62 = vld [vmem:[%s20336_s3 + $0x1944] ss:$16 sps:$4 sm:$0xff]  }
 0x77f   : > { %7685 = vmatpush1.bf16.msra.mxu0 %v15211_v0  ;;  %7767 = vmatpush1.bf16.msra.mxu1 %v15214_v1  ;;  %v15300_v0 = vld [vmem:[%s20336_s3 + $0x194c] ss:$16 sps:$4 sm:$0xff]   ;;  %v15295_v1 = vld [vmem:[%s20336_s3 + $0x1940] ss:$16 sps:$4 sm:$0xff]  }
 0x780   : > { %7686 = vmatprep.subr.bf16.mxu0 %v15219_v39  ;;  %7768 = vmatprep.subr.bf16.mxu1 %v15222_v3  ;;  %v15298_v39 = vld [vmem:[%s20336_s3 + $0x1948] ss:$16 sps:$4 sm:$0xff]   ;;  %v15303_v3 = vld [vmem:[%s20336_s3 + $0x1964] ss:$16 sps:$4 sm:$0xff]  }
 0x783   : > { %7687 = vmatpush1.bf16.msra.mxu0 %v15217_v4  ;;  %7769 = vmatpush1.bf16.msra.mxu1 %v15220_v6  ;;  %v15306_v4 = vld [vmem:[%s20336_s3 + $0x196c] ss:$16 sps:$4 sm:$0xff]   ;;  %v15301_v6 = vld [vmem:[%s20336_s3 + $0x1960] ss:$16 sps:$4 sm:$0xff]  }
 0x784   : > { %7688 = vmatprep.subr.bf16.mxu0 %v15225_v7  ;;  %7770 = vmatprep.subr.bf16.mxu1 %v15228_v8  ;;  %v15309_v7 = vld [vmem:[%s20336_s3 + $0x1984] ss:$16 sps:$4 sm:$0xff]   ;;  %v15312_v8 = vld [vmem:[%s20336_s3 + $0x198c] ss:$16 sps:$4 sm:$0xff]  }
 0x787   : > { %7689 = vmatpush1.bf16.msra.mxu0 %v15223_v9  ;;  %7771 = vmatpush1.bf16.msra.mxu1 %v15226_v52  ;;  %v15307_v9 = vld [vmem:[%s20336_s3 + $0x1980] ss:$16 sps:$4 sm:$0xff]   ;;  %v15310_v52 = vld [vmem:[%s20336_s3 + $0x1988] ss:$16 sps:$4 sm:$0xff]  }
 0x788   : > { %7690 = vmatprep.subr.bf16.mxu0 %v15231_v48  ;;  %7772 = vmatprep.subr.bf16.mxu1 %v15234_v13  ;;  %v15318_v48 = vld [vmem:[%s20336_s3 + $0x19ac] ss:$16 sps:$4 sm:$0xff]   ;;  %v15313_v13 = vld [vmem:[%s20336_s3 + $0x19a0] ss:$16 sps:$4 sm:$0xff]  }
 0x78b   : > { %7691 = vmatpush1.bf16.msra.mxu0 %v15229_v14  ;;  %7773 = vmatpush1.bf16.msra.mxu1 %v15232_v57  ;;  %v15316_v14 = vld [vmem:[%s20336_s3 + $0x19a8] ss:$16 sps:$4 sm:$0xff]   ;;  %v15321_v57 = vld [vmem:[%s20336_s3 + $0x19c4] ss:$16 sps:$4 sm:$0xff]  }
 0x78c   : > { %8583 = vmatprep.subr.bf16.mxu0 %v15237_v55  ;;  %8665 = vmatprep.subr.bf16.mxu1 %v15240_v11  ;;  %v15319_v55 = vld [vmem:[%s20336_s3 + $0x19c0] ss:$16 sps:$4 sm:$0xff]   ;;  %v15322_v11 = vld [vmem:[%s20336_s3 + $0x19c8] ss:$16 sps:$4 sm:$0xff]  }
 0x78e   : > { %7693 = vmatmul.mubr.bf16.vlgmr.msra.gmra.mrb[24].mxu0 %v6825_v63  ;;  %7775 = vmatmul.mubr.bf16.vlgmr.msra.gmra.mrb[24].mxu1 %v6825_v63  ;;  %v15325_v63 = vld [vmem:[%s20336_s3 + $0x19e0] ss:$16 sps:$4 sm:$0xff]  }
 0x78f   : > { %8584 = vmatpush1.bf16.msra.mxu0 %v15235_v17  ;;  %8666 = vmatpush1.bf16.msra.mxu1 %v15238_v18  ;;  %v15327_v17 = vld [vmem:[%s20336_s3 + $0x19e4] ss:$16 sps:$4 sm:$0xff]   ;;  %v15330_v18 = vld [vmem:[%s20336_s3 + $0x19ec] ss:$16 sps:$4 sm:$0xff]  }
 0x790   : > { %8585 = vmatprep.subr.bf16.mxu0 %v15243_v19  ;;  %8667 = vmatprep.subr.bf16.mxu1 %v15246_v20  ;;  %v15328_v19 = vld [vmem:[%s20336_s3 + $0x19e8] ss:$16 sps:$4 sm:$0xff]   ;;  %v15333_v20 = vld [vmem:[%s20336_s3 + $0x1a04] ss:$16 sps:$4 sm:$0xff]  }
 0x793   : > { %8586 = vmatpush1.bf16.msra.mxu0 %v15241_v22  ;;  %8668 = vmatpush1.bf16.msra.mxu1 %v15244_v23  ;;  %v15336_v22 = vld [vmem:[%s20336_s3 + $0x1a0c] ss:$16 sps:$4 sm:$0xff]   ;;  %v19220_v23 = vld [vmem:[%s20337_s4 + $0x14] sm:$0xf] }
 0x794   : > { %8587 = vmatprep.subr.bf16.mxu0 %v15249_v5  ;;  %8669 = vmatprep.subr.bf16.mxu1 %v15252_v24  ;;  %v6962_v5 = vrot.slane %v19220_v23, %v16806_v47  ;;  %v6966_v24 = vrot.slane %v19220_v23, %v16814_v49 }
 0x797   : > { %8588 = vmatpush1.bf16.msra.mxu0 %v15247_v25  ;;  %8670 = vmatpush1.bf16.msra.mxu1 %v15250_v27  ;;  %v6974_v25 = vrot.slane %v19220_v23, %v16817_v50 }
 0x798   : > { %8589 = vmatprep.subr.bf16.mxu0 %v15255_v28  ;;  %8671 = vmatprep.subr.bf16.mxu1 %v15258_v29 }
 0x79b   : > { %8590 = vmatpush1.bf16.msra.mxu0 %v15253_v30  ;;  %8672 = vmatpush1.bf16.msra.mxu1 %v15256_v31 }
 0x79c   : > { %8591 = vmatprep.subr.bf16.mxu0 %v15261_v12  ;;  %8673 = vmatprep.subr.bf16.mxu1 %v15264_v32 }
 0x79f   : > { %8592 = vmatpush1.bf16.msra.mxu0 %v15259_v33  ;;  %8674 = vmatpush1.bf16.msra.mxu1 %v15262_v35 }
 0x7a0   : > { %8593 = vmatprep.subr.bf16.mxu0 %v15267_v36  ;;  %8675 = vmatprep.subr.bf16.mxu1 %v15270_v16 }
 0x7a3   : > { %8594 = vmatpush1.bf16.msra.mxu0 %v15265_v37  ;;  %8676 = vmatpush1.bf16.msra.mxu1 %v15268_v38 }
 0x7a4   : > { %8595 = vmatprep.subr.bf16.mxu0 %v15273_v40  ;;  %8677 = vmatprep.subr.bf16.mxu1 %v15276_v41 }
 0x7a7   : > { %8596 = vmatpush1.bf16.msra.mxu0 %v15271_v42  ;;  %8678 = vmatpush1.bf16.msra.mxu1 %v15274_v21  ;;  %v15331_v42 = vld [vmem:[%s20336_s3 + $0x1a00] ss:$16 sps:$4 sm:$0xff]   ;;  %v15334_v21 = vld [vmem:[%s20336_s3 + $0x1a08] ss:$16 sps:$4 sm:$0xff]  }
 0x7a8   : > { %8597 = vmatprep.subr.bf16.mxu0 %v15279_v43  ;;  %8679 = vmatprep.subr.bf16.mxu1 %v15282_v44  ;;  %v15339_v44 = vld [vmem:[%s20336_s3 + $0x1a24] ss:$16 sps:$4 sm:$0xff]  }
 0x7ab   : > { %8598 = vmatpush1.bf16.msra.mxu0 %v15277_v51  ;;  %8680 = vmatpush1.bf16.msra.mxu1 %v15280_v26  ;;  %v15342_v51 = vld [vmem:[%s20336_s3 + $0x1a2c] ss:$16 sps:$4 sm:$0xff]  }
 0x7ac   : > { %8599 = vmatprep.subr.bf16.mxu0 %v15285_v53  ;;  %8681 = vmatprep.subr.bf16.mxu1 %v15288_v54  ;;  %v15337_v53 = vld [vmem:[%s20336_s3 + $0x1a20] ss:$16 sps:$4 sm:$0xff]   ;;  %v15340_v54 = vld [vmem:[%s20336_s3 + $0x1a28] ss:$16 sps:$4 sm:$0xff]  }
 0x7af   : > { %8600 = vmatpush1.bf16.msra.mxu0 %v15283_v56  ;;  %8682 = vmatpush1.bf16.msra.mxu1 %v15286_v58  ;;  %v15345_v56 = vld [vmem:[%s20336_s3 + $0x1a44] ss:$16 sps:$4 sm:$0xff]   ;;  %v15348_v58 = vld [vmem:[%s20336_s3 + $0x1a4c] ss:$16 sps:$4 sm:$0xff]  }
 0x7b0   : > { %8601 = vmatprep.subr.bf16.mxu0 %v15291_v59  ;;  %8683 = vmatprep.subr.bf16.mxu1 %v15294_v60  ;;  %v15343_v59 = vld [vmem:[%s20336_s3 + $0x1a40] ss:$16 sps:$4 sm:$0xff]   ;;  %v15346_v60 = vld [vmem:[%s20336_s3 + $0x1a48] ss:$16 sps:$4 sm:$0xff]  }
 0x7b3   : > { %8602 = vmatpush1.bf16.msra.mxu0 %v15289_v34  ;;  %8684 = vmatpush1.bf16.msra.mxu1 %v15292_v61  ;;  %v15351_v34 = vld [vmem:[%s20336_s3 + $0x1a64] ss:$16 sps:$4 sm:$0xff]   ;;  %v15354_v61 = vld [vmem:[%s20336_s3 + $0x1a6c] ss:$16 sps:$4 sm:$0xff]  }
 0x7b4   : > { %8603 = vmatprep.subr.bf16.mxu0 %v15297_v62  ;;  %8685 = vmatprep.subr.bf16.mxu1 %v15300_v0  ;;  %v15349_v62 = vld [vmem:[%s20336_s3 + $0x1a60] ss:$16 sps:$4 sm:$0xff]   ;;  %v15352_v0 = vld [vmem:[%s20336_s3 + $0x1a68] ss:$16 sps:$4 sm:$0xff]  }
 0x7b7   : > { %8604 = vmatpush1.bf16.msra.mxu0 %v15295_v1  ;;  %8686 = vmatpush1.bf16.msra.mxu1 %v15298_v39  ;;  %v15357_v1 = vld [vmem:[%s20336_s3 + $0x1a84] ss:$16 sps:$4 sm:$0xff]   ;;  %v15360_v39 = vld [vmem:[%s20336_s3 + $0x1a8c] ss:$16 sps:$4 sm:$0xff]  }
 0x7b8   : > { %8605 = vmatprep.subr.bf16.mxu0 %v15303_v3  ;;  %8687 = vmatprep.subr.bf16.mxu1 %v15306_v4  ;;  %v15355_v3 = vld [vmem:[%s20336_s3 + $0x1a80] ss:$16 sps:$4 sm:$0xff]   ;;  %v15358_v4 = vld [vmem:[%s20336_s3 + $0x1a88] ss:$16 sps:$4 sm:$0xff]  }
 0x7bb   : > { %8606 = vmatpush1.bf16.msra.mxu0 %v15301_v6  ;;  %8688 = vmatpush1.bf16.msra.mxu1 %v15304_v46  ;;  %v15363_v6 = vld [vmem:[%s20336_s3 + $0x1aa4] ss:$16 sps:$4 sm:$0xff]   ;;  %v15366_v46 = vld [vmem:[%s20336_s3 + $0x1aac] ss:$16 sps:$4 sm:$0xff]  }
 0x7bc   : > { %8607 = vmatprep.subr.bf16.mxu0 %v15309_v7  ;;  %8689 = vmatprep.subr.bf16.mxu1 %v15312_v8  ;;  %v15361_v7 = vld [vmem:[%s20336_s3 + $0x1aa0] ss:$16 sps:$4 sm:$0xff]   ;;  %v15364_v8 = vld [vmem:[%s20336_s3 + $0x1aa8] ss:$16 sps:$4 sm:$0xff]  }
 0x7bf   : > { %8608 = vmatpush1.bf16.msra.mxu0 %v15307_v9  ;;  %8690 = vmatpush1.bf16.msra.mxu1 %v15310_v52  ;;  %v15369_v9 = vld [vmem:[%s20336_s3 + $0x1ac4] ss:$16 sps:$4 sm:$0xff]   ;;  %v15372_v52 = vld [vmem:[%s20336_s3 + $0x1acc] ss:$16 sps:$4 sm:$0xff]  }
 0x7c0   : > { %8609 = vmatprep.subr.bf16.mxu0 %v15315_v10  ;;  %8691 = vmatprep.subr.bf16.mxu1 %v15318_v48  ;;  %v15367_v10 = vld [vmem:[%s20336_s3 + $0x1ac0] ss:$16 sps:$4 sm:$0xff]   ;;  %v15370_v48 = vld [vmem:[%s20336_s3 + $0x1ac8] ss:$16 sps:$4 sm:$0xff]  }
 0x7c3   : > { %8610 = vmatpush1.bf16.msra.mxu0 %v15313_v13  ;;  %8692 = vmatpush1.bf16.msra.mxu1 %v15316_v14  ;;  %v15375_v13 = vld [vmem:[%s20336_s3 + $0x1ae4] ss:$16 sps:$4 sm:$0xff]   ;;  %v15378_v14 = vld [vmem:[%s20336_s3 + $0x1aec] ss:$16 sps:$4 sm:$0xff]  }
 0x7c4   : > { %8611 = vmatprep.subr.bf16.mxu0 %v15321_v57  ;;  %8693 = vmatprep.subr.bf16.mxu1 %v15324_v15  ;;  %v15373_v57 = vld [vmem:[%s20336_s3 + $0x1ae0] ss:$16 sps:$4 sm:$0xff]   ;;  %v15376_v15 = vld [vmem:[%s20336_s3 + $0x1ae8] ss:$16 sps:$4 sm:$0xff]  }
 0x7c7   : > { %8612 = vmatpush1.bf16.msra.mxu0 %v15319_v55  ;;  %8694 = vmatpush1.bf16.msra.mxu1 %v15322_v11  ;;  %v15381_v55 = vld [vmem:[%s20336_s3 + $0x1b04] ss:$16 sps:$4 sm:$0xff]   ;;  %v15384_v11 = vld [vmem:[%s20336_s3 + $0x1b0c] ss:$16 sps:$4 sm:$0xff]  }
 0x7c8   : > { %8613 = vmatprep.subr.bf16.mxu0 %v15327_v17  ;;  %8695 = vmatprep.subr.bf16.mxu1 %v15330_v18  ;;  %v15379_v17 = vld [vmem:[%s20336_s3 + $0x1b00] ss:$16 sps:$4 sm:$0xff]   ;;  %v15382_v18 = vld [vmem:[%s20336_s3 + $0x1b08] ss:$16 sps:$4 sm:$0xff]  }
 0x7cb   : > { %8614 = vmatpush1.bf16.msra.mxu0 %v15325_v63  ;;  %8696 = vmatpush1.bf16.msra.mxu1 %v15328_v19  ;;  %v15387_v63 = vld [vmem:[%s20336_s3 + $0x1b24] ss:$16 sps:$4 sm:$0xff]   ;;  %v15390_v19 = vld [vmem:[%s20336_s3 + $0x1b2c] ss:$16 sps:$4 sm:$0xff]  }
 0x7cc   : > { %8624 = vmatprep.subr.bf16.mxu0 %v15333_v20  ;;  %8706 = vmatprep.subr.bf16.mxu1 %v15336_v22  ;;  %v15385_v20 = vld [vmem:[%s20336_s3 + $0x1b20] ss:$16 sps:$4 sm:$0xff]   ;;  %v15388_v22 = vld [vmem:[%s20336_s3 + $0x1b28] ss:$16 sps:$4 sm:$0xff]  }
 0x861   : > { %v7694_v27 = vpop.f32.mrb[24].mxu0  ;;  %v19228_v28 = vpop.f32.mrb[24].mxu1 }
 0x862   : > { %v13618_v29 = vadd.f32 %v7694_v27, %v6962_v5  ;;  %v7696_v30 = vpop.f32.mrb[25].mxu0  ;;  %v7778_v31 = vpop.f32.mrb[25].mxu1  ;;  %v15393_v5 = vld [vmem:[%s20336_s3 + $0x1b44] ss:$16 sps:$4 sm:$0xff]   ;;  %v15394_v27 = vld [vmem:[%s20336_s3 + $0x1b48] ss:$16 sps:$4 sm:$0xff]  }
 0x863   : > { %v13619_v12 = vadd.f32 %v7696_v30, %v6966_v24  ;;  %v13621_v32 = vadd.f32 %v7778_v31, %v6974_v25  ;;  %v7698_v33 = vpop.f32.mrb[26].mxu0  ;;  %v7780_v35 = vpop.f32.mrb[26].mxu1  ;;  %v15396_v24 = vld [vmem:[%s20336_s3 + $0x1b4c] ss:$16 sps:$4 sm:$0xff]   ;;  %v15391_v25 = vld [vmem:[%s20336_s3 + $0x1b40] ss:$16 sps:$4 sm:$0xff]  }
 0x864   : > { %v7783_v36 = vmax.f32 %v13618_v29, 0.0  ;;  %v7699_v16 = vpop.f32.mrb[27].mxu0  ;;  %v7781_v37 = vpop.f32.mrb[27].mxu1  ;;  %v15399_v29 = vld [vmem:[%s20336_s3 + $0x1b64] ss:$16 sps:$4 sm:$0xff]  }
 0x865   : > { %v7784_v38 = vmax.f32 %v13619_v12, 0.0  ;;  %v7786_v40 = vmax.f32 %v13621_v32, 0.0  ;;  %v15402_v30 = vld [vmem:[%s20336_s3 + $0x1b6c] ss:$16 sps:$4 sm:$0xff]   ;;  %v15397_v31 = vld [vmem:[%s20336_s3 + $0x1b60] ss:$16 sps:$4 sm:$0xff]  }
 0x866   : > { %v7787_v43 = vpack.c.bf16 %v7783_v36, %v7783_v36  ;;  %v15400_v12 = vld [vmem:[%s20336_s3 + $0x1b68] ss:$16 sps:$4 sm:$0xff]   ;;  %v15405_v32 = vld [vmem:[%s20336_s3 + $0x1b84] ss:$16 sps:$4 sm:$0xff]   ;;  %v15408_v33 = vld [vmem:[%s20336_s3 + $0x1b8c] ss:$16 sps:$4 sm:$0xff]  }
 0x867   : > { %v7788_v41 = vpack.c.bf16 %v7784_v38, %v7784_v38  ;;  %v7790_v26 = vpack.c.bf16 %v7786_v40, %v7786_v40  ;;  %v15403_v35 = vld [vmem:[%s20336_s3 + $0x1b80] ss:$16 sps:$4 sm:$0xff]   ;;  %v15406_v36 = vld [vmem:[%s20336_s3 + $0x1b88] ss:$16 sps:$4 sm:$0xff]   ;;  %v15411_v16 = vld [vmem:[%s20336_s3 + $0x1ba4] ss:$16 sps:$4 sm:$0xff]  }
 0x868   : > { %v15414_v37 = vld [vmem:[%s20336_s3 + $0x1bac] ss:$16 sps:$4 sm:$0xff]   ;;  %v15409_v38 = vld [vmem:[%s20336_s3 + $0x1ba0] ss:$16 sps:$4 sm:$0xff]   ;;  %v15412_v40 = vld [vmem:[%s20336_s3 + $0x1ba8] ss:$16 sps:$4 sm:$0xff]  }
 0x869   : > { %8615 = vmatprep.mubr.bf16.mxu0 %v7788_v41  ;;  %8697 = vmatprep.mubr.bf16.mxu1 %v7788_v41  ;;  %v6970_v41 = vrot.slane %v19220_v23, %v16984_v2  ;;  %v15418_v23 = vld [vmem:[%s20336_s3 + $0x1bc8] ss:$16 sps:$4 sm:$0xff]  }
 0x86a   : > { %8616 = vmatmul.mubr.bf16.vlgmr.msra.gmra.mrb[28].mxu0 %v7787_v43  ;;  %8698 = vmatmul.mubr.bf16.vlgmr.msra.gmra.mrb[28].mxu1 %v7787_v43  ;;  %v15415_v43 = vld [vmem:[%s20336_s3 + $0x1bc0] ss:$16 sps:$4 sm:$0xff]  }
 0x86b   : > { %8625 = vmatpush1.bf16.msra.mxu0 %v15331_v42  ;;  %8707 = vmatpush1.bf16.msra.mxu1 %v15334_v21  ;;  %v15417_v42 = vld [vmem:[%s20336_s3 + $0x1bc4] ss:$16 sps:$4 sm:$0xff]   ;;  %v15420_v21 = vld [vmem:[%s20336_s3 + $0x1bcc] ss:$16 sps:$4 sm:$0xff]  }
 0x86c   : > { %8656 = vmatprep.mubr.bf16.mxu0 %v7790_v26  ;;  %8738 = vmatprep.mubr.bf16.mxu1 %v7790_v26  ;;  %v15426_v26 = vld [vmem:[%s20336_s3 + $0x1bec] ss:$16 sps:$4 sm:$0xff]  }
 0x86d   : > { %8626 = vmatprep.subr.bf16.mxu0 %v15339_v44  ;;  %8708 = vmatprep.subr.bf16.mxu1 %v15342_v51  ;;  %v13620_v44 = vadd.f32 %v19228_v28, %v6970_v41  ;;  %v15423_v51 = vld [vmem:[%s20336_s3 + $0x1be4] ss:$16 sps:$4 sm:$0xff]   ;;  %v15424_v28 = vld [vmem:[%s20336_s3 + $0x1be8] ss:$16 sps:$4 sm:$0xff]  }
 0x86e   : > { %v15496_v41 = vld [vmem:[%s20336_s3 + $0x1d68] ss:$16 sps:$4 sm:$0xff]  }
 0x86f   : > { %8627 = vmatpush1.bf16.msra.mxu0 %v15337_v53  ;;  %8709 = vmatpush1.bf16.msra.mxu1 %v15340_v54  ;;  %v15421_v53 = vld [vmem:[%s20336_s3 + $0x1be0] ss:$16 sps:$4 sm:$0xff]   ;;  %v7785_v54 = vmax.f32 %v13620_v44, 0.0  ;;  %v15507_v44 = vld [vmem:[%s20336_s3 + $0x1da4] ss:$16 sps:$4 sm:$0xff]  }
 0x870   : > { %8628 = vmatprep.subr.bf16.mxu0 %v15345_v56  ;;  %8710 = vmatprep.subr.bf16.mxu1 %v15348_v58  ;;  %v15429_v56 = vld [vmem:[%s20336_s3 + $0x1c04] ss:$16 sps:$4 sm:$0xff]   ;;  %v15432_v58 = vld [vmem:[%s20336_s3 + $0x1c0c] ss:$16 sps:$4 sm:$0xff]  }
 0x873   : > { %8629 = vmatpush1.bf16.msra.mxu0 %v15343_v59  ;;  %8711 = vmatpush1.bf16.msra.mxu1 %v15346_v60  ;;  %v15427_v59 = vld [vmem:[%s20336_s3 + $0x1c00] ss:$16 sps:$4 sm:$0xff]   ;;  %v15430_v60 = vld [vmem:[%s20336_s3 + $0x1c08] ss:$16 sps:$4 sm:$0xff]  }
 0x874   : > { %8630 = vmatprep.subr.bf16.mxu0 %v15351_v34  ;;  %8712 = vmatprep.subr.bf16.mxu1 %v15354_v61  ;;  %v7789_v34 = vpack.c.bf16 %v7785_v54, %v7785_v54  ;;  %v15435_v61 = vld [vmem:[%s20336_s3 + $0x1c24] ss:$16 sps:$4 sm:$0xff]   ;;  %v15516_v54 = vld [vmem:[%s20336_s3 + $0x1dcc] ss:$16 sps:$4 sm:$0xff]  }
 0x877   : > { %8631 = vmatpush1.bf16.msra.mxu0 %v15349_v62  ;;  %8713 = vmatpush1.bf16.msra.mxu1 %v15352_v0  ;;  %v15438_v62 = vld [vmem:[%s20336_s3 + $0x1c2c] ss:$16 sps:$4 sm:$0xff]   ;;  %v15433_v0 = vld [vmem:[%s20336_s3 + $0x1c20] ss:$16 sps:$4 sm:$0xff]  }
 0x878   : > { %8632 = vmatprep.subr.bf16.mxu0 %v15357_v1  ;;  %8714 = vmatprep.subr.bf16.mxu1 %v15360_v39  ;;  %v15436_v1 = vld [vmem:[%s20336_s3 + $0x1c28] ss:$16 sps:$4 sm:$0xff]   ;;  %v15441_v39 = vld [vmem:[%s20336_s3 + $0x1c44] ss:$16 sps:$4 sm:$0xff]  }
 0x87b   : > { %8633 = vmatpush1.bf16.msra.mxu0 %v15355_v3  ;;  %8715 = vmatpush1.bf16.msra.mxu1 %v15358_v4  ;;  %v15444_v3 = vld [vmem:[%s20336_s3 + $0x1c4c] ss:$16 sps:$4 sm:$0xff]   ;;  %v15439_v4 = vld [vmem:[%s20336_s3 + $0x1c40] ss:$16 sps:$4 sm:$0xff]  }
 0x87c   : > { %8634 = vmatprep.subr.bf16.mxu0 %v15363_v6  ;;  %8716 = vmatprep.subr.bf16.mxu1 %v15366_v46  ;;  %v15442_v6 = vld [vmem:[%s20336_s3 + $0x1c48] ss:$16 sps:$4 sm:$0xff]   ;;  %v15447_v46 = vld [vmem:[%s20336_s3 + $0x1c64] ss:$16 sps:$4 sm:$0xff]  }
 0x87f   : > { %8635 = vmatpush1.bf16.msra.mxu0 %v15361_v7  ;;  %8717 = vmatpush1.bf16.msra.mxu1 %v15364_v8  ;;  %v15450_v7 = vld [vmem:[%s20336_s3 + $0x1c6c] ss:$16 sps:$4 sm:$0xff]   ;;  %v15445_v8 = vld [vmem:[%s20336_s3 + $0x1c60] ss:$16 sps:$4 sm:$0xff]  }
 0x880   : > { %8636 = vmatprep.subr.bf16.mxu0 %v15369_v9  ;;  %8718 = vmatprep.subr.bf16.mxu1 %v15372_v52  ;;  %v15448_v9 = vld [vmem:[%s20336_s3 + $0x1c68] ss:$16 sps:$4 sm:$0xff]   ;;  %v15453_v52 = vld [vmem:[%s20336_s3 + $0x1c84] ss:$16 sps:$4 sm:$0xff]  }
 0x883   : > { %8637 = vmatpush1.bf16.msra.mxu0 %v15367_v10  ;;  %8719 = vmatpush1.bf16.msra.mxu1 %v15370_v48  ;;  %v15456_v10 = vld [vmem:[%s20336_s3 + $0x1c8c] ss:$16 sps:$4 sm:$0xff]   ;;  %v15451_v48 = vld [vmem:[%s20336_s3 + $0x1c80] ss:$16 sps:$4 sm:$0xff]  }
 0x884   : > { %8638 = vmatprep.subr.bf16.mxu0 %v15375_v13  ;;  %8720 = vmatprep.subr.bf16.mxu1 %v15378_v14  ;;  %v15454_v13 = vld [vmem:[%s20336_s3 + $0x1c88] ss:$16 sps:$4 sm:$0xff]   ;;  %v15459_v14 = vld [vmem:[%s20336_s3 + $0x1ca4] ss:$16 sps:$4 sm:$0xff]  }
 0x887   : > { %8639 = vmatpush1.bf16.msra.mxu0 %v15373_v57  ;;  %8721 = vmatpush1.bf16.msra.mxu1 %v15376_v15  ;;  %v15462_v57 = vld [vmem:[%s20336_s3 + $0x1cac] ss:$16 sps:$4 sm:$0xff]   ;;  %v15457_v15 = vld [vmem:[%s20336_s3 + $0x1ca0] ss:$16 sps:$4 sm:$0xff]  }
 0x888   : > { %8640 = vmatprep.subr.bf16.mxu0 %v15381_v55  ;;  %8722 = vmatprep.subr.bf16.mxu1 %v15384_v11  ;;  %v15460_v55 = vld [vmem:[%s20336_s3 + $0x1ca8] ss:$16 sps:$4 sm:$0xff]   ;;  %v15465_v11 = vld [vmem:[%s20336_s3 + $0x1cc4] ss:$16 sps:$4 sm:$0xff]  }
 0x88b   : > { %8641 = vmatpush1.bf16.msra.mxu0 %v15379_v17  ;;  %8723 = vmatpush1.bf16.msra.mxu1 %v15382_v18  ;;  %v15468_v17 = vld [vmem:[%s20336_s3 + $0x1ccc] ss:$16 sps:$4 sm:$0xff]   ;;  %v15463_v18 = vld [vmem:[%s20336_s3 + $0x1cc0] ss:$16 sps:$4 sm:$0xff]  }
 0x88c   : > { %8642 = vmatprep.subr.bf16.mxu0 %v15387_v63  ;;  %8724 = vmatprep.subr.bf16.mxu1 %v15390_v19  ;;  %v15466_v63 = vld [vmem:[%s20336_s3 + $0x1cc8] ss:$16 sps:$4 sm:$0xff]   ;;  %v15471_v19 = vld [vmem:[%s20336_s3 + $0x1ce4] ss:$16 sps:$4 sm:$0xff]  }
 0x88f   : > { %8643 = vmatpush1.bf16.msra.mxu0 %v15385_v20  ;;  %8725 = vmatpush1.bf16.msra.mxu1 %v15388_v22  ;;  %v15474_v20 = vld [vmem:[%s20336_s3 + $0x1cec] ss:$16 sps:$4 sm:$0xff]   ;;  %v15469_v22 = vld [vmem:[%s20336_s3 + $0x1ce0] ss:$16 sps:$4 sm:$0xff]  }
 0x890   : > { %8644 = vmatprep.subr.bf16.mxu0 %v15393_v5  ;;  %8726 = vmatprep.subr.bf16.mxu1 %v15396_v24  ;;  %v15472_v5 = vld [vmem:[%s20336_s3 + $0x1ce8] ss:$16 sps:$4 sm:$0xff]   ;;  %v15477_v24 = vld [vmem:[%s20336_s3 + $0x1d04] ss:$16 sps:$4 sm:$0xff]  }
 0x893   : > { %8645 = vmatpush1.bf16.msra.mxu0 %v15391_v25  ;;  %8727 = vmatpush1.bf16.msra.mxu1 %v15394_v27  ;;  %v15480_v25 = vld [vmem:[%s20336_s3 + $0x1d0c] ss:$16 sps:$4 sm:$0xff]   ;;  %v15475_v27 = vld [vmem:[%s20336_s3 + $0x1d00] ss:$16 sps:$4 sm:$0xff]  }
 0x894   : > { %8646 = vmatprep.subr.bf16.mxu0 %v15399_v29  ;;  %8728 = vmatprep.subr.bf16.mxu1 %v15402_v30  ;;  %v15478_v29 = vld [vmem:[%s20336_s3 + $0x1d08] ss:$16 sps:$4 sm:$0xff]   ;;  %v15483_v30 = vld [vmem:[%s20336_s3 + $0x1d24] ss:$16 sps:$4 sm:$0xff]  }
 0x897   : > { %8647 = vmatpush1.bf16.msra.mxu0 %v15397_v31  ;;  %8729 = vmatpush1.bf16.msra.mxu1 %v15400_v12  ;;  %v15486_v31 = vld [vmem:[%s20336_s3 + $0x1d2c] ss:$16 sps:$4 sm:$0xff]   ;;  %v15481_v12 = vld [vmem:[%s20336_s3 + $0x1d20] ss:$16 sps:$4 sm:$0xff]  }
 0x898   : > { %8648 = vmatprep.subr.bf16.mxu0 %v15405_v32  ;;  %8730 = vmatprep.subr.bf16.mxu1 %v15408_v33  ;;  %v15484_v32 = vld [vmem:[%s20336_s3 + $0x1d28] ss:$16 sps:$4 sm:$0xff]   ;;  %v15489_v33 = vld [vmem:[%s20336_s3 + $0x1d44] ss:$16 sps:$4 sm:$0xff]  }
 0x89b   : > { %8649 = vmatpush1.bf16.msra.mxu0 %v15403_v35  ;;  %8731 = vmatpush1.bf16.msra.mxu1 %v15406_v36  ;;  %v15492_v35 = vld [vmem:[%s20336_s3 + $0x1d4c] ss:$16 sps:$4 sm:$0xff]   ;;  %v15487_v36 = vld [vmem:[%s20336_s3 + $0x1d40] ss:$16 sps:$4 sm:$0xff]  }
 0x89c   : > { %8650 = vmatprep.subr.bf16.mxu0 %v15411_v16  ;;  %8732 = vmatprep.subr.bf16.mxu1 %v15414_v37  ;;  %v15490_v16 = vld [vmem:[%s20336_s3 + $0x1d48] ss:$16 sps:$4 sm:$0xff]   ;;  %v15495_v37 = vld [vmem:[%s20336_s3 + $0x1d64] ss:$16 sps:$4 sm:$0xff]  }
 0x89f   : > { %8651 = vmatpush1.bf16.msra.mxu0 %v15409_v38  ;;  %8733 = vmatpush1.bf16.msra.mxu1 %v15412_v40  ;;  %v15498_v38 = vld [vmem:[%s20336_s3 + $0x1d6c] ss:$16 sps:$4 sm:$0xff]   ;;  %v15493_v40 = vld [vmem:[%s20336_s3 + $0x1d60] ss:$16 sps:$4 sm:$0xff]  }
 0x8a0   : > { %8652 = vmatprep.subr.bf16.mxu0 %v15417_v42  ;;  %8734 = vmatprep.subr.bf16.mxu1 %v15420_v21  ;;  %v15501_v42 = vld [vmem:[%s20336_s3 + $0x1d84] ss:$16 sps:$4 sm:$0xff]   ;;  %v15504_v21 = vld [vmem:[%s20336_s3 + $0x1d8c] ss:$16 sps:$4 sm:$0xff]  }
 0x8a3   : > { %8653 = vmatpush1.bf16.msra.mxu0 %v15415_v43  ;;  %8735 = vmatpush1.bf16.msra.mxu1 %v15418_v23  ;;  %v15499_v43 = vld [vmem:[%s20336_s3 + $0x1d80] ss:$16 sps:$4 sm:$0xff]   ;;  %v15502_v23 = vld [vmem:[%s20336_s3 + $0x1d88] ss:$16 sps:$4 sm:$0xff]  }
 0x8a4   : > { %8654 = vmatprep.subr.bf16.mxu0 %v15423_v51  ;;  %8736 = vmatprep.subr.bf16.mxu1 %v15426_v26  ;;  %v15510_v51 = vld [vmem:[%s20336_s3 + $0x1dac] ss:$16 sps:$4 sm:$0xff]   ;;  %v15505_v26 = vld [vmem:[%s20336_s3 + $0x1da0] ss:$16 sps:$4 sm:$0xff]  }
 0x8a7   : > { %8655 = vmatpush1.bf16.msra.mxu0 %v15421_v53  ;;  %8737 = vmatpush1.bf16.msra.mxu1 %v15424_v28  ;;  %v15508_v53 = vld [vmem:[%s20336_s3 + $0x1da8] ss:$16 sps:$4 sm:$0xff]   ;;  %v15513_v28 = vld [vmem:[%s20336_s3 + $0x1dc4] ss:$16 sps:$4 sm:$0xff]  }
 0x8a8   : > { %9547 = vmatprep.subr.bf16.mxu0 %v15429_v56  ;;  %9629 = vmatprep.subr.bf16.mxu1 %v15432_v58  ;;  %v15511_v56 = vld [vmem:[%s20336_s3 + $0x1dc0] ss:$16 sps:$4 sm:$0xff]   ;;  %v15514_v58 = vld [vmem:[%s20336_s3 + $0x1dc8] ss:$16 sps:$4 sm:$0xff]  }
 0x8aa   : > { %8657 = vmatmul.mubr.bf16.vlgmr.msra.gmra.mrb[28].mxu0 %v7789_v34  ;;  %8739 = vmatmul.mubr.bf16.vlgmr.msra.gmra.mrb[28].mxu1 %v7789_v34  ;;  %v15517_v34 = vld [vmem:[%s20336_s3 + $0x1de0] ss:$16 sps:$4 sm:$0xff]  }
 0x8ab   : > { %9548 = vmatpush1.bf16.msra.mxu0 %v15427_v59  ;;  %9630 = vmatpush1.bf16.msra.mxu1 %v15430_v60  ;;  %v15519_v59 = vld [vmem:[%s20336_s3 + $0x1de4] ss:$16 sps:$4 sm:$0xff]   ;;  %v15522_v60 = vld [vmem:[%s20336_s3 + $0x1dec] ss:$16 sps:$4 sm:$0xff]  }
 0x8ac   : > { %9549 = vmatprep.subr.bf16.mxu0 %v15435_v61  ;;  %9631 = vmatprep.subr.bf16.mxu1 %v15438_v62  ;;  %v15520_v61 = vld [vmem:[%s20336_s3 + $0x1de8] ss:$16 sps:$4 sm:$0xff]   ;;  %v15525_v62 = vld [vmem:[%s20336_s3 + $0x1e04] ss:$16 sps:$4 sm:$0xff]  }
 0x8af   : > { %9550 = vmatpush1.bf16.msra.mxu0 %v15433_v0  ;;  %9632 = vmatpush1.bf16.msra.mxu1 %v15436_v1  ;;  %v15528_v0 = vld [vmem:[%s20336_s3 + $0x1e0c] ss:$16 sps:$4 sm:$0xff]   ;;  %v19620_v1 = vld [vmem:[%s20337_s4 + $0x18] sm:$0xf] }
 0x8b0   : > { %9551 = vmatprep.subr.bf16.mxu0 %v15441_v39  ;;  %9633 = vmatprep.subr.bf16.mxu1 %v15444_v3  ;;  %v7926_v39 = vrot.slane %v19620_v1, %v16806_v47  ;;  %v7930_v3 = vrot.slane %v19620_v1, %v16814_v49 }
 0x8b3   : > { %9552 = vmatpush1.bf16.msra.mxu0 %v15439_v4  ;;  %9634 = vmatpush1.bf16.msra.mxu1 %v15442_v6  ;;  %v7938_v4 = vrot.slane %v19620_v1, %v16817_v50 }
 0x8b4   : > { %9553 = vmatprep.subr.bf16.mxu0 %v15447_v46  ;;  %9635 = vmatprep.subr.bf16.mxu1 %v15450_v7 }
 0x8b7   : > { %9554 = vmatpush1.bf16.msra.mxu0 %v15445_v8  ;;  %9636 = vmatpush1.bf16.msra.mxu1 %v15448_v9 }
 0x8b8   : > { %9555 = vmatprep.subr.bf16.mxu0 %v15453_v52  ;;  %9637 = vmatprep.subr.bf16.mxu1 %v15456_v10 }
 0x8bb   : > { %9556 = vmatpush1.bf16.msra.mxu0 %v15451_v48  ;;  %9638 = vmatpush1.bf16.msra.mxu1 %v15454_v13 }
 0x8bc   : > { %9557 = vmatprep.subr.bf16.mxu0 %v15459_v14  ;;  %9639 = vmatprep.subr.bf16.mxu1 %v15462_v57 }
 0x8bf   : > { %9558 = vmatpush1.bf16.msra.mxu0 %v15457_v15  ;;  %9640 = vmatpush1.bf16.msra.mxu1 %v15460_v55 }
 0x8c0   : > { %9559 = vmatprep.subr.bf16.mxu0 %v15465_v11  ;;  %9641 = vmatprep.subr.bf16.mxu1 %v15468_v17 }
 0x8c3   : > { %9560 = vmatpush1.bf16.msra.mxu0 %v15463_v18  ;;  %9642 = vmatpush1.bf16.msra.mxu1 %v15466_v63  ;;  %v15523_v18 = vld [vmem:[%s20336_s3 + $0x1e00] ss:$16 sps:$4 sm:$0xff]   ;;  %v15526_v63 = vld [vmem:[%s20336_s3 + $0x1e08] ss:$16 sps:$4 sm:$0xff]  }
 0x8c4   : > { %9561 = vmatprep.subr.bf16.mxu0 %v15471_v19  ;;  %9643 = vmatprep.subr.bf16.mxu1 %v15474_v20  ;;  %v15531_v20 = vld [vmem:[%s20336_s3 + $0x1e24] ss:$16 sps:$4 sm:$0xff]  }
 0x8c7   : > { %9562 = vmatpush1.bf16.msra.mxu0 %v15469_v22  ;;  %9644 = vmatpush1.bf16.msra.mxu1 %v15472_v5  ;;  %v15534_v22 = vld [vmem:[%s20336_s3 + $0x1e2c] ss:$16 sps:$4 sm:$0xff]  }
 0x8c8   : > { %9563 = vmatprep.subr.bf16.mxu0 %v15477_v24  ;;  %9645 = vmatprep.subr.bf16.mxu1 %v15480_v25  ;;  %v15529_v24 = vld [vmem:[%s20336_s3 + $0x1e20] ss:$16 sps:$4 sm:$0xff]   ;;  %v15532_v25 = vld [vmem:[%s20336_s3 + $0x1e28] ss:$16 sps:$4 sm:$0xff]  }
 0x8cb   : > { %9564 = vmatpush1.bf16.msra.mxu0 %v15475_v27  ;;  %9646 = vmatpush1.bf16.msra.mxu1 %v15478_v29  ;;  %v15537_v27 = vld [vmem:[%s20336_s3 + $0x1e44] ss:$16 sps:$4 sm:$0xff]   ;;  %v15540_v29 = vld [vmem:[%s20336_s3 + $0x1e4c] ss:$16 sps:$4 sm:$0xff]  }
 0x8cc   : > { %9565 = vmatprep.subr.bf16.mxu0 %v15483_v30  ;;  %9647 = vmatprep.subr.bf16.mxu1 %v15486_v31  ;;  %v15535_v30 = vld [vmem:[%s20336_s3 + $0x1e40] ss:$16 sps:$4 sm:$0xff]   ;;  %v15538_v31 = vld [vmem:[%s20336_s3 + $0x1e48] ss:$16 sps:$4 sm:$0xff]  }
 0x8cf   : > { %9566 = vmatpush1.bf16.msra.mxu0 %v15481_v12  ;;  %9648 = vmatpush1.bf16.msra.mxu1 %v15484_v32  ;;  %v15543_v12 = vld [vmem:[%s20336_s3 + $0x1e64] ss:$16 sps:$4 sm:$0xff]   ;;  %v15546_v32 = vld [vmem:[%s20336_s3 + $0x1e6c] ss:$16 sps:$4 sm:$0xff]  }
 0x8d0   : > { %9567 = vmatprep.subr.bf16.mxu0 %v15489_v33  ;;  %9649 = vmatprep.subr.bf16.mxu1 %v15492_v35  ;;  %v15541_v33 = vld [vmem:[%s20336_s3 + $0x1e60] ss:$16 sps:$4 sm:$0xff]   ;;  %v15544_v35 = vld [vmem:[%s20336_s3 + $0x1e68] ss:$16 sps:$4 sm:$0xff]  }
 0x8d3   : > { %9568 = vmatpush1.bf16.msra.mxu0 %v15487_v36  ;;  %9650 = vmatpush1.bf16.msra.mxu1 %v15490_v16  ;;  %v15549_v36 = vld [vmem:[%s20336_s3 + $0x1e84] ss:$16 sps:$4 sm:$0xff]   ;;  %v15552_v16 = vld [vmem:[%s20336_s3 + $0x1e8c] ss:$16 sps:$4 sm:$0xff]  }
 0x8d4   : > { %9569 = vmatprep.subr.bf16.mxu0 %v15495_v37  ;;  %9651 = vmatprep.subr.bf16.mxu1 %v15498_v38  ;;  %v15547_v37 = vld [vmem:[%s20336_s3 + $0x1e80] ss:$16 sps:$4 sm:$0xff]   ;;  %v15550_v38 = vld [vmem:[%s20336_s3 + $0x1e88] ss:$16 sps:$4 sm:$0xff]  }
 0x8d7   : > { %9570 = vmatpush1.bf16.msra.mxu0 %v15493_v40  ;;  %9652 = vmatpush1.bf16.msra.mxu1 %v15496_v41  ;;  %v15555_v40 = vld [vmem:[%s20336_s3 + $0x1ea4] ss:$16 sps:$4 sm:$0xff]   ;;  %v15558_v41 = vld [vmem:[%s20336_s3 + $0x1eac] ss:$16 sps:$4 sm:$0xff]  }
 0x8d8   : > { %9571 = vmatprep.subr.bf16.mxu0 %v15501_v42  ;;  %9653 = vmatprep.subr.bf16.mxu1 %v15504_v21  ;;  %v15553_v42 = vld [vmem:[%s20336_s3 + $0x1ea0] ss:$16 sps:$4 sm:$0xff]   ;;  %v15556_v21 = vld [vmem:[%s20336_s3 + $0x1ea8] ss:$16 sps:$4 sm:$0xff]  }
 0x8db   : > { %9572 = vmatpush1.bf16.msra.mxu0 %v15499_v43  ;;  %9654 = vmatpush1.bf16.msra.mxu1 %v15502_v23  ;;  %v15561_v43 = vld [vmem:[%s20336_s3 + $0x1ec4] ss:$16 sps:$4 sm:$0xff]   ;;  %v15564_v23 = vld [vmem:[%s20336_s3 + $0x1ecc] ss:$16 sps:$4 sm:$0xff]  }
 0x8dc   : > { %9573 = vmatprep.subr.bf16.mxu0 %v15507_v44  ;;  %9655 = vmatprep.subr.bf16.mxu1 %v15510_v51  ;;  %v15559_v44 = vld [vmem:[%s20336_s3 + $0x1ec0] ss:$16 sps:$4 sm:$0xff]   ;;  %v15562_v51 = vld [vmem:[%s20336_s3 + $0x1ec8] ss:$16 sps:$4 sm:$0xff]  }
 0x8df   : > { %9574 = vmatpush1.bf16.msra.mxu0 %v15505_v26  ;;  %9656 = vmatpush1.bf16.msra.mxu1 %v15508_v53  ;;  %v15567_v26 = vld [vmem:[%s20336_s3 + $0x1ee4] ss:$16 sps:$4 sm:$0xff]   ;;  %v15570_v53 = vld [vmem:[%s20336_s3 + $0x1eec] ss:$16 sps:$4 sm:$0xff]  }
 0x8e0   : > { %9575 = vmatprep.subr.bf16.mxu0 %v15513_v28  ;;  %9657 = vmatprep.subr.bf16.mxu1 %v15516_v54  ;;  %v15565_v28 = vld [vmem:[%s20336_s3 + $0x1ee0] ss:$16 sps:$4 sm:$0xff]   ;;  %v15568_v54 = vld [vmem:[%s20336_s3 + $0x1ee8] ss:$16 sps:$4 sm:$0xff]  }
 0x8e3   : > { %9576 = vmatpush1.bf16.msra.mxu0 %v15511_v56  ;;  %9658 = vmatpush1.bf16.msra.mxu1 %v15514_v58  ;;  %v15573_v56 = vld [vmem:[%s20336_s3 + $0x1f04] ss:$16 sps:$4 sm:$0xff]   ;;  %v15576_v58 = vld [vmem:[%s20336_s3 + $0x1f0c] ss:$16 sps:$4 sm:$0xff]  }
 0x8e4   : > { %9577 = vmatprep.subr.bf16.mxu0 %v15519_v59  ;;  %9659 = vmatprep.subr.bf16.mxu1 %v15522_v60  ;;  %v15571_v59 = vld [vmem:[%s20336_s3 + $0x1f00] ss:$16 sps:$4 sm:$0xff]   ;;  %v15574_v60 = vld [vmem:[%s20336_s3 + $0x1f08] ss:$16 sps:$4 sm:$0xff]  }
 0x8e7   : > { %9578 = vmatpush1.bf16.msra.mxu0 %v15517_v34  ;;  %9660 = vmatpush1.bf16.msra.mxu1 %v15520_v61  ;;  %v15579_v34 = vld [vmem:[%s20336_s3 + $0x1f24] ss:$16 sps:$4 sm:$0xff]   ;;  %v15582_v61 = vld [vmem:[%s20336_s3 + $0x1f2c] ss:$16 sps:$4 sm:$0xff]  }
 0x8e8   : > { %9588 = vmatprep.subr.bf16.mxu0 %v15525_v62  ;;  %9670 = vmatprep.subr.bf16.mxu1 %v15528_v0  ;;  %v15577_v62 = vld [vmem:[%s20336_s3 + $0x1f20] ss:$16 sps:$4 sm:$0xff]   ;;  %v15580_v0 = vld [vmem:[%s20336_s3 + $0x1f28] ss:$16 sps:$4 sm:$0xff]  }
 0x97d   : > { %v8658_v6 = vpop.f32.mrb[28].mxu0  ;;  %v19628_v46 = vpop.f32.mrb[28].mxu1 }
 0x97e   : > { %v13622_v7 = vadd.f32 %v8658_v6, %v7926_v39  ;;  %v8660_v8 = vpop.f32.mrb[29].mxu0  ;;  %v8742_v9 = vpop.f32.mrb[29].mxu1  ;;  %v15585_v39 = vld [vmem:[%s20336_s3 + $0x1f44] ss:$16 sps:$4 sm:$0xff]   ;;  %v15586_v6 = vld [vmem:[%s20336_s3 + $0x1f48] ss:$16 sps:$4 sm:$0xff]  }
 0x97f   : > { %v13623_v52 = vadd.f32 %v8660_v8, %v7930_v3  ;;  %v13625_v10 = vadd.f32 %v8742_v9, %v7938_v4  ;;  %v8662_v48 = vpop.f32.mrb[30].mxu0  ;;  %v8744_v13 = vpop.f32.mrb[30].mxu1  ;;  %v15588_v3 = vld [vmem:[%s20336_s3 + $0x1f4c] ss:$16 sps:$4 sm:$0xff]   ;;  %v15583_v4 = vld [vmem:[%s20336_s3 + $0x1f40] ss:$16 sps:$4 sm:$0xff]  }
 0x980   : > { %v8747_v14 = vmax.f32 %v13622_v7, 0.0  ;;  %v8663_v57 = vpop.f32.mrb[31].mxu0  ;;  %v8745_v15 = vpop.f32.mrb[31].mxu1  ;;  %v15591_v7 = vld [vmem:[%s20336_s3 + $0x1f64] ss:$16 sps:$4 sm:$0xff]  }
 0x981   : > { %v8748_v55 = vmax.f32 %v13623_v52, 0.0  ;;  %v8750_v11 = vmax.f32 %v13625_v10, 0.0  ;;  %v15594_v8 = vld [vmem:[%s20336_s3 + $0x1f6c] ss:$16 sps:$4 sm:$0xff]   ;;  %v15589_v9 = vld [vmem:[%s20336_s3 + $0x1f60] ss:$16 sps:$4 sm:$0xff]  }
 0x982   : > { %v8751_v19 = vpack.c.bf16 %v8747_v14, %v8747_v14  ;;  %v15592_v52 = vld [vmem:[%s20336_s3 + $0x1f68] ss:$16 sps:$4 sm:$0xff]   ;;  %v15597_v10 = vld [vmem:[%s20336_s3 + $0x1f84] ss:$16 sps:$4 sm:$0xff]   ;;  %v15600_v48 = vld [vmem:[%s20336_s3 + $0x1f8c] ss:$16 sps:$4 sm:$0xff]  }
 0x983   : > { %v8752_v17 = vpack.c.bf16 %v8748_v55, %v8748_v55  ;;  %v8754_v5 = vpack.c.bf16 %v8750_v11, %v8750_v11  ;;  %v15595_v13 = vld [vmem:[%s20336_s3 + $0x1f80] ss:$16 sps:$4 sm:$0xff]   ;;  %v15598_v14 = vld [vmem:[%s20336_s3 + $0x1f88] ss:$16 sps:$4 sm:$0xff]   ;;  %v15603_v57 = vld [vmem:[%s20336_s3 + $0x1fa4] ss:$16 sps:$4 sm:$0xff]  }
 0x984   : > { %v15606_v15 = vld [vmem:[%s20336_s3 + $0x1fac] ss:$16 sps:$4 sm:$0xff]   ;;  %v15601_v55 = vld [vmem:[%s20336_s3 + $0x1fa0] ss:$16 sps:$4 sm:$0xff]   ;;  %v15604_v11 = vld [vmem:[%s20336_s3 + $0x1fa8] ss:$16 sps:$4 sm:$0xff]  }
 0x985   : > { %9579 = vmatprep.mubr.bf16.mxu0 %v8752_v17  ;;  %9661 = vmatprep.mubr.bf16.mxu1 %v8752_v17  ;;  %v7934_v17 = vrot.slane %v19620_v1, %v16984_v2  ;;  %v15610_v1 = vld [vmem:[%s20336_s3 + $0x1fc8] ss:$16 sps:$4 sm:$0xff]  }
 0x986   : > { %9580 = vmatmul.mubr.bf16.vlgmr.msra.gmra.mrb[32].mxu0 %v8751_v19  ;;  %9662 = vmatmul.mubr.bf16.vlgmr.msra.gmra.mrb[32].mxu1 %v8751_v19  ;;  %v15607_v19 = vld [vmem:[%s20336_s3 + $0x1fc0] ss:$16 sps:$4 sm:$0xff]  }
 0x987   : > { %9589 = vmatpush1.bf16.msra.mxu0 %v15523_v18  ;;  %9671 = vmatpush1.bf16.msra.mxu1 %v15526_v63  ;;  %v15609_v18 = vld [vmem:[%s20336_s3 + $0x1fc4] ss:$16 sps:$4 sm:$0xff]   ;;  %v15612_v63 = vld [vmem:[%s20336_s3 + $0x1fcc] ss:$16 sps:$4 sm:$0xff]  }
 0x988   : > { %9620 = vmatprep.mubr.bf16.mxu0 %v8754_v5  ;;  %9702 = vmatprep.mubr.bf16.mxu1 %v8754_v5  ;;  %v15618_v5 = vld [vmem:[%s20336_s3 + $0x1fec] ss:$16 sps:$4 sm:$0xff]  }
 0x989   : > { %9590 = vmatprep.subr.bf16.mxu0 %v15531_v20  ;;  %9672 = vmatprep.subr.bf16.mxu1 %v15534_v22  ;;  %v13624_v20 = vadd.f32 %v19628_v46, %v7934_v17  ;;  %v15615_v22 = vld [vmem:[%s20336_s3 + $0x1fe4] ss:$16 sps:$4 sm:$0xff]   ;;  %v15616_v46 = vld [vmem:[%s20336_s3 + $0x1fe8] ss:$16 sps:$4 sm:$0xff]  }
 0x98a   : > { %v15688_v17 = vld [vmem:[%s20336_s3 + $0x2168] ss:$16 sps:$4 sm:$0xff]  }
 0x98b   : > { %9591 = vmatpush1.bf16.msra.mxu0 %v15529_v24  ;;  %9673 = vmatpush1.bf16.msra.mxu1 %v15532_v25  ;;  %v15613_v24 = vld [vmem:[%s20336_s3 + $0x1fe0] ss:$16 sps:$4 sm:$0xff]   ;;  %v8749_v25 = vmax.f32 %v13624_v20, 0.0  ;;  %v15699_v20 = vld [vmem:[%s20336_s3 + $0x21a4] ss:$16 sps:$4 sm:$0xff]  }
 0x98c   : > { %9592 = vmatprep.subr.bf16.mxu0 %v15537_v27  ;;  %9674 = vmatprep.subr.bf16.mxu1 %v15540_v29  ;;  %v15621_v27 = vld [vmem:[%s20336_s3 + $0x2004] ss:$16 sps:$4 sm:$0xff]   ;;  %v15624_v29 = vld [vmem:[%s20336_s3 + $0x200c] ss:$16 sps:$4 sm:$0xff]  }
 0x98f   : > { %9593 = vmatpush1.bf16.msra.mxu0 %v15535_v30  ;;  %9675 = vmatpush1.bf16.msra.mxu1 %v15538_v31  ;;  %v15619_v30 = vld [vmem:[%s20336_s3 + $0x2000] ss:$16 sps:$4 sm:$0xff]   ;;  %v15622_v31 = vld [vmem:[%s20336_s3 + $0x2008] ss:$16 sps:$4 sm:$0xff]  }
 0x990   : > { %9594 = vmatprep.subr.bf16.mxu0 %v15543_v12  ;;  %9676 = vmatprep.subr.bf16.mxu1 %v15546_v32  ;;  %v8753_v12 = vpack.c.bf16 %v8749_v25, %v8749_v25  ;;  %v15627_v32 = vld [vmem:[%s20336_s3 + $0x2024] ss:$16 sps:$4 sm:$0xff]   ;;  %v15708_v25 = vld [vmem:[%s20336_s3 + $0x21cc] ss:$16 sps:$4 sm:$0xff]  }
 0x993   : > { %9595 = vmatpush1.bf16.msra.mxu0 %v15541_v33  ;;  %9677 = vmatpush1.bf16.msra.mxu1 %v15544_v35  ;;  %v15630_v33 = vld [vmem:[%s20336_s3 + $0x202c] ss:$16 sps:$4 sm:$0xff]   ;;  %v15625_v35 = vld [vmem:[%s20336_s3 + $0x2020] ss:$16 sps:$4 sm:$0xff]  }
 0x994   : > { %9596 = vmatprep.subr.bf16.mxu0 %v15549_v36  ;;  %9678 = vmatprep.subr.bf16.mxu1 %v15552_v16  ;;  %v15628_v36 = vld [vmem:[%s20336_s3 + $0x2028] ss:$16 sps:$4 sm:$0xff]   ;;  %v15633_v16 = vld [vmem:[%s20336_s3 + $0x2044] ss:$16 sps:$4 sm:$0xff]  }
 0x997   : > { %9597 = vmatpush1.bf16.msra.mxu0 %v15547_v37  ;;  %9679 = vmatpush1.bf16.msra.mxu1 %v15550_v38  ;;  %v15636_v37 = vld [vmem:[%s20336_s3 + $0x204c] ss:$16 sps:$4 sm:$0xff]   ;;  %v15631_v38 = vld [vmem:[%s20336_s3 + $0x2040] ss:$16 sps:$4 sm:$0xff]  }
 0x998   : > { %9598 = vmatprep.subr.bf16.mxu0 %v15555_v40  ;;  %9680 = vmatprep.subr.bf16.mxu1 %v15558_v41  ;;  %v15634_v40 = vld [vmem:[%s20336_s3 + $0x2048] ss:$16 sps:$4 sm:$0xff]   ;;  %v15639_v41 = vld [vmem:[%s20336_s3 + $0x2064] ss:$16 sps:$4 sm:$0xff]  }
 0x99b   : > { %9599 = vmatpush1.bf16.msra.mxu0 %v15553_v42  ;;  %9681 = vmatpush1.bf16.msra.mxu1 %v15556_v21  ;;  %v15642_v42 = vld [vmem:[%s20336_s3 + $0x206c] ss:$16 sps:$4 sm:$0xff]   ;;  %v15637_v21 = vld [vmem:[%s20336_s3 + $0x2060] ss:$16 sps:$4 sm:$0xff]  }
 0x99c   : > { %9600 = vmatprep.subr.bf16.mxu0 %v15561_v43  ;;  %9682 = vmatprep.subr.bf16.mxu1 %v15564_v23  ;;  %v15640_v43 = vld [vmem:[%s20336_s3 + $0x2068] ss:$16 sps:$4 sm:$0xff]   ;;  %v15645_v23 = vld [vmem:[%s20336_s3 + $0x2084] ss:$16 sps:$4 sm:$0xff]  }
 0x99f   : > { %9601 = vmatpush1.bf16.msra.mxu0 %v15559_v44  ;;  %9683 = vmatpush1.bf16.msra.mxu1 %v15562_v51  ;;  %v15648_v44 = vld [vmem:[%s20336_s3 + $0x208c] ss:$16 sps:$4 sm:$0xff]   ;;  %v15643_v51 = vld [vmem:[%s20336_s3 + $0x2080] ss:$16 sps:$4 sm:$0xff]  }
 0x9a0   : > { %9602 = vmatprep.subr.bf16.mxu0 %v15567_v26  ;;  %9684 = vmatprep.subr.bf16.mxu1 %v15570_v53  ;;  %v15646_v26 = vld [vmem:[%s20336_s3 + $0x2088] ss:$16 sps:$4 sm:$0xff]   ;;  %v15651_v53 = vld [vmem:[%s20336_s3 + $0x20a4] ss:$16 sps:$4 sm:$0xff]  }
 0x9a3   : > { %9603 = vmatpush1.bf16.msra.mxu0 %v15565_v28  ;;  %9685 = vmatpush1.bf16.msra.mxu1 %v15568_v54  ;;  %v15654_v28 = vld [vmem:[%s20336_s3 + $0x20ac] ss:$16 sps:$4 sm:$0xff]   ;;  %v15649_v54 = vld [vmem:[%s20336_s3 + $0x20a0] ss:$16 sps:$4 sm:$0xff]  }
 0x9a4   : > { %9604 = vmatprep.subr.bf16.mxu0 %v15573_v56  ;;  %9686 = vmatprep.subr.bf16.mxu1 %v15576_v58  ;;  %v15652_v56 = vld [vmem:[%s20336_s3 + $0x20a8] ss:$16 sps:$4 sm:$0xff]   ;;  %v15657_v58 = vld [vmem:[%s20336_s3 + $0x20c4] ss:$16 sps:$4 sm:$0xff]  }
 0x9a7   : > { %9605 = vmatpush1.bf16.msra.mxu0 %v15571_v59  ;;  %9687 = vmatpush1.bf16.msra.mxu1 %v15574_v60  ;;  %v15660_v59 = vld [vmem:[%s20336_s3 + $0x20cc] ss:$16 sps:$4 sm:$0xff]   ;;  %v15655_v60 = vld [vmem:[%s20336_s3 + $0x20c0] ss:$16 sps:$4 sm:$0xff]  }
 0x9a8   : > { %9606 = vmatprep.subr.bf16.mxu0 %v15579_v34  ;;  %9688 = vmatprep.subr.bf16.mxu1 %v15582_v61  ;;  %v15658_v34 = vld [vmem:[%s20336_s3 + $0x20c8] ss:$16 sps:$4 sm:$0xff]   ;;  %v15663_v61 = vld [vmem:[%s20336_s3 + $0x20e4] ss:$16 sps:$4 sm:$0xff]  }
 0x9ab   : > { %9607 = vmatpush1.bf16.msra.mxu0 %v15577_v62  ;;  %9689 = vmatpush1.bf16.msra.mxu1 %v15580_v0  ;;  %v15666_v62 = vld [vmem:[%s20336_s3 + $0x20ec] ss:$16 sps:$4 sm:$0xff]   ;;  %v15661_v0 = vld [vmem:[%s20336_s3 + $0x20e0] ss:$16 sps:$4 sm:$0xff]  }
 0x9ac   : > { %9608 = vmatprep.subr.bf16.mxu0 %v15585_v39  ;;  %9690 = vmatprep.subr.bf16.mxu1 %v15588_v3  ;;  %v15664_v39 = vld [vmem:[%s20336_s3 + $0x20e8] ss:$16 sps:$4 sm:$0xff]   ;;  %v15669_v3 = vld [vmem:[%s20336_s3 + $0x2104] ss:$16 sps:$4 sm:$0xff]  }
 0x9af   : > { %9609 = vmatpush1.bf16.msra.mxu0 %v15583_v4  ;;  %9691 = vmatpush1.bf16.msra.mxu1 %v15586_v6  ;;  %v15672_v4 = vld [vmem:[%s20336_s3 + $0x210c] ss:$16 sps:$4 sm:$0xff]   ;;  %v15667_v6 = vld [vmem:[%s20336_s3 + $0x2100] ss:$16 sps:$4 sm:$0xff]  }
 0x9b0   : > { %9610 = vmatprep.subr.bf16.mxu0 %v15591_v7  ;;  %9692 = vmatprep.subr.bf16.mxu1 %v15594_v8  ;;  %v15670_v7 = vld [vmem:[%s20336_s3 + $0x2108] ss:$16 sps:$4 sm:$0xff]   ;;  %v15675_v8 = vld [vmem:[%s20336_s3 + $0x2124] ss:$16 sps:$4 sm:$0xff]  }
 0x9b3   : > { %9611 = vmatpush1.bf16.msra.mxu0 %v15589_v9  ;;  %9693 = vmatpush1.bf16.msra.mxu1 %v15592_v52  ;;  %v15678_v9 = vld [vmem:[%s20336_s3 + $0x212c] ss:$16 sps:$4 sm:$0xff]   ;;  %v15673_v52 = vld [vmem:[%s20336_s3 + $0x2120] ss:$16 sps:$4 sm:$0xff]  }
 0x9b4   : > { %9612 = vmatprep.subr.bf16.mxu0 %v15597_v10  ;;  %9694 = vmatprep.subr.bf16.mxu1 %v15600_v48  ;;  %v15676_v10 = vld [vmem:[%s20336_s3 + $0x2128] ss:$16 sps:$4 sm:$0xff]   ;;  %v15681_v48 = vld [vmem:[%s20336_s3 + $0x2144] ss:$16 sps:$4 sm:$0xff]  }
 0x9b7   : > { %9613 = vmatpush1.bf16.msra.mxu0 %v15595_v13  ;;  %9695 = vmatpush1.bf16.msra.mxu1 %v15598_v14  ;;  %v15684_v13 = vld [vmem:[%s20336_s3 + $0x214c] ss:$16 sps:$4 sm:$0xff]   ;;  %v15679_v14 = vld [vmem:[%s20336_s3 + $0x2140] ss:$16 sps:$4 sm:$0xff]  }
 0x9b8   : > { %9614 = vmatprep.subr.bf16.mxu0 %v15603_v57  ;;  %9696 = vmatprep.subr.bf16.mxu1 %v15606_v15  ;;  %v15682_v57 = vld [vmem:[%s20336_s3 + $0x2148] ss:$16 sps:$4 sm:$0xff]   ;;  %v15687_v15 = vld [vmem:[%s20336_s3 + $0x2164] ss:$16 sps:$4 sm:$0xff]  }
 0x9bb   : > { %9615 = vmatpush1.bf16.msra.mxu0 %v15601_v55  ;;  %9697 = vmatpush1.bf16.msra.mxu1 %v15604_v11  ;;  %v15690_v55 = vld [vmem:[%s20336_s3 + $0x216c] ss:$16 sps:$4 sm:$0xff]   ;;  %v15685_v11 = vld [vmem:[%s20336_s3 + $0x2160] ss:$16 sps:$4 sm:$0xff]  }
 0x9bc   : > { %9616 = vmatprep.subr.bf16.mxu0 %v15609_v18  ;;  %9698 = vmatprep.subr.bf16.mxu1 %v15612_v63  ;;  %v15693_v18 = vld [vmem:[%s20336_s3 + $0x2184] ss:$16 sps:$4 sm:$0xff]   ;;  %v15696_v63 = vld [vmem:[%s20336_s3 + $0x218c] ss:$16 sps:$4 sm:$0xff]  }
 0x9bf   : > { %9617 = vmatpush1.bf16.msra.mxu0 %v15607_v19  ;;  %9699 = vmatpush1.bf16.msra.mxu1 %v15610_v1  ;;  %v15691_v19 = vld [vmem:[%s20336_s3 + $0x2180] ss:$16 sps:$4 sm:$0xff]   ;;  %v15694_v1 = vld [vmem:[%s20336_s3 + $0x2188] ss:$16 sps:$4 sm:$0xff]  }
 0x9c0   : > { %9618 = vmatprep.subr.bf16.mxu0 %v15615_v22  ;;  %9700 = vmatprep.subr.bf16.mxu1 %v15618_v5  ;;  %v15702_v22 = vld [vmem:[%s20336_s3 + $0x21ac] ss:$16 sps:$4 sm:$0xff]   ;;  %v15697_v5 = vld [vmem:[%s20336_s3 + $0x21a0] ss:$16 sps:$4 sm:$0xff]  }
 0x9c3   : > { %9619 = vmatpush1.bf16.msra.mxu0 %v15613_v24  ;;  %9701 = vmatpush1.bf16.msra.mxu1 %v15616_v46  ;;  %v15700_v24 = vld [vmem:[%s20336_s3 + $0x21a8] ss:$16 sps:$4 sm:$0xff]   ;;  %v15705_v46 = vld [vmem:[%s20336_s3 + $0x21c4] ss:$16 sps:$4 sm:$0xff]  }
 0x9c4   : > { %10511 = vmatprep.subr.bf16.mxu0 %v15621_v27  ;;  %10593 = vmatprep.subr.bf16.mxu1 %v15624_v29  ;;  %v15703_v27 = vld [vmem:[%s20336_s3 + $0x21c0] ss:$16 sps:$4 sm:$0xff]   ;;  %v15706_v29 = vld [vmem:[%s20336_s3 + $0x21c8] ss:$16 sps:$4 sm:$0xff]  }
 0x9c6   : > { %9621 = vmatmul.mubr.bf16.vlgmr.msra.gmra.mrb[32].mxu0 %v8753_v12  ;;  %9703 = vmatmul.mubr.bf16.vlgmr.msra.gmra.mrb[32].mxu1 %v8753_v12  ;;  %v15709_v12 = vld [vmem:[%s20336_s3 + $0x21e0] ss:$16 sps:$4 sm:$0xff]  }
 0x9c7   : > { %10512 = vmatpush1.bf16.msra.mxu0 %v15619_v30  ;;  %10594 = vmatpush1.bf16.msra.mxu1 %v15622_v31  ;;  %v15711_v30 = vld [vmem:[%s20336_s3 + $0x21e4] ss:$16 sps:$4 sm:$0xff]   ;;  %v15714_v31 = vld [vmem:[%s20336_s3 + $0x21ec] ss:$16 sps:$4 sm:$0xff]  }
 0x9c8   : > { %10513 = vmatprep.subr.bf16.mxu0 %v15627_v32  ;;  %10595 = vmatprep.subr.bf16.mxu1 %v15630_v33  ;;  %v15712_v32 = vld [vmem:[%s20336_s3 + $0x21e8] ss:$16 sps:$4 sm:$0xff]   ;;  %v15717_v33 = vld [vmem:[%s20336_s3 + $0x2204] ss:$16 sps:$4 sm:$0xff]  }
 0x9cb   : > { %10514 = vmatpush1.bf16.msra.mxu0 %v15625_v35  ;;  %10596 = vmatpush1.bf16.msra.mxu1 %v15628_v36  ;;  %v15720_v35 = vld [vmem:[%s20336_s3 + $0x220c] ss:$16 sps:$4 sm:$0xff]  }
 0x9cc   : > { %10515 = vmatprep.subr.bf16.mxu0 %v15633_v16  ;;  %10597 = vmatprep.subr.bf16.mxu1 %v15636_v37  ;;  %v20020_v36 = vld [vmem:[%s20337_s4 + $0x1c] sm:$0xf] }
 0x9cd   : > { %v8890_v16 = vrot.slane %v20020_v36, %v16806_v47  ;;  %v8894_v37 = vrot.slane %v20020_v36, %v16814_v49 }
 0x9cf   : > { %10516 = vmatpush1.bf16.msra.mxu0 %v15631_v38  ;;  %10598 = vmatpush1.bf16.msra.mxu1 %v15634_v40  ;;  %v8902_v38 = vrot.slane %v20020_v36, %v16817_v50 }
 0x9d0   : > { %10517 = vmatprep.subr.bf16.mxu0 %v15639_v41  ;;  %10599 = vmatprep.subr.bf16.mxu1 %v15642_v42 }
 0x9d3   : > { %10518 = vmatpush1.bf16.msra.mxu0 %v15637_v21  ;;  %10600 = vmatpush1.bf16.msra.mxu1 %v15640_v43 }
 0x9d4   : > { %10519 = vmatprep.subr.bf16.mxu0 %v15645_v23  ;;  %10601 = vmatprep.subr.bf16.mxu1 %v15648_v44 }
 0x9d7   : > { %10520 = vmatpush1.bf16.msra.mxu0 %v15643_v51  ;;  %10602 = vmatpush1.bf16.msra.mxu1 %v15646_v26 }
 0x9d8   : > { %10521 = vmatprep.subr.bf16.mxu0 %v15651_v53  ;;  %10603 = vmatprep.subr.bf16.mxu1 %v15654_v28 }
 0x9db   : > { %10522 = vmatpush1.bf16.msra.mxu0 %v15649_v54  ;;  %10604 = vmatpush1.bf16.msra.mxu1 %v15652_v56 }
 0x9dc   : > { %10523 = vmatprep.subr.bf16.mxu0 %v15657_v58  ;;  %10605 = vmatprep.subr.bf16.mxu1 %v15660_v59 }
 0x9df   : > { %10524 = vmatpush1.bf16.msra.mxu0 %v15655_v60  ;;  %10606 = vmatpush1.bf16.msra.mxu1 %v15658_v34  ;;  %v15715_v60 = vld [vmem:[%s20336_s3 + $0x2200] ss:$16 sps:$4 sm:$0xff]   ;;  %v15718_v34 = vld [vmem:[%s20336_s3 + $0x2208] ss:$16 sps:$4 sm:$0xff]  }
 0x9e0   : > { %10525 = vmatprep.subr.bf16.mxu0 %v15663_v61  ;;  %10607 = vmatprep.subr.bf16.mxu1 %v15666_v62  ;;  %v15723_v62 = vld [vmem:[%s20336_s3 + $0x2224] ss:$16 sps:$4 sm:$0xff]  }
 0x9e3   : > { %10526 = vmatpush1.bf16.msra.mxu0 %v15661_v0  ;;  %10608 = vmatpush1.bf16.msra.mxu1 %v15664_v39  ;;  %v15726_v0 = vld [vmem:[%s20336_s3 + $0x222c] ss:$16 sps:$4 sm:$0xff]  }
 0x9e4   : > { %10527 = vmatprep.subr.bf16.mxu0 %v15669_v3  ;;  %10609 = vmatprep.subr.bf16.mxu1 %v15672_v4  ;;  %v15721_v3 = vld [vmem:[%s20336_s3 + $0x2220] ss:$16 sps:$4 sm:$0xff]   ;;  %v15724_v4 = vld [vmem:[%s20336_s3 + $0x2228] ss:$16 sps:$4 sm:$0xff]  }
 0x9e7   : > { %10528 = vmatpush1.bf16.msra.mxu0 %v15667_v6  ;;  %10610 = vmatpush1.bf16.msra.mxu1 %v15670_v7  ;;  %v15729_v6 = vld [vmem:[%s20336_s3 + $0x2244] ss:$16 sps:$4 sm:$0xff]   ;;  %v15732_v7 = vld [vmem:[%s20336_s3 + $0x224c] ss:$16 sps:$4 sm:$0xff]  }
 0x9e8   : > { %10529 = vmatprep.subr.bf16.mxu0 %v15675_v8  ;;  %10611 = vmatprep.subr.bf16.mxu1 %v15678_v9  ;;  %v15727_v8 = vld [vmem:[%s20336_s3 + $0x2240] ss:$16 sps:$4 sm:$0xff]   ;;  %v15730_v9 = vld [vmem:[%s20336_s3 + $0x2248] ss:$16 sps:$4 sm:$0xff]  }
 0x9eb   : > { %10530 = vmatpush1.bf16.msra.mxu0 %v15673_v52  ;;  %10612 = vmatpush1.bf16.msra.mxu1 %v15676_v10  ;;  %v15735_v52 = vld [vmem:[%s20336_s3 + $0x2264] ss:$16 sps:$4 sm:$0xff]   ;;  %v15738_v10 = vld [vmem:[%s20336_s3 + $0x226c] ss:$16 sps:$4 sm:$0xff]  }
 0x9ec   : > { %10531 = vmatprep.subr.bf16.mxu0 %v15681_v48  ;;  %10613 = vmatprep.subr.bf16.mxu1 %v15684_v13  ;;  %v15733_v48 = vld [vmem:[%s20336_s3 + $0x2260] ss:$16 sps:$4 sm:$0xff]   ;;  %v15736_v13 = vld [vmem:[%s20336_s3 + $0x2268] ss:$16 sps:$4 sm:$0xff]  }
 0x9ef   : > { %10532 = vmatpush1.bf16.msra.mxu0 %v15679_v14  ;;  %10614 = vmatpush1.bf16.msra.mxu1 %v15682_v57  ;;  %v15741_v14 = vld [vmem:[%s20336_s3 + $0x2284] ss:$16 sps:$4 sm:$0xff]   ;;  %v15744_v57 = vld [vmem:[%s20336_s3 + $0x228c] ss:$16 sps:$4 sm:$0xff]  }
 0x9f0   : > { %10533 = vmatprep.subr.bf16.mxu0 %v15687_v15  ;;  %10615 = vmatprep.subr.bf16.mxu1 %v15690_v55  ;;  %v15739_v15 = vld [vmem:[%s20336_s3 + $0x2280] ss:$16 sps:$4 sm:$0xff]   ;;  %v15742_v55 = vld [vmem:[%s20336_s3 + $0x2288] ss:$16 sps:$4 sm:$0xff]  }
 0x9f3   : > { %10534 = vmatpush1.bf16.msra.mxu0 %v15685_v11  ;;  %10616 = vmatpush1.bf16.msra.mxu1 %v15688_v17  ;;  %v15747_v11 = vld [vmem:[%s20336_s3 + $0x22a4] ss:$16 sps:$4 sm:$0xff]   ;;  %v15750_v17 = vld [vmem:[%s20336_s3 + $0x22ac] ss:$16 sps:$4 sm:$0xff]  }
 0x9f4   : > { %10535 = vmatprep.subr.bf16.mxu0 %v15693_v18  ;;  %10617 = vmatprep.subr.bf16.mxu1 %v15696_v63  ;;  %v15745_v18 = vld [vmem:[%s20336_s3 + $0x22a0] ss:$16 sps:$4 sm:$0xff]   ;;  %v15748_v63 = vld [vmem:[%s20336_s3 + $0x22a8] ss:$16 sps:$4 sm:$0xff]  }
 0x9f7   : > { %10536 = vmatpush1.bf16.msra.mxu0 %v15691_v19  ;;  %10618 = vmatpush1.bf16.msra.mxu1 %v15694_v1  ;;  %v15753_v19 = vld [vmem:[%s20336_s3 + $0x22c4] ss:$16 sps:$4 sm:$0xff]   ;;  %v15756_v1 = vld [vmem:[%s20336_s3 + $0x22cc] ss:$16 sps:$4 sm:$0xff]  }
 0x9f8   : > { %10537 = vmatprep.subr.bf16.mxu0 %v15699_v20  ;;  %10619 = vmatprep.subr.bf16.mxu1 %v15702_v22  ;;  %v15751_v20 = vld [vmem:[%s20336_s3 + $0x22c0] ss:$16 sps:$4 sm:$0xff]   ;;  %v15754_v22 = vld [vmem:[%s20336_s3 + $0x22c8] ss:$16 sps:$4 sm:$0xff]  }
 0x9fb   : > { %10538 = vmatpush1.bf16.msra.mxu0 %v15697_v5  ;;  %10620 = vmatpush1.bf16.msra.mxu1 %v15700_v24  ;;  %v15759_v5 = vld [vmem:[%s20336_s3 + $0x22e4] ss:$16 sps:$4 sm:$0xff]   ;;  %v15762_v24 = vld [vmem:[%s20336_s3 + $0x22ec] ss:$16 sps:$4 sm:$0xff]  }
 0x9fc   : > { %10539 = vmatprep.subr.bf16.mxu0 %v15705_v46  ;;  %10621 = vmatprep.subr.bf16.mxu1 %v15708_v25  ;;  %v15757_v46 = vld [vmem:[%s20336_s3 + $0x22e0] ss:$16 sps:$4 sm:$0xff]   ;;  %v15760_v25 = vld [vmem:[%s20336_s3 + $0x22e8] ss:$16 sps:$4 sm:$0xff]  }
 0x9ff   : > { %10540 = vmatpush1.bf16.msra.mxu0 %v15703_v27  ;;  %10622 = vmatpush1.bf16.msra.mxu1 %v15706_v29  ;;  %v15765_v27 = vld [vmem:[%s20336_s3 + $0x2304] ss:$16 sps:$4 sm:$0xff]   ;;  %v15768_v29 = vld [vmem:[%s20336_s3 + $0x230c] ss:$16 sps:$4 sm:$0xff]  }
 0xa00   : > { %10541 = vmatprep.subr.bf16.mxu0 %v15711_v30  ;;  %10623 = vmatprep.subr.bf16.mxu1 %v15714_v31  ;;  %v15763_v30 = vld [vmem:[%s20336_s3 + $0x2300] ss:$16 sps:$4 sm:$0xff]   ;;  %v15766_v31 = vld [vmem:[%s20336_s3 + $0x2308] ss:$16 sps:$4 sm:$0xff]  }
 0xa03   : > { %10542 = vmatpush1.bf16.msra.mxu0 %v15709_v12  ;;  %10624 = vmatpush1.bf16.msra.mxu1 %v15712_v32  ;;  %v15771_v12 = vld [vmem:[%s20336_s3 + $0x2324] ss:$16 sps:$4 sm:$0xff]   ;;  %v15774_v32 = vld [vmem:[%s20336_s3 + $0x232c] ss:$16 sps:$4 sm:$0xff]  }
 0xa04   : > { %10552 = vmatprep.subr.bf16.mxu0 %v15717_v33  ;;  %10634 = vmatprep.subr.bf16.mxu1 %v15720_v35  ;;  %v15769_v33 = vld [vmem:[%s20336_s3 + $0x2320] ss:$16 sps:$4 sm:$0xff]   ;;  %v15772_v35 = vld [vmem:[%s20336_s3 + $0x2328] ss:$16 sps:$4 sm:$0xff]  }
 0xa99   : > { %v9622_v40 = vpop.f32.mrb[32].mxu0  ;;  %v20028_v41 = vpop.f32.mrb[32].mxu1 }
 0xa9a   : > { %v13626_v42 = vadd.f32 %v9622_v40, %v8890_v16  ;;  %v9624_v21 = vpop.f32.mrb[33].mxu0  ;;  %v9706_v43 = vpop.f32.mrb[33].mxu1  ;;  %v15777_v16 = vld [vmem:[%s20336_s3 + $0x2344] ss:$16 sps:$4 sm:$0xff]   ;;  %v15778_v40 = vld [vmem:[%s20336_s3 + $0x2348] ss:$16 sps:$4 sm:$0xff]  }
 0xa9b   : > { %v13627_v23 = vadd.f32 %v9624_v21, %v8894_v37  ;;  %v13629_v44 = vadd.f32 %v9706_v43, %v8902_v38  ;;  %v9626_v51 = vpop.f32.mrb[34].mxu0  ;;  %v9708_v26 = vpop.f32.mrb[34].mxu1  ;;  %v15780_v37 = vld [vmem:[%s20336_s3 + $0x234c] ss:$16 sps:$4 sm:$0xff]   ;;  %v15775_v38 = vld [vmem:[%s20336_s3 + $0x2340] ss:$16 sps:$4 sm:$0xff]  }
 0xa9c   : > { %v9711_v53 = vmax.f32 %v13626_v42, 0.0  ;;  %v9627_v28 = vpop.f32.mrb[35].mxu0  ;;  %v9709_v54 = vpop.f32.mrb[35].mxu1  ;;  %v15783_v42 = vld [vmem:[%s20336_s3 + $0x2364] ss:$16 sps:$4 sm:$0xff]  }
 0xa9d   : > { %v9712_v56 = vmax.f32 %v13627_v23, 0.0  ;;  %v9714_v58 = vmax.f32 %v13629_v44, 0.0  ;;  %v15786_v21 = vld [vmem:[%s20336_s3 + $0x236c] ss:$16 sps:$4 sm:$0xff]   ;;  %v15781_v43 = vld [vmem:[%s20336_s3 + $0x2360] ss:$16 sps:$4 sm:$0xff]  }
 0xa9e   : > { %v9715_v61 = vpack.c.bf16 %v9711_v53, %v9711_v53  ;;  %v15784_v23 = vld [vmem:[%s20336_s3 + $0x2368] ss:$16 sps:$4 sm:$0xff]   ;;  %v15789_v44 = vld [vmem:[%s20336_s3 + $0x2384] ss:$16 sps:$4 sm:$0xff]   ;;  %v15792_v51 = vld [vmem:[%s20336_s3 + $0x238c] ss:$16 sps:$4 sm:$0xff]  }
 0xa9f   : > { %v9716_v59 = vpack.c.bf16 %v9712_v56, %v9712_v56  ;;  %v9718_v39 = vpack.c.bf16 %v9714_v58, %v9714_v58  ;;  %v15787_v26 = vld [vmem:[%s20336_s3 + $0x2380] ss:$16 sps:$4 sm:$0xff]   ;;  %v15790_v53 = vld [vmem:[%s20336_s3 + $0x2388] ss:$16 sps:$4 sm:$0xff]   ;;  %v15795_v28 = vld [vmem:[%s20336_s3 + $0x23a4] ss:$16 sps:$4 sm:$0xff]  }
 0xaa0   : > { %v15798_v54 = vld [vmem:[%s20336_s3 + $0x23ac] ss:$16 sps:$4 sm:$0xff]   ;;  %v15793_v56 = vld [vmem:[%s20336_s3 + $0x23a0] ss:$16 sps:$4 sm:$0xff]   ;;  %v15796_v58 = vld [vmem:[%s20336_s3 + $0x23a8] ss:$16 sps:$4 sm:$0xff]  }
 0xaa1   : > { %10543 = vmatprep.mubr.bf16.mxu0 %v9716_v59  ;;  %10625 = vmatprep.mubr.bf16.mxu1 %v9716_v59  ;;  %v8898_v59 = vrot.slane %v20020_v36, %v16984_v2  ;;  %v15802_v36 = vld [vmem:[%s20336_s3 + $0x23c8] ss:$16 sps:$4 sm:$0xff]  }
 0xaa2   : > { %10544 = vmatmul.mubr.bf16.vlgmr.msra.gmra.mrb[36].mxu0 %v9715_v61  ;;  %10626 = vmatmul.mubr.bf16.vlgmr.msra.gmra.mrb[36].mxu1 %v9715_v61  ;;  %v15799_v61 = vld [vmem:[%s20336_s3 + $0x23c0] ss:$16 sps:$4 sm:$0xff]  }
 0xaa3   : > { %10553 = vmatpush1.bf16.msra.mxu0 %v15715_v60  ;;  %10635 = vmatpush1.bf16.msra.mxu1 %v15718_v34  ;;  %v15801_v60 = vld [vmem:[%s20336_s3 + $0x23c4] ss:$16 sps:$4 sm:$0xff]   ;;  %v15804_v34 = vld [vmem:[%s20336_s3 + $0x23cc] ss:$16 sps:$4 sm:$0xff]  }
 0xaa4   : > { %10584 = vmatprep.mubr.bf16.mxu0 %v9718_v39  ;;  %10666 = vmatprep.mubr.bf16.mxu1 %v9718_v39  ;;  %v15810_v39 = vld [vmem:[%s20336_s3 + $0x23ec] ss:$16 sps:$4 sm:$0xff]  }
 0xaa5   : > { %10554 = vmatprep.subr.bf16.mxu0 %v15723_v62  ;;  %10636 = vmatprep.subr.bf16.mxu1 %v15726_v0  ;;  %v13628_v62 = vadd.f32 %v20028_v41, %v8898_v59  ;;  %v15807_v0 = vld [vmem:[%s20336_s3 + $0x23e4] ss:$16 sps:$4 sm:$0xff]   ;;  %v15808_v41 = vld [vmem:[%s20336_s3 + $0x23e8] ss:$16 sps:$4 sm:$0xff]  }
 0xaa7   : > { %10555 = vmatpush1.bf16.msra.mxu0 %v15721_v3  ;;  %10637 = vmatpush1.bf16.msra.mxu1 %v15724_v4  ;;  %v15805_v3 = vld [vmem:[%s20336_s3 + $0x23e0] ss:$16 sps:$4 sm:$0xff]   ;;  %v9713_v4 = vmax.f32 %v13628_v62, 0.0 }
 0xaa8   : > { %10556 = vmatprep.subr.bf16.mxu0 %v15729_v6  ;;  %10638 = vmatprep.subr.bf16.mxu1 %v15732_v7  ;;  %v15811_v6 = vld [vmem:[%s20338_s5 + $0x40] sm:$0xff]  }
 0xaa9   : > { %v15812_v7 = vld [vmem:[%s20338_s5 + $0xc0] sm:$0xff]  }
 0xaab   : > { %10557 = vmatpush1.bf16.msra.mxu0 %v15727_v8  ;;  %10639 = vmatpush1.bf16.msra.mxu1 %v15730_v9  ;;  %v15813_v8 = vld [vmem:[%s20338_s5] sm:$0xff]  }
 0xaac   : > { %10558 = vmatprep.subr.bf16.mxu0 %v15735_v52  ;;  %10640 = vmatprep.subr.bf16.mxu1 %v15738_v10  ;;  %v15814_v9 = vld [vmem:[%s20338_s5 + $0x80] sm:$0xff]   ;;  %v9717_v52 = vpack.c.bf16 %v9713_v4, %v9713_v4  ;;  %v15815_v10 = vld [vmem:[%s20338_s5 + $0x48] sm:$0xff]  }
 0xaaf   : > { %10559 = vmatpush1.bf16.msra.mxu0 %v15733_v48  ;;  %10641 = vmatpush1.bf16.msra.mxu1 %v15736_v13  ;;  %v15816_v48 = vld [vmem:[%s20338_s5 + $0xc8] sm:$0xff]  }
 0xab0   : > { %10560 = vmatprep.subr.bf16.mxu0 %v15741_v14  ;;  %10642 = vmatprep.subr.bf16.mxu1 %v15744_v57  ;;  %v15817_v13 = vld [vmem:[%s20338_s5 + $0x8] sm:$0xff]   ;;  %v15819_v57 = vld [vmem:[%s20338_s5 + $0x50] sm:$0xff]  }
 0xab1   : > { %v15818_v14 = vld [vmem:[%s20338_s5 + $0x88] sm:$0xff]  }
 0xab3   : > { %10561 = vmatpush1.bf16.msra.mxu0 %v15739_v15  ;;  %10643 = vmatpush1.bf16.msra.mxu1 %v15742_v55  ;;  %v15820_v15 = vld [vmem:[%s20338_s5 + $0xd0] sm:$0xff]  }
 0xab4   : > { %10562 = vmatprep.subr.bf16.mxu0 %v15747_v11  ;;  %10644 = vmatprep.subr.bf16.mxu1 %v15750_v17  ;;  %v15821_v55 = vld [vmem:[%s20338_s5 + $0x10] sm:$0xff]   ;;  %v15823_v17 = vld [vmem:[%s20338_s5 + $0x58] sm:$0xff]  }
 0xab5   : > { %v15822_v11 = vld [vmem:[%s20338_s5 + $0x90] sm:$0xff]  }
 0xab7   : > { %10563 = vmatpush1.bf16.msra.mxu0 %v15745_v18  ;;  %10645 = vmatpush1.bf16.msra.mxu1 %v15748_v63  ;;  %v15824_v18 = vld [vmem:[%s20338_s5 + $0xd8] sm:$0xff]  }
 0xab8   : > { %10564 = vmatprep.subr.bf16.mxu0 %v15753_v19  ;;  %10646 = vmatprep.subr.bf16.mxu1 %v15756_v1  ;;  %v15825_v63 = vld [vmem:[%s20338_s5 + $0x18] sm:$0xff]   ;;  %v15827_v1 = vld [vmem:[%s20338_s5 + $0x60] sm:$0xff]  }
 0xab9   : > { %v15826_v19 = vld [vmem:[%s20338_s5 + $0x98] sm:$0xff]  }
 0xabb   : > { %10565 = vmatpush1.bf16.msra.mxu0 %v15751_v20  ;;  %10647 = vmatpush1.bf16.msra.mxu1 %v15754_v22  ;;  %v15828_v20 = vld [vmem:[%s20338_s5 + $0xe0] sm:$0xff]  }
 0xabc   : > { %10566 = vmatprep.subr.bf16.mxu0 %v15759_v5  ;;  %10648 = vmatprep.subr.bf16.mxu1 %v15762_v24  ;;  %v15829_v22 = vld [vmem:[%s20338_s5 + $0x20] sm:$0xff]   ;;  %v15831_v24 = vld [vmem:[%s20338_s5 + $0x68] sm:$0xff]  }
 0xabd   : > { %v15830_v5 = vld [vmem:[%s20338_s5 + $0xa0] sm:$0xff]  }
 0xabf   : > { %10567 = vmatpush1.bf16.msra.mxu0 %v15757_v46  ;;  %10649 = vmatpush1.bf16.msra.mxu1 %v15760_v25  ;;  %v15832_v46 = vld [vmem:[%s20338_s5 + $0xe8] sm:$0xff]  }
 0xac0   : > { %10568 = vmatprep.subr.bf16.mxu0 %v15765_v27  ;;  %10650 = vmatprep.subr.bf16.mxu1 %v15768_v29  ;;  %v15833_v25 = vld [vmem:[%s20338_s5 + $0x28] sm:$0xff]   ;;  %v15835_v29 = vld [vmem:[%s20338_s5 + $0x70] sm:$0xff]  }
 0xac1   : > { %v15834_v27 = vld [vmem:[%s20338_s5 + $0xa8] sm:$0xff]  }
 0xac3   : > { %10569 = vmatpush1.bf16.msra.mxu0 %v15763_v30  ;;  %10651 = vmatpush1.bf16.msra.mxu1 %v15766_v31  ;;  %v15836_v30 = vld [vmem:[%s20338_s5 + $0xf0] sm:$0xff]  }
 0xac4   : > { %10570 = vmatprep.subr.bf16.mxu0 %v15771_v12  ;;  %10652 = vmatprep.subr.bf16.mxu1 %v15774_v32  ;;  %v15837_v31 = vld [vmem:[%s20338_s5 + $0x30] sm:$0xff]   ;;  %v15839_v32 = vld [vmem:[%s20338_s5 + $0x78] sm:$0xff]  }
 0xac5   : > { %v15838_v12 = vld [vmem:[%s20338_s5 + $0xb0] sm:$0xff]  }
 0xac7   : > { %10571 = vmatpush1.bf16.msra.mxu0 %v15769_v33  ;;  %10653 = vmatpush1.bf16.msra.mxu1 %v15772_v35  ;;  %v15840_v33 = vld [vmem:[%s20338_s5 + $0xf8] sm:$0xff]  }
 0xac8   : > { %10572 = vmatprep.subr.bf16.mxu0 %v15777_v16  ;;  %10654 = vmatprep.subr.bf16.mxu1 %v15780_v37  ;;  %v15841_v35 = vld [vmem:[%s20338_s5 + $0x38] sm:$0xff]   ;;  %v13386_v37 = vld [vmem:[%s20337_s4 + $0x20] sm:$0xf] }
 0xac9   : > { %v15842_v16 = vld [vmem:[%s20338_s5 + $0xb8] sm:$0xff]  }
 0xacb   : > { %10573 = vmatpush1.bf16.msra.mxu0 %v15775_v38  ;;  %10655 = vmatpush1.bf16.msra.mxu1 %v15778_v40  ;;  %v9854_v38 = vrot.slane %v13386_v37, %v16806_v47  ;;  %v9862_v40 = vrot.slane %v13386_v37, %v16984_v2 }
 0xacc   : > { %10574 = vmatprep.subr.bf16.mxu0 %v15783_v42  ;;  %10656 = vmatprep.subr.bf16.mxu1 %v15786_v21  ;;  %v9858_v42 = vrot.slane %v13386_v37, %v16814_v49  ;;  %v9866_v21 = vrot.slane %v13386_v37, %v16817_v50 }
 0xacf   : > { %10575 = vmatpush1.bf16.msra.mxu0 %v15781_v43  ;;  %10657 = vmatpush1.bf16.msra.mxu1 %v15784_v23 }
 0xad0   : > { %10576 = vmatprep.subr.bf16.mxu0 %v15789_v44  ;;  %10658 = vmatprep.subr.bf16.mxu1 %v15792_v51 }
 0xad3   : > { %10577 = vmatpush1.bf16.msra.mxu0 %v15787_v26  ;;  %10659 = vmatpush1.bf16.msra.mxu1 %v15790_v53 }
 0xad4   : > { %10578 = vmatprep.subr.bf16.mxu0 %v15795_v28  ;;  %10660 = vmatprep.subr.bf16.mxu1 %v15798_v54 }
 0xad7   : > { %10579 = vmatpush1.bf16.msra.mxu0 %v15793_v56  ;;  %10661 = vmatpush1.bf16.msra.mxu1 %v15796_v58 }
 0xad8   : > { %10580 = vmatprep.subr.bf16.mxu0 %v15801_v60  ;;  %10662 = vmatprep.subr.bf16.mxu1 %v15804_v34 }
 0xadb   : > { %10581 = vmatpush1.bf16.msra.mxu0 %v15799_v61  ;;  %10663 = vmatpush1.bf16.msra.mxu1 %v15802_v36 }
 0xadc   : > { %10582 = vmatprep.subr.bf16.mxu0 %v15807_v0  ;;  %10664 = vmatprep.subr.bf16.mxu1 %v15810_v39 }
 0xadf   : > { %10583 = vmatpush1.bf16.msra.mxu0 %v15805_v3  ;;  %10665 = vmatpush1.bf16.msra.mxu1 %v15808_v41  ;;  %v13515_v3 = vld [vmem:[%s20339_s6] ss:$0 sm:$0xff] }
 0xae0   : > { %13550 = vmatprep.subr.bf16.mxu0 %v15811_v6  ;;  %13572 = vmatprep.subr.bf16.mxu1 %v15812_v7  ;;  %v11027_v6 = vand.u32 127, %v508_v45 }
 0xae2   : > { %10585 = vmatmul.mubr.bf16.vlgmr.msra.gmra.mrb[36].mxu0 %v9717_v52  ;;  %10667 = vmatmul.mubr.bf16.vlgmr.msra.gmra.mrb[36].mxu1 %v9717_v52  ;;  %vm11028_vm0 = vcmp.lt.s32.totalorder %v11027_v6, 10 }
 0xae3   : > { %13551 = vmatpush3.bf16.msra.mxu0 %v15813_v8  ;;  %13573 = vmatpush3.bf16.msra.mxu1 %v15814_v9 }
 0xae4   : > { %13552 = vmatprep.subr.bf16.mxu0 %v15815_v10  ;;  %13574 = vmatprep.subr.bf16.mxu1 %v15816_v48 }
 0xae7   : > { %13553 = vmatpush3.bf16.msra.mxu0 %v15817_v13  ;;  %13575 = vmatpush3.bf16.msra.mxu1 %v15818_v14 }
 0xae8   : > { %13554 = vmatprep.subr.bf16.mxu0 %v15819_v57  ;;  %13576 = vmatprep.subr.bf16.mxu1 %v15820_v15 }
 0xaeb   : > { %13555 = vmatpush3.bf16.msra.mxu0 %v15821_v55  ;;  %13577 = vmatpush3.bf16.msra.mxu1 %v15822_v11 }
 0xaec   : > { %13556 = vmatprep.subr.bf16.mxu0 %v15823_v17  ;;  %13578 = vmatprep.subr.bf16.mxu1 %v15824_v18 }
 0xaef   : > { %13557 = vmatpush3.bf16.msra.mxu0 %v15825_v63  ;;  %13579 = vmatpush3.bf16.msra.mxu1 %v15826_v19 }
 0xaf0   : > { %13558 = vmatprep.subr.bf16.mxu0 %v15827_v1  ;;  %13580 = vmatprep.subr.bf16.mxu1 %v15828_v20 }
 0xaf3   : > { %13559 = vmatpush3.bf16.msra.mxu0 %v15829_v22  ;;  %13581 = vmatpush3.bf16.msra.mxu1 %v15830_v5 }
 0xaf4   : > { %13560 = vmatprep.subr.bf16.mxu0 %v15831_v24  ;;  %13582 = vmatprep.subr.bf16.mxu1 %v15832_v46 }
 0xaf7   : > { %13561 = vmatpush3.bf16.msra.mxu0 %v15833_v25  ;;  %13583 = vmatpush3.bf16.msra.mxu1 %v15834_v27 }
 0xaf8   : > { %13562 = vmatprep.subr.bf16.mxu0 %v15835_v29  ;;  %13584 = vmatprep.subr.bf16.mxu1 %v15836_v30 }
 0xafb   : > { %13563 = vmatpush3.bf16.msra.mxu0 %v15837_v31  ;;  %13585 = vmatpush3.bf16.msra.mxu1 %v15838_v12 }
 0xafc   : > { %13564 = vmatprep.subr.bf16.mxu0 %v15839_v32  ;;  %13586 = vmatprep.subr.bf16.mxu1 %v15840_v33 }
 0xaff   : > { %13565 = vmatpush3.bf16.msra.mxu0 %v15841_v35  ;;  %13587 = vmatpush3.bf16.msra.mxu1 %v15842_v16 }
 0xbb5   : > { %v10586_v43 = vpop.f32.mrb[36].mxu0  ;;  %v10668_v23 = vpop.f32.mrb[36].mxu1 }
 0xbb6   : > { %v13630_v44 = vadd.f32 %v10586_v43, %v9854_v38  ;;  %v13632_v51 = vadd.f32 %v10668_v23, %v9862_v40  ;;  %v10588_v26 = vpop.f32.mrb[37].mxu0  ;;  %v10670_v53 = vpop.f32.mrb[37].mxu1 }
 0xbb7   : > { %v13631_v28 = vadd.f32 %v10588_v26, %v9858_v42  ;;  %v13633_v54 = vadd.f32 %v10670_v53, %v9866_v21  ;;  %v10590_v56 = vpop.f32.mrb[38].mxu0  ;;  %v10672_v58 = vpop.f32.mrb[38].mxu1 }
 0xbb8   : > { %v10675_v59 = vmax.f32 %v13630_v44, 0.0  ;;  %v10677_v60 = vmax.f32 %v13632_v51, 0.0  ;;  %v10591_v34 = vpop.f32.mrb[39].mxu0  ;;  %v10673_v47 = vpop.f32.mrb[39].mxu1 }
 0xbb9   : > { %v10676_v61 = vmax.f32 %v13631_v28, 0.0  ;;  %v10678_v2 = vmax.f32 %v13633_v54, 0.0 }
 0xbba   : > { %v10679_v62 = vpack.c.bf16 %v10675_v59, %v10675_v59  ;;  %v10681_v50 = vpack.c.bf16 %v10677_v60, %v10677_v60 }
 0xbbb   : > { %v10680_v36 = vpack.c.bf16 %v10676_v61, %v10676_v61  ;;  %v10682_v49 = vpack.c.bf16 %v10678_v2, %v10678_v2 }
 0xbbd   : > { %10978 = vmatprep.mubr.bf16.mxu0 %v10680_v36  ;;  %11018 = vmatprep.mubr.bf16.mxu1 %v10682_v49 }
 0xbbe   : > { %10979 = vmatmul.mubr.bf16.vlgmr.msra.gmra.mrb[40].mxu0 %v10679_v62  ;;  %11019 = vmatmul.mubr.bf16.vlgmr.msra.gmra.mrb[40].mxu1 %v10681_v50 }
 0xc91   : > { %v13566_v0 = vpop.f32.mrb[40].mxu0  ;;  %v13588_v39 = vpop.f32.mrb[40].mxu1 }
 0xc92   : > { %v13567_v41 = vpop.f32.mrb[41].mxu0  ;;  %v13589_v4 = vpop.f32.mrb[41].mxu1 }
 0xc93   : > { %v13568_v7 = vadd.f32 %v13567_v41, %v13566_v0  ;;  %v13590_v8 = vadd.f32 %v13589_v4, %v13588_v39  ;;  %v13569_v9 = vpop.f32.mrb[42].mxu0  ;;  %v13591_v52 = vpop.f32.mrb[42].mxu1 }
 0xc94   : > { %v13570_v10 = vpop.f32.mrb[43].mxu0  ;;  %v13592_v48 = vpop.f32.mrb[43].mxu1 }
 0xc95   : > { %v10981_v13 = vadd.f32 %v13568_v7, %v13515_v3 }
 0xc97   : > { %v11021_v14 = vadd.f32 %v13590_v8, %v10981_v13 }
 0xc99   : > { %v11029_v57 = vsel %vm11028_vm0, %v11021_v14, -inf }
 0xc9a   : > { %11030 = vmax.xlane.f32.xlu0 %v11029_v57 }
 0xd27   : > { %v11031_v15 = vpop.xlane.xlu0 %11030 }
 0xd28   : > { %v11032_v55 = vsub.f32 %v11029_v57, %v11031_v15 }
 0xd2a   : > { %v11033_v11 = vmul.f32 1.442695, %v11032_v55 }
 0xd2c   : > { %15843 = vpow2.f32 %v11033_v11 }
 0xd36   : > { %v15844_v17 = vpop.eup %15843 }
 0xd37   : > { %11035 = vadd.xlane.f32.xlu0 %v15844_v17 }
 0xdc4   : > { %v11036_v18 = vpop.xlane.xlu0 %11035 }
 0xdc5   : > { %15845 = vrcp.f32 %v11036_v18 }
 0xdcf   : > { %v15846_v45 = vpop.eup %15845 }
 0xdd0   : > { %v11038_v63 = vmul.f32 %v15846_v45, %v15844_v17 }
 0xdd2   : > { %11039 = vst [vmem:[%s276_s9] sm:$0xff] %v11038_v63 }
 0xdd3 PF: > { %s17_s24 = sadd.s32 1, %s15853_s24  }
 0xdd4   : > { %p14_p4 = scmp.ge.s32.totalorder %s17_s24, 6  }
 0xdd6   :  { %16 = sbr.rel (!%p14_p4) target bundleno = 1 (0x1), region = 94 }

</bundles_post_ra>
